<compile_context>
chip_gen: v5e
topology: v5e:2x2
jax: 0.10.0
libtpu: 0.0.40
codegen_flags: <defaults>
</compile_context>

<pallas_src>
import functools
import math

import numpy as np
import jax
import jax.numpy as jnp
from jax import lax
from jax.experimental import pallas as pl
from jax.experimental.pallas import tpu as pltpu


# ---------------------------------------------------------------------------
# Host-side operator-matrix construction (shared / cached)
# ---------------------------------------------------------------------------
_CACHE = {}


def _cached(key, builder):
    if key not in _CACHE:
        _CACHE[key] = jnp.asarray(builder())
    return _CACHE[key]


def _shift_matrix(H, W, dh, dw):
    """(HW, HW) matrix: (S @ x)[h*W+w] = x[(h+dh)*W + (w+dw)] (zero outside)."""
    S = np.zeros((H * W, H * W), np.float32)
    for h in range(H):
        hs = h + dh
        if hs < 0 or hs >= H:
            continue
        for w in range(W):
            ws = w + dw
            if 0 <= ws < W:
                S[h * W + w, hs * W + ws] = 1.0
    return S


def dw_shift_mats(H, W, d):
    """(9, HW, HW) shift matrices for a 3x3 depthwise conv with dilation d, padding d."""
    return _cached(("dw", H, W, d), lambda: np.stack(
        [_shift_matrix(H, W, (kh - 1) * d, (kw - 1) * d)
         for kh in range(3) for kw in range(3)]))


def dase_shift_mats(H, W, d):
    """(12, HW, HW): [H d=1, W d=1, H d=d, W d=d] x 3 taps each."""
    def build():
        mats = []
        for dil, axis in ((1, 0), (1, 1), (d, 0), (d, 1)):
            for k in range(3):
                off = (k - 1) * dil
                dh, dwid = (off, 0) if axis == 0 else (0, off)
                mats.append(_shift_matrix(H, W, dh, dwid))
        return np.stack(mats)
    return _cached(("dase_s", H, W, d), build)


def pool_gather_mats(H, W):
    """(4, HWo, HWi) gather matrices; max over the 4 gathered maps == 2x2/2 ceil-mode maxpool."""
    def build():
        Ho, Wo = -(-H // 2), -(-W // 2)
        G = np.zeros((4, Ho * Wo, H * W), np.float32)
        for ho in range(Ho):
            for wo in range(Wo):
                for k, (dh, dwid) in enumerate(((0, 0), (0, 1), (1, 0), (1, 1))):
                    h, w = 2 * ho + dh, 2 * wo + dwid
                    if h >= H or w >= W:          # ceil_mode: window clipped to valid region
                        h, w = 2 * ho, 2 * wo
                    G[k, ho * Wo + wo, h * W + w] = 1.0
        return G
    return _cached(("pool", H, W), build)


def upsample_mat(Ho, Wo, Hi, Wi):
    """(HoWo, HiWi) bilinear upsample operator, align_corners=True."""
    def u1(out, inp):
        U = np.zeros((out, inp), np.float32)
        if inp == 1:
            U[:, 0] = 1.0
            return U
        if out == 1:
            U[0, 0] = 1.0
            return U
        for o in range(out):
            src = o * (inp - 1) / (out - 1)
            i0 = min(int(math.floor(src)), inp - 1)
            i1 = min(i0 + 1, inp - 1)
            f = src - i0
            U[o, i0] += 1.0 - f
            U[o, i1] += f
        return U
    return _cached(("up", Ho, Wo, Hi, Wi), lambda: np.kron(u1(Ho, Hi), u1(Wo, Wi)))


# ---------------------------------------------------------------------------
# Pallas kernels
# ---------------------------------------------------------------------------
def _rebnconv_kernel(*refs, pool_a, up_a, has_b, use_se, extra_se, add_res):
    """Fused [maxpool] -> [upsample+concat] -> dw3x3 -> 1x1 -> BN -> ReLU -> [SE] -> [SE] -> [+res]."""
    it = iter(refs)
    a_ref = next(it)
    g_ref = next(it) if pool_a else None
    u_ref = next(it) if up_a else None
    b_ref = next(it) if has_b else None
    s_ref = next(it)
    wdwa_ref = next(it)
    wdwb_ref = next(it) if has_b else None
    wpwa_ref = next(it)
    wpwb_ref = next(it) if has_b else None
    bns_ref = next(it)
    bnb_ref = next(it)
    sew1_ref = next(it) if use_se else None
    sew2_ref = next(it) if use_se else None
    se2w1_ref = next(it) if extra_se else None
    se2w2_ref = next(it) if extra_se else None
    r_ref = next(it) if add_res else None
    o_ref = next(it)

    f32 = jnp.float32
    xa = a_ref[0].astype(f32)                                    # (HWa, Ca)

    if pool_a:                                                   # 2x2/2 ceil-mode maxpool
        pooled = jnp.dot(g_ref[0], xa, preferred_element_type=f32)
        for k in range(1, 4):
            pooled = jnp.maximum(pooled, jnp.dot(g_ref[k], xa, preferred_element_type=f32))
        xa = pooled
    if up_a:                                                     # bilinear align_corners upsample
        xa = jnp.dot(u_ref[...], xa, preferred_element_type=f32)

    def dwconv(v, wref):                                         # depthwise 3x3 (dilated)
        acc = jnp.dot(s_ref[0], v, preferred_element_type=f32) * wref[0]
        for t in range(1, 9):
            acc = acc + jnp.dot(s_ref[t], v, preferred_element_type=f32) * wref[t]
        return acc

    y = jnp.dot(dwconv(xa, wdwa_ref), wpwa_ref[...], preferred_element_type=f32)
    if has_b:                                                    # concat handled by split weights
        xb = b_ref[0].astype(f32)
        y = y + jnp.dot(dwconv(xb, wdwb_ref), wpwb_ref[...], preferred_element_type=f32)

    y = jnp.maximum(y * bns_ref[...] + bnb_ref[...], 0.0)        # folded BN + ReLU

    def apply_se(v, w1_ref, w2_ref):
        m = jnp.mean(v, axis=0, keepdims=True)                   # global average pool
        h = jnp.maximum(jnp.dot(m, w1_ref[...], preferred_element_type=f32), 0.0)
        logit = jnp.dot(h, w2_ref[...], preferred_element_type=f32)
        return v * (1.0 / (1.0 + jnp.exp(-logit)))               # sigmoid gate

    if use_se:
        y = apply_se(y, sew1_ref, sew2_ref)
    if extra_se:                                                 # folded RSU se_out
        y = apply_se(y, se2w1_ref, se2w2_ref)
    if add_res:                                                  # folded RSU residual
        y = y + r_ref[0].astype(f32)
    o_ref[0] = y.astype(o_ref.dtype)


def _dase_kernel(*refs, pre_pool):
    """Fused DASEModule (optionally preceded by the top-level 2x2 maxpool)."""
    it = iter(refs)
    x_ref = next(it)
    g_ref = next(it) if pre_pool else None
    s_ref = next(it)         # (12, HW, HW): [H d1, W d1, H dd, W dd] x 3 taps
    bnpin_ref = next(it)     # (3, 1, C): scale, bias, prelu alpha
    win_ref = next(it)       # (C, C2)
    wconv_ref = next(it)     # (6, C2, C2): [conv3x1 | conv1x3] x 3 taps, [i, o]
    wdw_ref = next(it)       # (12, 1, C2): [d3x1 | d1x3 | dd3x1 | dd1x3] x 3 taps
    bnph_ref = next(it)      # (21, 1, C2): 7 x (scale, bias, alpha)
    sew1_ref = next(it)      # (2, C2, C2//8)
    sew2_ref = next(it)      # (2, C2//8, C2)
    wout_ref = next(it)      # (C2, C)
    seow1_ref = next(it)     # (C, C//16)
    seow2_ref = next(it)     # (C//16, C)
    perm_ref = next(it)      # (C, C) channel-shuffle permutation
    o_ref = next(it)

    f32 = jnp.float32
    x = x_ref[0].astype(f32)
    if pre_pool:
        pooled = jnp.dot(g_ref[0], x, preferred_element_type=f32)
        for k in range(1, 4):
            pooled = jnp.maximum(pooled, jnp.dot(g_ref[k], x, preferred_element_type=f32))
        x = pooled                                               # DASE "input"

    def prelu(t, a):
        return jnp.where(t >= 0.0, t, a * t)

    def bnp_half(v, i):
        return prelu(v * bnph_ref[i * 3 + 0] + bnph_ref[i * 3 + 1], bnph_ref[i * 3 + 2])

    def dense3(v, si, wi, bi):                                   # full conv, 3 taps along one axis
        acc = None
        for t in range(3):
            z = jnp.dot(v, wconv_ref[wi * 3 + t], preferred_element_type=f32)
            z = jnp.dot(s_ref[si * 3 + t], z, preferred_element_type=f32)
            acc = z if acc is None else acc + z
        return bnp_half(acc, bi)

    def dw3(v, si, di, bi):                                      # depthwise conv, 3 taps
        acc = None
        for t in range(3):
            z = jnp.dot(s_ref[si * 3 + t], v, preferred_element_type=f32) * wdw_ref[di * 3 + t]
            acc = z if acc is None else acc + z
        return bnp_half(acc, bi)

    def apply_se(v, w1, w2):
        m = jnp.mean(v, axis=0, keepdims=True)
        h = jnp.maximum(jnp.dot(m, w1, preferred_element_type=f32), 0.0)
        logit = jnp.dot(h, w2, preferred_element_type=f32)
        return v * (1.0 / (1.0 + jnp.exp(-logit)))

    h = prelu(x * bnpin_ref[0] + bnpin_ref[1], bnpin_ref[2])     # bn_relu_1
    inp = jnp.dot(h, win_ref[...], preferred_element_type=f32)   # conv1x1_in

    main = dense3(inp, 0, 0, 0)                                  # conv3x1
    main = dense3(main, 1, 1, 1)                                 # conv1x3

    br1 = dw3(inp, 0, 0, 2)                                      # dconv3x1
    br1 = dw3(br1, 1, 1, 3)                                      # dconv1x3
    br1 = apply_se(br1, sew1_ref[0], sew2_ref[0])                # se1

    br2 = dw3(inp, 2, 2, 4)                                      # ddconv3x1 (dilated)
    br2 = dw3(br2, 3, 3, 5)                                      # ddconv1x3 (dilated)
    br2 = apply_se(br2, sew1_ref[1], sew2_ref[1])                # se2

    out = br1 + br2 + main
    out = bnp_half(out, 6)                                       # bn_relu_2
    out = jnp.dot(out, wout_ref[...], preferred_element_type=f32)  # conv1x1
    out = apply_se(out, seow1_ref[...], seow2_ref[...])          # se_out
    out = out + x                                                # residual with (pooled) input
    out = jnp.dot(out, perm_ref[...], preferred_element_type=f32)  # channel shuffle
    o_ref[0] = out.astype(o_ref.dtype)


# ---------------------------------------------------------------------------
# Pallas wrappers
# ---------------------------------------------------------------------------
def _const_spec(arr):
    nd = arr.ndim
    return pl.BlockSpec(tuple(arr.shape), lambda n, _nd=nd: (0,) * _nd)


def _batched_spec(arr):
    blk = (1,) + tuple(arr.shape[1:])
    return pl.BlockSpec(blk, lambda n, _nd=arr.ndim: (n,) + (0,) * (_nd - 1))


def rebnconv_block(a, lay, *, b=None, residual=None):
    N = a.shape[0]
    S = lay["S"]
    HW = S.shape[1]
    cout = lay["cout"]
    G, U = lay.get("G"), lay.get("U")
    pool_a, up_a = G is not None, U is not None
    has_b = b is not None
    use_se = "se_w1" in lay
    extra_se = "se2_w1" in lay
    add_res = residual is not None

    inputs, specs = [], []

    def add(arr, batched=False):
        inputs.append(arr)
        specs.append(_batched_spec(arr) if batched else _const_spec(arr))

    add(a, batched=True)
    if pool_a:
        add(G)
    if up_a:
        add(U)
    if has_b:
        add(b, batched=True)
    add(S)
    add(lay["wdw_a"])
    if has_b:
        add(lay["wdw_b"])
    add(lay["wpw_a"])
    if has_b:
        add(lay["wpw_b"])
    add(lay["bn_s"])
    add(lay["bn_b"])
    if use_se:
        add(lay["se_w1"]); add(lay["se_w2"])
    if extra_se:
        add(lay["se2_w1"]); add(lay["se2_w2"])
    if add_res:
        add(residual, batched=True)

    kernel = functools.partial(_rebnconv_kernel, pool_a=pool_a, up_a=up_a, has_b=has_b,
                               use_se=use_se, extra_se=extra_se, add_res=add_res)
    return pl.pallas_call(
        kernel,
        out_shape=jax.ShapeDtypeStruct((N, HW, cout), jnp.float32),
        grid=(N,),
        in_specs=specs,
        out_specs=pl.BlockSpec((1, HW, cout), lambda n: (n, 0, 0)),
        compiler_params=pltpu.CompilerParams(dimension_semantics=("parallel",)),
    )(*inputs)


def dase_block(x, p):
    N = x.shape[0]
    HW = p["S_all"].shape[1]
    C = p["C"]
    pre_pool = p["pre_pool"]

    inputs, specs = [], []

    def add(arr, batched=False):
        inputs.append(arr)
        specs.append(_batched_spec(arr) if batched else _const_spec(arr))

    add(x, batched=True)
    if pre_pool:
        add(p["G"])
    add(p["S_all"])
    add(p["bnp_in"])
    add(p["w_in"])
    add(p["wconv"])
    add(p["wdw_p"])
    add(p["bnp_half"])
    add(p["se_mid_w1"])
    add(p["se_mid_w2"])
    add(p["w_out"])
    add(p["seo_w1"])
    add(p["seo_w2"])
    add(p["perm"])

    kernel = functools.partial(_dase_kernel, pre_pool=pre_pool)
    return pl.pallas_call(
        kernel,
        out_shape=jax.ShapeDtypeStruct((N, HW, C), jnp.float32),
        grid=(N,),
        in_specs=specs,
        out_specs=pl.BlockSpec((1, HW, C), lambda n: (n, 0, 0)),
        compiler_params=pltpu.CompilerParams(dimension_semantics=("parallel",)),
    )(*inputs)


# ---------------------------------------------------------------------------
# Parameter construction (deterministic, inference-mode BN folded)
# ---------------------------------------------------------------------------
def _fold_bn(key, ch, eps):
    kg, kb, km, kv = jax.random.split(key, 4)
    gamma = 1.3 + 0.05 * jax.random.normal(kg, (ch,), jnp.float32)
    beta = 0.05 * jax.random.normal(kb, (ch,), jnp.float32)
    mean = 0.05 * jax.random.normal(km, (ch,), jnp.float32)
    var = 1.0 + 0.1 * jax.random.uniform(kv, (ch,), jnp.float32)
    scale = gamma / jnp.sqrt(var + eps)
    bias = beta - mean * scale
    return scale, bias


def _se_weights(key, ch, ratio):
    k1, k2 = jax.random.split(key)
    hid = max(ch // ratio, 1)
    w1 = 0.05 * jax.random.normal(k1, (ch, hid), jnp.float32)
    w2 = 0.05 * jax.random.normal(k2, (hid, ch), jnp.float32)
    return w1, w2


def rebnconv_params(key, cin, cout, *, d, use_se, H, W, split=None, extra_se_ch=None):
    ks = jax.random.split(key, 5)
    wdw = jax.random.normal(ks[0], (cin, 3, 3), jnp.float32) * float(np.sqrt(2.0 / 9.0))
    wpw = jax.random.normal(ks[1], (cin, cout), jnp.float32) * float(np.sqrt(2.0 / cin))
    bn_s, bn_b = _fold_bn(ks[2], cout, 1e-5)

    p = dict(dirate=d, cin=cin, cout=cout, H=H, W=W,
             wdw=wdw, wpw=wpw, bn_s_vec=bn_s, bn_b_vec=bn_b)
    # Pallas layouts: per-tap depthwise weights (9, 1, cin) with t = kh*3 + kw.
    taps = jnp.reshape(jnp.transpose(jnp.reshape(wdw, (cin, 9)), (1, 0)), (9, 1, cin))
    if split is None:
        p["wdw_a"], p["wpw_a"] = taps, wpw
    else:                                   # decoder: concat(a, b) handled by split weights
        p["wdw_a"], p["wdw_b"] = taps[:, :, :split], taps[:, :, split:]
        p["wpw_a"], p["wpw_b"] = wpw[:split], wpw[split:]
    p["bn_s"] = bn_s.reshape(1, cout)
    p["bn_b"] = bn_b.reshape(1, cout)
    if use_se:
        p["se_w1"], p["se_w2"] = _se_weights(ks[3], cout, 8)
    if extra_se_ch is not None:             # RSU se_out folded into the last decoder block
        p["se2_w1"], p["se2_w2"] = _se_weights(ks[4], extra_se_ch, 8)
    p["S"] = dw_shift_mats(H, W, d)
    return p


def rsu_params(key, *, depth, in_ch, mid_ch, out_ch, H, W, in_se):
    sizes = [(H, W)]
    for _ in range(depth - 2):
        h, w = sizes[-1]
        sizes.append((-(-h // 2), -(-w // 2)))
    ks = iter(jax.random.split(key, 2 * depth + 2))

    prm = dict(depth=depth, sizes=sizes, H=H, W=W, out_ch=out_ch)
    prm["convin"] = rebnconv_params(next(ks), in_ch, out_ch, d=1, use_se=in_se, H=H, W=W)

    enc = []
    for k in range(1, depth):
        cin = out_ch if k == 1 else mid_ch
        hk, wk = sizes[k - 1]
        lay = rebnconv_params(next(ks), cin, mid_ch, d=1, use_se=True, H=hk, W=wk)
        if k > 1:
            hp, wp = sizes[k - 2]
            lay["G"] = pool_gather_mats(hp, wp)
        enc.append(lay)
    prm["enc"] = enc

    hb, wb = sizes[-1]
    prm["bott"] = rebnconv_params(next(ks), mid_ch, mid_ch, d=2, use_se=True, H=hb, W=wb)

    dec = []
    for k in range(1, depth):
        hk, wk = sizes[k - 1]
        cout = out_ch if k == 1 else mid_ch
        lay = rebnconv_params(next(ks), 2 * mid_ch, cout, d=1, use_se=True, H=hk, W=wk,
                              split=mid_ch, extra_se_ch=out_ch if k == 1 else None)
        if k < depth - 1:
            hs, ws = sizes[k]
            if (hs, ws) != (hk, wk):
                lay["U"] = upsample_mat(hk, wk, hs, ws)
        dec.append(lay)
    prm["dec"] = dec
    return prm


def dase_params(key, *, C, d, H_in, W_in, pre_pool):
    C2 = C // 2
    H, W = (-(-H_in // 2), -(-W_in // 2)) if pre_pool else (H_in, W_in)
    ks = iter(jax.random.split(key, 24))

    p = dict(C=C, C2=C2, d=d, H=H, W=W, pre_pool=pre_pool)
    if pre_pool:
        p["G"] = pool_gather_mats(H_in, W_in)
    p["S_all"] = dase_shift_mats(H, W, d)

    s1, b1 = _fold_bn(next(ks), C, 1e-3)
    a1 = jnp.full((C,), 0.25, jnp.float32)
    p["bn1_s"], p["bn1_b"], p["alpha1"] = s1, b1, a1
    p["bnp_in"] = jnp.stack([s1, b1, a1]).reshape(3, 1, C)

    p["w_in"] = jax.random.normal(next(ks), (C, C2), jnp.float32) * float(np.sqrt(2.0 / C))

    w3h = jax.random.normal(next(ks), (C2, C2, 3), jnp.float32) * float(np.sqrt(2.0 / (3 * C2)))
    w3w = jax.random.normal(next(ks), (C2, C2, 3), jnp.float32) * float(np.sqrt(2.0 / (3 * C2)))
    wd = jax.random.normal(next(ks), (4, C2, 3), jnp.float32) * float(np.sqrt(2.0 / 3.0))

    bnp_list, bnp_ref = [], []
    for _ in range(7):
        si, bi = _fold_bn(next(ks), C2, 1e-3)
        ai = jnp.full((C2,), 0.25, jnp.float32)
        bnp_list.append(jnp.stack([si, bi, ai]))
        bnp_ref.append((si, bi, ai))
    p["bnp_half"] = jnp.stack(bnp_list).reshape(7 * 3, 1, C2)
    p["bnp_ref"] = bnp_ref

    p["se1_w1"], p["se1_w2"] = _se_weights(next(ks), C2, 8)
    p["se2_w1"], p["se2_w2"] = _se_weights(next(ks), C2, 8)
    p["w_out"] = jax.random.normal(next(ks), (C2, C), jnp.float32) * float(np.sqrt(2.0 / C2))
    p["seo_w1"], p["seo_w2"] = _se_weights(next(ks), C, 16)

    # Pallas layouts
    wconv = jnp.stack([jnp.transpose(w3h, (2, 1, 0)), jnp.transpose(w3w, (2, 1, 0))])
    p["wconv"] = wconv.reshape(6, C2, C2)                     # [which*3+t, i, o]
    p["wdw_p"] = jnp.transpose(wd, (0, 2, 1)).reshape(12, 1, C2)
    p["se_mid_w1"] = jnp.stack([p["se1_w1"], p["se2_w1"]])
    p["se_mid_w2"] = jnp.stack([p["se1_w2"], p["se2_w2"]])
    g = C // 2
    perm = np.zeros((C, C), np.float32)
    for i in range(g):
        for j in range(2):
            perm[i * 2 + j, j * g + i] = 1.0                  # channel shuffle (groups = C//2)
    p["perm"] = jnp.asarray(perm)

    # Reference (HWIO) layouts
    p["w3h_hwio"] = jnp.transpose(w3h, (2, 1, 0))[:, None, :, :]
    p["w3w_hwio"] = jnp.transpose(w3w, (2, 1, 0))[None, :, :, :]
    p["wd_hwio"] = [
        jnp.transpose(wd[0], (1, 0))[:, None, None, :],
        jnp.transpose(wd[1], (1, 0))[None, :, None, :],
        jnp.transpose(wd[2], (1, 0))[:, None, None, :],
        jnp.transpose(wd[3], (1, 0))[None, :, None, :],
    ]
    return p


def init_model(key, H, W, dw1=32, dw2=48, out_ch=64):
    ks = jax.random.split(key, 6)
    model = {}
    model["stage1"] = rsu_params(ks[0], depth=7, in_ch=3, mid_ch=16, out_ch=dw1, H=H, W=W, in_se=False)
    H1, W1 = -(-H // 2), -(-W // 2)
    model["dase1"] = dase_params(ks[1], C=dw1, d=1, H_in=H, W_in=W, pre_pool=True)
    model["stage2"] = rsu_params(ks[2], depth=6, in_ch=dw1, mid_ch=24, out_ch=dw2, H=H1, W=W1, in_se=True)
    H2, W2 = -(-H1 // 2), -(-W1 // 2)
    model["dase2"] = dase_params(ks[3], C=dw2, d=2, H_in=H1, W_in=W1, pre_pool=True)
    model["stage3"] = rsu_params(ks[4], depth=5, in_ch=dw2, mid_ch=32, out_ch=out_ch, H=H2, W=W2, in_se=True)
    H3, W3 = -(-H2 // 2), -(-W2 // 2)
    model["dase3"] = dase_params(ks[5], C=out_ch, d=4, H_in=H2, W_in=W2, pre_pool=True)
    model["out_hw"] = (H3, W3)
    return model


# ---------------------------------------------------------------------------
# Shared orchestration (same structure for Pallas and reference backends)
# ---------------------------------------------------------------------------
def rsu_forward(x, prm, B):
    hxin = B.rebnconv(x, prm["convin"])
    feats = []
    prev = hxin
    for lay in prm["enc"]:                       # encoder (pool fused into blocks k >= 2)
        prev = B.rebnconv(prev, lay)
        feats.append(prev)
    dec = B.rebnconv(feats[-1], prm["bott"])     # dilated bottleneck
    for k in range(len(feats), 0, -1):           # decoder (upsample+concat fused)
        lay = prm["dec"][k - 1]
        if k == 1:
            dec = B.rebnconv(dec, lay, b=feats[0], residual=hxin)   # se_out + residual folded
        else:
            dec = B.rebnconv(dec, lay, b=feats[k - 1])
    return dec


def rsud_forward(x, model, B):
    h = rsu_forward(x, model["stage1"], B)
    h = B.dase(h, model["dase1"])
    h = rsu_forward(h, model["stage2"], B)
    h = B.dase(h, model["dase2"])
    h = rsu_forward(h, model["stage3"], B)
    h = B.dase(h, model["dase3"])
    return h


class PallasBackend:
    rebnconv = staticmethod(rebnconv_block)
    dase = staticmethod(dase_block)


def forward_pallas(x_nchw, model):
    N, C, H, W = x_nchw.shape
    x = jnp.transpose(x_nchw, (0, 2, 3, 1)).reshape(N, H * W, C)
    y = rsud_forward(x, model, PallasBackend)
    Ho, Wo = model["out_hw"]
    y = y.reshape(N, Ho, Wo, y.shape[-1])
    return jnp.transpose(y, (0, 3, 1, 2))


# ---------------------------------------------------------------------------
# Independent pure-JAX reference (lax.conv based, NHWC)
# ---------------------------------------------------------------------------
def ref_se_block(y, w1, w2):
    m = jnp.mean(y, axis=(1, 2))
    h = jnp.maximum(m @ w1, 0.0)
    s = 1.0 / (1.0 + jnp.exp(-(h @ w2)))
    return y * s[:, None, None, :]


def ref_maxpool(x):
    H, W = x.shape[1], x.shape[2]
    return lax.reduce_window(x, -jnp.inf, lax.max, (1, 2, 2, 1), (1, 2, 2, 1),
                             padding=((0, 0), (0, H % 2), (0, W % 2), (0, 0)))


def ref_upsample(x, Ho, Wo):
    N, H, W, C = x.shape
    if (H, W) == (Ho, Wo):
        return x

    def idx(out, inp):
        if inp == 1:
            return np.zeros(out, np.int32), np.zeros(out, np.int32), np.zeros(out, np.float32)
        if out == 1:
            return np.zeros(1, np.int32), np.zeros(1, np.int32), np.zeros(1, np.float32)
        src = np.arange(out) * (inp - 1) / (out - 1)
        i0 = np.minimum(np.floor(src).astype(np.int32), inp - 1)
        i1 = np.minimum(i0 + 1, inp - 1)
        return i0, i1, (src - i0).astype(np.float32)

    h0, h1, fh = idx(Ho, H)
    w0, w1, fw = idx(Wo, W)
    xh = x[:, h0] * (1.0 - fh)[None, :, None, None] + x[:, h1] * fh[None, :, None, None]
    return xh[:, :, w0] * (1.0 - fw)[None, None, :, None] + xh[:, :, w1] * fw[None, None, :, None]


def ref_rebnconv_block(a, lay, *, b=None, residual=None):
    if "G" in lay:
        a = ref_maxpool(a)
    if b is not None:
        if a.shape[1:3] != b.shape[1:3]:
            a = ref_upsample(a, b.shape[1], b.shape[2])
        x = jnp.concatenate([a, b], axis=-1)
    else:
        x = a
    d = lay["dirate"]
    cin = x.shape[-1]
    w_hwio = jnp.transpose(lay["wdw"], (1, 2, 0))[:, :, None, :]
    dw = lax.conv_general_dilated(x, w_hwio, (1, 1), ((d, d), (d, d)), rhs_dilation=(d, d),
                                  dimension_numbers=("NHWC", "HWIO", "NHWC"),
                                  feature_group_count=cin)
    y = jnp.einsum("nhwc,co->nhwo", dw, lay["wpw"])
    y = jnp.maximum(y * lay["bn_s_vec"] + lay["bn_b_vec"], 0.0)
    if "se_w1" in lay:
        y = ref_se_block(y, lay["se_w1"], lay["se_w2"])
    if "se2_w1" in lay:
        y = ref_se_block(y, lay["se2_w1"], lay["se2_w2"])
    if residual is not None:
        y = y + residual
    return y


def ref_dase_block(x, p):
    if p["pre_pool"]:
        x = ref_maxpool(x)
    d = p["d"]
    C2 = p["C2"]

    def prelu(v, a):
        return jnp.where(v >= 0.0, v, a * v)

    def conv(v, w, pad, dil, groups):
        return lax.conv_general_dilated(v, w, (1, 1), pad, rhs_dilation=dil,
                                        dimension_numbers=("NHWC", "HWIO", "NHWC"),
                                        feature_group_count=groups)

    def bnp(v, i):
        s, b, a = p["bnp_ref"][i]
        return prelu(v * s + b, a)

    h = prelu(x * p["bn1_s"] + p["bn1_b"], p["alpha1"])
    inp = jnp.einsum("nhwc,co->nhwo", h, p["w_in"])

    main = bnp(conv(inp, p["w3h_hwio"], ((1, 1), (0, 0)), (1, 1), 1), 0)
    main = bnp(conv(main, p["w3w_hwio"], ((0, 0), (1, 1)), (1, 1), 1), 1)

    br1 = bnp(conv(inp, p["wd_hwio"][0], ((1, 1), (0, 0)), (1, 1), C2), 2)
    br1 = bnp(conv(br1, p["wd_hwio"][1], ((0, 0), (1, 1)), (1, 1), C2), 3)
    br1 = ref_se_block(br1, p["se1_w1"], p["se1_w2"])

    br2 = bnp(conv(inp, p["wd_hwio"][2], ((d, d), (0, 0)), (d, 1), C2), 4)
    br2 = bnp(conv(br2, p["wd_hwio"][3], ((0, 0), (d, d)), (1, d), C2), 5)
    br2 = ref_se_block(br2, p["se2_w1"], p["se2_w2"])

    out = br1 + br2 + main
    out = bnp(out, 6)
    out = jnp.einsum("nhwc,co->nhwo", out, p["w_out"])
    out = ref_se_block(out, p["seo_w1"], p["seo_w2"])
    out = out + x

    N, H, W, C = out.shape
    g = C // 2
    out = out.reshape(N, H, W, g, 2).transpose(0, 1, 2, 4, 3).reshape(N, H, W, C)
    return out


class RefBackend:
    rebnconv = staticmethod(ref_rebnconv_block)
    dase = staticmethod(ref_dase_block)


def forward_reference(x_nchw, model):
    x = jnp.transpose(x_nchw, (0, 2, 3, 1))
    y = rsud_forward(x, model, RefBackend)
    return jnp.transpose(y, (0, 3, 1, 2))


# ---------------------------------------------------------------------------
if __name__ == "__main__":
    key = jax.random.PRNGKey(0)
    k_x, k_m = jax.random.split(key)

    N, H, W = 2, 16, 16
    x = jax.random.normal(k_x, (N, 3, H, W), jnp.float32)        # NCHW, like PyTorch
    model = init_model(k_m, H, W)

    out = forward_pallas(x, model)
    out = jax.block_until_ready(out)
    assert out.shape == (N, 64, H // 8, W // 8), out.shape

    ref = forward_reference(x, model)
    ref = jax.block_until_ready(ref)

    np.testing.assert_allclose(np.asarray(out), np.asarray(ref), rtol=1e-2, atol=1e-2)
    print("KERNEL_OK")
</pallas_src>

<mosaic_0001>
module attributes {stable_mosaic.version = 11 : i64} {
  func.func @_rebnconv_kernel(%arg0: i32, %arg1: memref<1x256x3xf32, #tpu.memory_space<vmem>>, %arg2: memref<9x256x256xf32, #tpu.memory_space<vmem>>, %arg3: memref<9x1x3xf32, #tpu.memory_space<vmem>>, %arg4: memref<3x32xf32, #tpu.memory_space<vmem>>, %arg5: memref<1x32xf32, #tpu.memory_space<vmem>>, %arg6: memref<1x32xf32, #tpu.memory_space<vmem>>, %arg7: memref<1x256x32xf32, #tpu.memory_space<vmem>>) attributes {dimension_semantics = [#tpu.dimension_semantics<parallel>], iteration_bounds = array<i64: 2>, scalar_prefetch = 0 : i64, scratch_operands = 0 : i64, tpu.core_type = #tpu.core_type<tc>, window_params = [{transform_indices = @transform_0, window_bounds = array<i64: 1, 256, 3>}, {pipeline_mode = #tpu.pipeline_mode<synchronous>, transform_indices = @transform_1, window_bounds = array<i64: 9, 256, 256>}, {pipeline_mode = #tpu.pipeline_mode<synchronous>, transform_indices = @transform_2, window_bounds = array<i64: 9, 1, 3>}, {pipeline_mode = #tpu.pipeline_mode<synchronous>, transform_indices = @transform_3, window_bounds = array<i64: 3, 32>}, {pipeline_mode = #tpu.pipeline_mode<synchronous>, transform_indices = @transform_4, window_bounds = array<i64: 1, 32>}, {pipeline_mode = #tpu.pipeline_mode<synchronous>, transform_indices = @transform_5, window_bounds = array<i64: 1, 32>}, {transform_indices = @transform_6, window_bounds = array<i64: 1, 256, 32>}]} {
    %c0 = arith.constant 0 : index
    %c0_0 = arith.constant 0 : index
    %c0_1 = arith.constant 0 : index
    %0 = vector.load %arg1[%c0, %c0_0, %c0_1] : memref<1x256x3xf32, #tpu.memory_space<vmem>>, vector<1x256x3xf32>
    %1 = vector.shape_cast %0 : vector<1x256x3xf32> to vector<256x3xf32>
    %c0_2 = arith.constant 0 : index
    %c0_3 = arith.constant 0 : index
    %c0_4 = arith.constant 0 : index
    %2 = vector.load %arg2[%c0_2, %c0_3, %c0_4] : memref<9x256x256xf32, #tpu.memory_space<vmem>>, vector<1x256x256xf32>
    %3 = vector.shape_cast %2 : vector<1x256x256xf32> to vector<256x256xf32>
    %cst = arith.constant dense<0.000000e+00> : vector<256x3xf32>
    %4 = tpu.matmul %3, %1, %cst {dimension_numbers = #tpu.dot_dimension_numbers<[1], [0], [0], [1], [0, 0, 1, 1], [], []>} : vector<256x256xf32>, vector<256x3xf32>, vector<256x3xf32> -> vector<256x3xf32>
    %c0_5 = arith.constant 0 : index
    %c0_6 = arith.constant 0 : index
    %c0_7 = arith.constant 0 : index
    %5 = vector.load %arg3[%c0_5, %c0_6, %c0_7] : memref<9x1x3xf32, #tpu.memory_space<vmem>>, vector<1x1x3xf32>
    %6 = vector.shape_cast %5 : vector<1x1x3xf32> to vector<1x3xf32>
    %7 = vector.broadcast %6 : vector<1x3xf32> to vector<256x3xf32>
    %8 = arith.mulf %4, %7 : vector<256x3xf32>
    %c1 = arith.constant 1 : index
    %c0_8 = arith.constant 0 : index
    %c0_9 = arith.constant 0 : index
    %9 = vector.load %arg2[%c1, %c0_8, %c0_9] : memref<9x256x256xf32, #tpu.memory_space<vmem>>, vector<1x256x256xf32>
    %10 = vector.shape_cast %9 : vector<1x256x256xf32> to vector<256x256xf32>
    %cst_10 = arith.constant dense<0.000000e+00> : vector<256x3xf32>
    %11 = tpu.matmul %10, %1, %cst_10 {dimension_numbers = #tpu.dot_dimension_numbers<[1], [0], [0], [1], [0, 0, 1, 1], [], []>} : vector<256x256xf32>, vector<256x3xf32>, vector<256x3xf32> -> vector<256x3xf32>
    %c1_11 = arith.constant 1 : index
    %c0_12 = arith.constant 0 : index
    %c0_13 = arith.constant 0 : index
    %12 = vector.load %arg3[%c1_11, %c0_12, %c0_13] : memref<9x1x3xf32, #tpu.memory_space<vmem>>, vector<1x1x3xf32>
    %13 = vector.shape_cast %12 : vector<1x1x3xf32> to vector<1x3xf32>
    %14 = vector.broadcast %13 : vector<1x3xf32> to vector<256x3xf32>
    %15 = arith.mulf %11, %14 : vector<256x3xf32>
    %16 = arith.addf %8, %15 : vector<256x3xf32>
    %c2 = arith.constant 2 : index
    %c0_14 = arith.constant 0 : index
    %c0_15 = arith.constant 0 : index
    %17 = vector.load %arg2[%c2, %c0_14, %c0_15] : memref<9x256x256xf32, #tpu.memory_space<vmem>>, vector<1x256x256xf32>
    %18 = vector.shape_cast %17 : vector<1x256x256xf32> to vector<256x256xf32>
    %cst_16 = arith.constant dense<0.000000e+00> : vector<256x3xf32>
    %19 = tpu.matmul %18, %1, %cst_16 {dimension_numbers = #tpu.dot_dimension_numbers<[1], [0], [0], [1], [0, 0, 1, 1], [], []>} : vector<256x256xf32>, vector<256x3xf32>, vector<256x3xf32> -> vector<256x3xf32>
    %c2_17 = arith.constant 2 : index
    %c0_18 = arith.constant 0 : index
    %c0_19 = arith.constant 0 : index
    %20 = vector.load %arg3[%c2_17, %c0_18, %c0_19] : memref<9x1x3xf32, #tpu.memory_space<vmem>>, vector<1x1x3xf32>
    %21 = vector.shape_cast %20 : vector<1x1x3xf32> to vector<1x3xf32>
    %22 = vector.broadcast %21 : vector<1x3xf32> to vector<256x3xf32>
    %23 = arith.mulf %19, %22 : vector<256x3xf32>
    %24 = arith.addf %16, %23 : vector<256x3xf32>
    %c3 = arith.constant 3 : index
    %c0_20 = arith.constant 0 : index
    %c0_21 = arith.constant 0 : index
    %25 = vector.load %arg2[%c3, %c0_20, %c0_21] : memref<9x256x256xf32, #tpu.memory_space<vmem>>, vector<1x256x256xf32>
    %26 = vector.shape_cast %25 : vector<1x256x256xf32> to vector<256x256xf32>
    %cst_22 = arith.constant dense<0.000000e+00> : vector<256x3xf32>
    %27 = tpu.matmul %26, %1, %cst_22 {dimension_numbers = #tpu.dot_dimension_numbers<[1], [0], [0], [1], [0, 0, 1, 1], [], []>} : vector<256x256xf32>, vector<256x3xf32>, vector<256x3xf32> -> vector<256x3xf32>
    %c3_23 = arith.constant 3 : index
    %c0_24 = arith.constant 0 : index
    %c0_25 = arith.constant 0 : index
    %28 = vector.load %arg3[%c3_23, %c0_24, %c0_25] : memref<9x1x3xf32, #tpu.memory_space<vmem>>, vector<1x1x3xf32>
    %29 = vector.shape_cast %28 : vector<1x1x3xf32> to vector<1x3xf32>
    %30 = vector.broadcast %29 : vector<1x3xf32> to vector<256x3xf32>
    %31 = arith.mulf %27, %30 : vector<256x3xf32>
    %32 = arith.addf %24, %31 : vector<256x3xf32>
    %c4 = arith.constant 4 : index
    %c0_26 = arith.constant 0 : index
    %c0_27 = arith.constant 0 : index
    %33 = vector.load %arg2[%c4, %c0_26, %c0_27] : memref<9x256x256xf32, #tpu.memory_space<vmem>>, vector<1x256x256xf32>
    %34 = vector.shape_cast %33 : vector<1x256x256xf32> to vector<256x256xf32>
    %cst_28 = arith.constant dense<0.000000e+00> : vector<256x3xf32>
    %35 = tpu.matmul %34, %1, %cst_28 {dimension_numbers = #tpu.dot_dimension_numbers<[1], [0], [0], [1], [0, 0, 1, 1], [], []>} : vector<256x256xf32>, vector<256x3xf32>, vector<256x3xf32> -> vector<256x3xf32>
    %c4_29 = arith.constant 4 : index
    %c0_30 = arith.constant 0 : index
    %c0_31 = arith.constant 0 : index
    %36 = vector.load %arg3[%c4_29, %c0_30, %c0_31] : memref<9x1x3xf32, #tpu.memory_space<vmem>>, vector<1x1x3xf32>
    %37 = vector.shape_cast %36 : vector<1x1x3xf32> to vector<1x3xf32>
    %38 = vector.broadcast %37 : vector<1x3xf32> to vector<256x3xf32>
    %39 = arith.mulf %35, %38 : vector<256x3xf32>
    %40 = arith.addf %32, %39 : vector<256x3xf32>
    %c5 = arith.constant 5 : index
    %c0_32 = arith.constant 0 : index
    %c0_33 = arith.constant 0 : index
    %41 = vector.load %arg2[%c5, %c0_32, %c0_33] : memref<9x256x256xf32, #tpu.memory_space<vmem>>, vector<1x256x256xf32>
    %42 = vector.shape_cast %41 : vector<1x256x256xf32> to vector<256x256xf32>
    %cst_34 = arith.constant dense<0.000000e+00> : vector<256x3xf32>
    %43 = tpu.matmul %42, %1, %cst_34 {dimension_numbers = #tpu.dot_dimension_numbers<[1], [0], [0], [1], [0, 0, 1, 1], [], []>} : vector<256x256xf32>, vector<256x3xf32>, vector<256x3xf32> -> vector<256x3xf32>
    %c5_35 = arith.constant 5 : index
    %c0_36 = arith.constant 0 : index
    %c0_37 = arith.constant 0 : index
    %44 = vector.load %arg3[%c5_35, %c0_36, %c0_37] : memref<9x1x3xf32, #tpu.memory_space<vmem>>, vector<1x1x3xf32>
    %45 = vector.shape_cast %44 : vector<1x1x3xf32> to vector<1x3xf32>
    %46 = vector.broadcast %45 : vector<1x3xf32> to vector<256x3xf32>
    %47 = arith.mulf %43, %46 : vector<256x3xf32>
    %48 = arith.addf %40, %47 : vector<256x3xf32>
    %c6 = arith.constant 6 : index
    %c0_38 = arith.constant 0 : index
    %c0_39 = arith.constant 0 : index
    %49 = vector.load %arg2[%c6, %c0_38, %c0_39] : memref<9x256x256xf32, #tpu.memory_space<vmem>>, vector<1x256x256xf32>
    %50 = vector.shape_cast %49 : vector<1x256x256xf32> to vector<256x256xf32>
    %cst_40 = arith.constant dense<0.000000e+00> : vector<256x3xf32>
    %51 = tpu.matmul %50, %1, %cst_40 {dimension_numbers = #tpu.dot_dimension_numbers<[1], [0], [0], [1], [0, 0, 1, 1], [], []>} : vector<256x256xf32>, vector<256x3xf32>, vector<256x3xf32> -> vector<256x3xf32>
    %c6_41 = arith.constant 6 : index
    %c0_42 = arith.constant 0 : index
    %c0_43 = arith.constant 0 : index
    %52 = vector.load %arg3[%c6_41, %c0_42, %c0_43] : memref<9x1x3xf32, #tpu.memory_space<vmem>>, vector<1x1x3xf32>
    %53 = vector.shape_cast %52 : vector<1x1x3xf32> to vector<1x3xf32>
    %54 = vector.broadcast %53 : vector<1x3xf32> to vector<256x3xf32>
    %55 = arith.mulf %51, %54 : vector<256x3xf32>
    %56 = arith.addf %48, %55 : vector<256x3xf32>
    %c7 = arith.constant 7 : index
    %c0_44 = arith.constant 0 : index
    %c0_45 = arith.constant 0 : index
    %57 = vector.load %arg2[%c7, %c0_44, %c0_45] : memref<9x256x256xf32, #tpu.memory_space<vmem>>, vector<1x256x256xf32>
    %58 = vector.shape_cast %57 : vector<1x256x256xf32> to vector<256x256xf32>
    %cst_46 = arith.constant dense<0.000000e+00> : vector<256x3xf32>
    %59 = tpu.matmul %58, %1, %cst_46 {dimension_numbers = #tpu.dot_dimension_numbers<[1], [0], [0], [1], [0, 0, 1, 1], [], []>} : vector<256x256xf32>, vector<256x3xf32>, vector<256x3xf32> -> vector<256x3xf32>
    %c7_47 = arith.constant 7 : index
    %c0_48 = arith.constant 0 : index
    %c0_49 = arith.constant 0 : index
    %60 = vector.load %arg3[%c7_47, %c0_48, %c0_49] : memref<9x1x3xf32, #tpu.memory_space<vmem>>, vector<1x1x3xf32>
    %61 = vector.shape_cast %60 : vector<1x1x3xf32> to vector<1x3xf32>
    %62 = vector.broadcast %61 : vector<1x3xf32> to vector<256x3xf32>
    %63 = arith.mulf %59, %62 : vector<256x3xf32>
    %64 = arith.addf %56, %63 : vector<256x3xf32>
    %c8 = arith.constant 8 : index
    %c0_50 = arith.constant 0 : index
    %c0_51 = arith.constant 0 : index
    %65 = vector.load %arg2[%c8, %c0_50, %c0_51] : memref<9x256x256xf32, #tpu.memory_space<vmem>>, vector<1x256x256xf32>
    %66 = vector.shape_cast %65 : vector<1x256x256xf32> to vector<256x256xf32>
    %cst_52 = arith.constant dense<0.000000e+00> : vector<256x3xf32>
    %67 = tpu.matmul %66, %1, %cst_52 {dimension_numbers = #tpu.dot_dimension_numbers<[1], [0], [0], [1], [0, 0, 1, 1], [], []>} : vector<256x256xf32>, vector<256x3xf32>, vector<256x3xf32> -> vector<256x3xf32>
    %c8_53 = arith.constant 8 : index
    %c0_54 = arith.constant 0 : index
    %c0_55 = arith.constant 0 : index
    %68 = vector.load %arg3[%c8_53, %c0_54, %c0_55] : memref<9x1x3xf32, #tpu.memory_space<vmem>>, vector<1x1x3xf32>
    %69 = vector.shape_cast %68 : vector<1x1x3xf32> to vector<1x3xf32>
    %70 = vector.broadcast %69 : vector<1x3xf32> to vector<256x3xf32>
    %71 = arith.mulf %67, %70 : vector<256x3xf32>
    %72 = arith.addf %64, %71 : vector<256x3xf32>
    %c0_56 = arith.constant 0 : index
    %c0_57 = arith.constant 0 : index
    %73 = vector.load %arg4[%c0_56, %c0_57] : memref<3x32xf32, #tpu.memory_space<vmem>>, vector<3x32xf32>
    %cst_58 = arith.constant dense<0.000000e+00> : vector<256x32xf32>
    %74 = tpu.matmul %72, %73, %cst_58 {dimension_numbers = #tpu.dot_dimension_numbers<[1], [0], [0], [1], [0, 0, 1, 1], [], []>} : vector<256x3xf32>, vector<3x32xf32>, vector<256x32xf32> -> vector<256x32xf32>
    %c0_59 = arith.constant 0 : index
    %c0_60 = arith.constant 0 : index
    %75 = vector.load %arg5[%c0_59, %c0_60] : memref<1x32xf32, #tpu.memory_space<vmem>>, vector<1x32xf32>
    %76 = vector.broadcast %75 : vector<1x32xf32> to vector<256x32xf32>
    %77 = arith.mulf %74, %76 : vector<256x32xf32>
    %c0_61 = arith.constant 0 : index
    %c0_62 = arith.constant 0 : index
    %78 = vector.load %arg6[%c0_61, %c0_62] : memref<1x32xf32, #tpu.memory_space<vmem>>, vector<1x32xf32>
    %79 = vector.broadcast %78 : vector<1x32xf32> to vector<256x32xf32>
    %80 = arith.addf %77, %79 : vector<256x32xf32>
    %cst_63 = arith.constant 0.000000e+00 : f32
    %81 = vector.broadcast %cst_63 : f32 to vector<256x32xf32>
    %82 = arith.maximumf %80, %81 : vector<256x32xf32>
    %c0_64 = arith.constant 0 : index
    %c0_65 = arith.constant 0 : index
    %c0_66 = arith.constant 0 : index
    %83 = vector.load %arg7[%c0_64, %c0_65, %c0_66] : memref<1x256x32xf32, #tpu.memory_space<vmem>>, vector<1x256x32xf32>
    %84 = vector.shape_cast %83 : vector<1x256x32xf32> to vector<256x32xf32>
    %85 = vector.shape_cast %82 : vector<256x32xf32> to vector<1x256x32xf32>
    tpu.vector_store %arg7[%c0_64, %c0_65, %c0_66], %85 {strides = array<i32>} : memref<1x256x32xf32, #tpu.memory_space<vmem>>, vector<1x256x32xf32>,
    return
  }
  func.func @transform_0(%arg0: i32) -> (i32, i32, i32) {
    %c0_i32 = arith.constant 0 : i32
    %c0_i32_0 = arith.constant 0 : i32
    %c0_i32_1 = arith.constant 0 : i32
    return %arg0, %c0_i32, %c0_i32_0 : i32, i32, i32
  }
  func.func @transform_1(%arg0: i32) -> (i32, i32, i32) {
    %c0_i32 = arith.constant 0 : i32
    %c0_i32_0 = arith.constant 0 : i32
    %c0_i32_1 = arith.constant 0 : i32
    %c0_i32_2 = arith.constant 0 : i32
    return %c0_i32, %c0_i32_0, %c0_i32_1 : i32, i32, i32
  }
  func.func @transform_2(%arg0: i32) -> (i32, i32, i32) {
    %c0_i32 = arith.constant 0 : i32
    %c0_i32_0 = arith.constant 0 : i32
    %c0_i32_1 = arith.constant 0 : i32
    %c0_i32_2 = arith.constant 0 : i32
    return %c0_i32, %c0_i32_0, %c0_i32_1 : i32, i32, i32
  }
  func.func @transform_3(%arg0: i32) -> (i32, i32) {
    %c0_i32 = arith.constant 0 : i32
    %c0_i32_0 = arith.constant 0 : i32
    %c0_i32_1 = arith.constant 0 : i32
    return %c0_i32, %c0_i32_0 : i32, i32
  }
  func.func @transform_4(%arg0: i32) -> (i32, i32) {
    %c0_i32 = arith.constant 0 : i32
    %c0_i32_0 = arith.constant 0 : i32
    %c0_i32_1 = arith.constant 0 : i32
    return %c0_i32, %c0_i32_0 : i32, i32
  }
  func.func @transform_5(%arg0: i32) -> (i32, i32) {
    %c0_i32 = arith.constant 0 : i32
    %c0_i32_0 = arith.constant 0 : i32
    %c0_i32_1 = arith.constant 0 : i32
    return %c0_i32, %c0_i32_0 : i32, i32
  }
  func.func @transform_6(%arg0: i32) -> (i32, i32, i32) {
    %c0_i32 = arith.constant 0 : i32
    %c0_i32_0 = arith.constant 0 : i32
    %c0_i32_1 = arith.constant 0 : i32
    return %arg0, %c0_i32, %c0_i32_0 : i32, i32, i32
  }
}

</mosaic_0001>

<bundles_post_ra>
// kernel: tpu_custom_call.1
= control target key start
LH: loop header
LB: loop body
LE: loop exit
PB: predicated region body
PF: predicated region fallthrough
CT: control target
= control target key end

     0   :  { %11 = vsyncpa [#allocation3], 0  ;;  %s6906_s0 = inlined_call_operand.vmem [shape: f32[2,256,3], index: 0, kind: input, shape index: {}]   ;;  %s6907_s1 = inlined_call_operand.hbm [shape: f32[9,256,256], index: 1, kind: input, shape index: {}]   ;;  %s6908_s2 = inlined_call_operand.vmem [shape: f32[9,1,3], index: 2, kind: input, shape index: {}]   ;;  %s6909_s3 = inlined_call_operand.hbm [shape: f32[3,32], index: 3, kind: input, shape index: {}]   ;;  %s6910_s4 = inlined_call_operand.hbm [shape: f32[1,32], index: 4, kind: input, shape index: {}]   ;;  %s6911_s5 = inlined_call_operand.hbm [shape: f32[1,32], index: 5, kind: input, shape index: {}]   ;;  %s6912_s6 = inlined_call_operand.vmem [shape: f32[2,256,32], index: 6, kind: output, shape index: {}]  }
   0x1   :  { %12 = vsyncpa [#allocation5], 0 }
   0x2   :  { %13 = vsyncpa [#allocation8], 0  ;;  %s4393_s21 = smov 0  }
   0x3 LB: > { %s210_s24 = sshll.u32 %s6909_s3, 4  ;;  %s4402_s25 = sadd.s32 4294967295, %s4350_s21   ;;  %s4350_s21 = sphi %s4393_s21, %s19_s21   ;;  %s211_s24 = int_to_ptr.hbm [resolvable:$true] %s210_s24 }
   0x4   : > { %p4001_p0 = scmp.ge.s32.totalorder %s4350_s21, 1  ;;  %p181_p1 = scmp.lt.s32.totalorder %s4350_s21, 3 }
   0x5   : > { %p4138_p2 = scmp.eq.s32.totalorder %s4402_s25, 0  ;;  %s4352_s27 = smov [#allocation4]  }
   0x6   : > { %p4407_p3 = pnand %p4001_p0, %p181_p1  ;;  %s212_s28 = sshll.u32 %s4352_s27, 4  ;;  %s213_s28 = int_to_ptr.vmem [resolvable:$true] %s212_s28 }
   0x7   : > { %s192_s7 = sshll.u32 %s6907_s1, 4  ;;  %s4353_s9 = smov [#allocation2]   ;;  %s193_s7 = int_to_ptr.hbm [resolvable:$true] %s192_s7 }
   0x8   : > { %p4125_p4 = pneg %p4407_p3  ;;  %s194_s10 = sshll.u32 %s4353_s9, 4  ;;  %s195_s10 = int_to_ptr.vmem [resolvable:$true] %s194_s10 }
   0x9   : > { %s222_s13 = sshll.u32 %s6910_s4, 4  ;;  %s4354_s14 = smov 256   ;;  %s223_s13 = int_to_ptr.hbm [resolvable:$true] %s222_s13 }
   0xa   : > { %p4418_p5 = pnand %p4138_p2, %p4125_p4  ;;  %s4355_s15 = smov 16  }
   0xb   : > { %s4356_s16 = smov [#allocation6]   ;;  %s234_s20 = sshll.u32 %s6911_s5, 4  ;;  %s235_s20 = int_to_ptr.hbm [resolvable:$true] %s234_s20 }
   0xc   : > { %4131 = dma.hbm_to_vmem [thread:$0]  (!%p4418_p5), %s211_s24, 64, %s213_s28, [#allocation5]  }
   0xd   : > { %4128 = dma.hbm_to_vmem [thread:$0]  (!%p4418_p5), %s193_s7, 73728, %s195_s10, [#allocation3], %s4354_s14, %s4354_s14, %s4355_s15  }
   0xe   : > { %s224_s17 = sshll.u32 %s4356_s16, 4  ;;  %s4357_s22 = smov [#allocation7]   ;;  %s225_s17 = int_to_ptr.vmem [resolvable:$true] %s224_s17 }
   0xf   : > { %4134 = dma.hbm_to_vmem [thread:$0]  (!%p4418_p5), %s223_s13, 16, %s225_s17, [#allocation5]  }
  0x10   : > { %s236_s23 = sshll.u32 %s4357_s22, 4  ;;  %257 = sbr.rel (%p4407_p3) target bundleno = 1551 (0x60f), region = 44  ;;  %s237_s23 = int_to_ptr.vmem [resolvable:$true] %s236_s23 }
  0x11   : > { %4137 = dma.hbm_to_vmem [thread:$0]  (!%p4418_p5), %s235_s20, 16, %s237_s23, [#allocation8]  }
  0x15   : > { %4337 = dma.done.wait (%p4138_p2), [#allocation3], 73728  }
  0x16   : > { %4339 = vsyncadd (%p4138_p2), [#allocation3], 4294893568 }
  0x17   : > { %4341 = dma.done.wait (%p4138_p2), [#allocation5], 80  }
  0x18   : > { %4343 = vsyncadd (%p4138_p2), [#allocation5], 4294967216 }
  0x19   : > { %4345 = dma.done.wait (%p4138_p2), [#allocation8], 16  }
  0x1a   : > { %4347 = vsyncadd (%p4138_p2), [#allocation8], 4294967280  ;;  %p303_p6 = scmp.lt.s32.totalorder %s4402_s25, 1  ;;  %v393_v31 = vld [vmem:[#allocation2 + $0x180] sm:$0xff]  ;;  %v346_v34 = vld [vmem:[#allocation2 + $0x8] sm:$0xff]  ;;  %vm3649_vm0 = vcmask 1042432  }
  0x1b   : > { %v345_v33 = vld [vmem:[#allocation2] sm:$0xff]  ;;  %v395_v35 = vld [vmem:[#allocation2 + $0x190] sm:$0xff]  ;;  %v348_v37 = vld [vmem:[#allocation2 + $0x18] sm:$0xff]  ;;  %vm3552_vm1 = vcmask 23552   ;;  %vm3870_vm2 = vcmask 261120  }
  0x1c   : > { %s7464_s25 = smov (!%p303_p6, %s4402_s25), 1  ;;  %v347_v36 = vld [vmem:[#allocation2 + $0x10] sm:$0xff]  ;;  %v397_v38 = vld [vmem:[#allocation2 + $0x1a0] sm:$0xff]  ;;  %v350_v40 = vld [vmem:[#allocation2 + $0x28] sm:$0xff] }
  0x1d   : > { %s4059_s24 = sshll.u32 %s7464_s25, 8  ;;  %v349_v39 = vld [vmem:[#allocation2 + $0x20] sm:$0xff]  ;;  %v399_v41 = vld [vmem:[#allocation2 + $0x1b0] sm:$0xff]  ;;  %v352_v43 = vld [vmem:[#allocation2 + $0x38] sm:$0xff] }
  0x1e   : > { %s4460_s28 = scalar_lea.vmem %s6906_s0, %s4059_s24  ;;  %v351_v42 = vld [vmem:[#allocation2 + $0x30] sm:$0xff]  ;;  %v401_v44 = vld [vmem:[#allocation2 + $0x1c0] sm:$0xff]  ;;  %v354_v46 = vld [vmem:[#allocation2 + $0x48] sm:$0xff]  ;;  %s6650_s16 = scalar_lea.vmem %s6912_s6, %s4059_s24 }
  0x1f   : > { %v4463_v0 = vld [vmem:[%s4460_s28 + $0x78] sm:$0xff]  ;;  %v4466_v1 = vld [vmem:[%s4460_s28 + $0x70] sm:$0xff]  ;;  %v4474_v3 = vld [vmem:[%s4460_s28 + $0x68] sm:$0xff] }
  0x20   : > { %4061 = vmatpush.msra.mxu3 %v4463_v0  ;;  %409 = vmatpush.msra.mxu0 %v4463_v0  ;;  %v4471_v2 = vld [vmem:[%s4460_s28 + $0xf8] sm:$0xff]  ;;  %v4478_v4 = vld [vmem:[%s4460_s28 + $0xf0] sm:$0xff]  ;;  %v4484_v5 = vld [vmem:[%s4460_s28 + $0xe8] sm:$0xff] }
  0x21   : > { %522 = vmatpush.msra.mxu1 %v4471_v2  ;;  %736 = vmatpush.msra.mxu2 %v4463_v0  ;;  %v4487_v6 = vld [vmem:[%s4460_s28 + $0x60] sm:$0xff]  ;;  %v4497_v8 = vld [vmem:[%s4460_s28 + $0x58] sm:$0xff]  ;;  %v4507_v10 = vld [vmem:[%s4460_s28 + $0x50] sm:$0xff] }
  0x22   : > { %4062 = vmatpush.msra.mxu3 %v4466_v1  ;;  %410 = vmatpush.msra.mxu0 %v4466_v1  ;;  %v4494_v7 = vld [vmem:[%s4460_s28 + $0xe0] sm:$0xff]  ;;  %v4504_v9 = vld [vmem:[%s4460_s28 + $0xd8] sm:$0xff]  ;;  %v4514_v11 = vld [vmem:[%s4460_s28 + $0xd0] sm:$0xff] }
  0x23   : > { %523 = vmatpush.msra.mxu1 %v4478_v4  ;;  %737 = vmatpush.msra.mxu2 %v4466_v1  ;;  %v4517_v12 = vld [vmem:[%s4460_s28 + $0x48] sm:$0xff]  ;;  %v4523_v13 = vld [vmem:[%s4460_s28 + $0x40] sm:$0xff]  ;;  %v4530_v15 = vld [vmem:[%s4460_s28 + $0x38] sm:$0xff] }
  0x24   : > { %4063 = vmatpush.msra.mxu3 %v4474_v3  ;;  %411 = vmatpush.msra.mxu0 %v4474_v3  ;;  %v4527_v14 = vld [vmem:[%s4460_s28 + $0xc8] sm:$0xff]  ;;  %v4534_v16 = vld [vmem:[%s4460_s28 + $0xc0] sm:$0xff]  ;;  %v4544_v17 = vld [vmem:[%s4460_s28 + $0xb8] sm:$0xff] }
  0x25   : > { %524 = vmatpush.msra.mxu1 %v4484_v5  ;;  %738 = vmatpush.msra.mxu2 %v4474_v3  ;;  %v4547_v18 = vld [vmem:[%s4460_s28 + $0x30] sm:$0xff]  ;;  %v4557_v20 = vld [vmem:[%s4460_s28 + $0x28] sm:$0xff]  ;;  %v4567_v22 = vld [vmem:[%s4460_s28 + $0x20] sm:$0xff] }
  0x26   : > { %4064 = vmatpush.msra.mxu3 %v4487_v6  ;;  %412 = vmatpush.msra.mxu0 %v4487_v6  ;;  %v4554_v19 = vld [vmem:[%s4460_s28 + $0xb0] sm:$0xff]  ;;  %v4564_v21 = vld [vmem:[%s4460_s28 + $0xa8] sm:$0xff]  ;;  %v4574_v23 = vld [vmem:[%s4460_s28 + $0xa0] sm:$0xff] }
  0x27   : > { %525 = vmatpush.msra.mxu1 %v4494_v7  ;;  %739 = vmatpush.msra.mxu2 %v4487_v6  ;;  %v4577_v24 = vld [vmem:[%s4460_s28 + $0x18] sm:$0xff]  ;;  %v4587_v26 = vld [vmem:[%s4460_s28 + $0x10] sm:$0xff]  ;;  %v4597_v28 = vld [vmem:[%s4460_s28 + $0x8] sm:$0xff] }
  0x28   : > { %4065 = vmatpush.msra.mxu3 %v4497_v8  ;;  %413 = vmatpush.msra.mxu0 %v4497_v8  ;;  %v4584_v25 = vld [vmem:[%s4460_s28 + $0x98] sm:$0xff]  ;;  %v4594_v27 = vld [vmem:[%s4460_s28 + $0x90] sm:$0xff]  ;;  %v4604_v29 = vld [vmem:[%s4460_s28 + $0x88] sm:$0xff] }
  0x29   : > { %526 = vmatpush.msra.mxu1 %v4504_v9  ;;  %740 = vmatpush.msra.mxu2 %v4497_v8  ;;  %v4607_v30 = vld [vmem:[%s4460_s28] sm:$0xff]  ;;  %v403_v47 = vld [vmem:[#allocation2 + $0x1d0] sm:$0xff]  ;;  %v356_v49 = vld [vmem:[#allocation2 + $0x58] sm:$0xff] }
  0x2a   : > { %4066 = vmatpush.msra.mxu3 %v4507_v10  ;;  %414 = vmatpush.msra.mxu0 %v4507_v10  ;;  %v4614_v32 = vld [vmem:[%s4460_s28 + $0x80] sm:$0xff]  ;;  %v355_v48 = vld [vmem:[#allocation2 + $0x50] sm:$0xff]  ;;  %v358_v52 = vld [vmem:[#allocation2 + $0x68] sm:$0xff] }
  0x2b   : > { %527 = vmatpush.msra.mxu1 %v4514_v11  ;;  %741 = vmatpush.msra.mxu2 %v4507_v10  ;;  %v353_v45 = vld [vmem:[#allocation2 + $0x40] sm:$0xff]  ;;  %v407_v53 = vld [vmem:[#allocation2 + $0x1f0] sm:$0xff]  ;;  %v360_v55 = vld [vmem:[#allocation2 + $0x78] sm:$0xff] }
  0x2c   : > { %4067 = vmatpush.msra.mxu3 %v4517_v12  ;;  %415 = vmatpush.msra.mxu0 %v4517_v12  ;;  %v405_v50 = vld [vmem:[#allocation2 + $0x1e0] sm:$0xff]  ;;  %v359_v54 = vld [vmem:[#allocation2 + $0x70] sm:$0xff]  ;;  %v394_v56 = vld [vmem:[#allocation2 + $0x188] sm:$0xff] }
  0x2d   : > { %528 = vmatpush.msra.mxu1 %v4527_v14  ;;  %742 = vmatpush.msra.mxu2 %v4517_v12  ;;  %v357_v51 = vld [vmem:[#allocation2 + $0x60] sm:$0xff]  ;;  %v362_v58 = vld [vmem:[#allocation2 + $0x88] sm:$0xff]  ;;  %v396_v59 = vld [vmem:[#allocation2 + $0x198] sm:$0xff] }
  0x2e   : > { %4068 = vmatpush.msra.mxu3 %v4523_v13  ;;  %416 = vmatpush.msra.mxu0 %v4523_v13  ;;  %v361_v57 = vld [vmem:[#allocation2 + $0x80] sm:$0xff]  ;;  %v363_v60 = vld [vmem:[#allocation2 + $0x90] sm:$0xff]  ;;  %v364_v61 = vld [vmem:[#allocation2 + $0x98] sm:$0xff] }
  0x2f   : > { %529 = vmatpush.msra.mxu1 %v4534_v16  ;;  %743 = vmatpush.msra.mxu2 %v4523_v13  ;;  %v398_v62 = vld [vmem:[#allocation2 + $0x1a8] sm:$0xff]  ;;  %v365_v63 = vld [vmem:[#allocation2 + $0xa0] sm:$0xff] }
  0x30   : > { %4069 = vmatpush.msra.mxu3 %v4530_v15  ;;  %417 = vmatpush.msra.mxu0 %v4530_v15 }
  0x31   : > { %530 = vmatpush.msra.mxu1 %v4544_v17  ;;  %744 = vmatpush.msra.mxu2 %v4530_v15 }
  0x32   : > { %4070 = vmatpush.msra.mxu3 %v4547_v18  ;;  %418 = vmatpush.msra.mxu0 %v4547_v18 }
  0x33   : > { %531 = vmatpush.msra.mxu1 %v4554_v19  ;;  %745 = vmatpush.msra.mxu2 %v4547_v18 }
  0x34   : > { %4071 = vmatpush.msra.mxu3 %v4557_v20  ;;  %419 = vmatpush.msra.mxu0 %v4557_v20 }
  0x35   : > { %532 = vmatpush.msra.mxu1 %v4564_v21  ;;  %746 = vmatpush.msra.mxu2 %v4557_v20 }
  0x36   : > { %4072 = vmatpush.msra.mxu3 %v4567_v22  ;;  %420 = vmatpush.msra.mxu0 %v4567_v22 }
  0x37   : > { %533 = vmatpush.msra.mxu1 %v4574_v23  ;;  %747 = vmatpush.msra.mxu2 %v4567_v22 }
  0x38   : > { %4073 = vmatpush.msra.mxu3 %v4577_v24  ;;  %421 = vmatpush.msra.mxu0 %v4577_v24 }
  0x39   : > { %534 = vmatpush.msra.mxu1 %v4584_v25  ;;  %748 = vmatpush.msra.mxu2 %v4577_v24 }
  0x3a   : > { %4074 = vmatpush.msra.mxu3 %v4587_v26  ;;  %422 = vmatpush.msra.mxu0 %v4587_v26 }
  0x3b   : > { %535 = vmatpush.msra.mxu1 %v4594_v27  ;;  %749 = vmatpush.msra.mxu2 %v4587_v26 }
  0x3c   : > { %4075 = vmatpush.msra.mxu3 %v4597_v28  ;;  %423 = vmatpush.msra.mxu0 %v4597_v28 }
  0x3d   : > { %536 = vmatpush.msra.mxu1 %v4604_v29  ;;  %750 = vmatpush.msra.mxu2 %v4597_v28 }
  0x3e   : > { %4076 = vmatpush.msra.mxu3 %v4607_v30  ;;  %424 = vmatpush.msra.mxu0 %v4607_v30 }
  0x3f   : > { %497 = vmatmul.f32.vlgmr.msra.gmra.mxu3 %v393_v31  ;;  %537 = vmatpush.msra.mxu1 %v4614_v32  ;;  %v366_v31 = vld [vmem:[#allocation2 + $0xa8] sm:$0xff] }
  0x40   : > { %4077 = vmatpush.msrb.mxu3 %v4471_v2  ;;  %425 = vmatmul.f32.vlgmr.msra.gmra.mxu0 %v345_v33  ;;  %v400_v33 = vld [vmem:[#allocation2 + $0x1b8] sm:$0xff] }
  0x41   : > { %538 = vmatmul.f32.vlgmr.msra.gmra.mxu1 %v346_v34  ;;  %1096 = vmatpush.msrb.mxu0 %v4463_v0  ;;  %v367_v34 = vld [vmem:[#allocation2 + $0xb0] sm:$0xff] }
  0x42   : > { %4078 = vmatpush.msrb.mxu3 %v4478_v4  ;;  %1209 = vmatpush.msrb.mxu1 %v4471_v2 }
  0x43   : > { %1097 = vmatpush.msrb.mxu0 %v4466_v1  ;;  %751 = vmatpush.msra.mxu2 %v4607_v30 }
  0x44   : > { %4079 = vmatpush.msrb.mxu3 %v4484_v5  ;;  %1210 = vmatpush.msrb.mxu1 %v4478_v4 }
  0x45   : > { %1098 = vmatpush.msrb.mxu0 %v4474_v3  ;;  %1456 = vmatpush.msrb.mxu2 %v4463_v0 }
  0x46   : > { %4080 = vmatpush.msrb.mxu3 %v4494_v7  ;;  %1211 = vmatpush.msrb.mxu1 %v4484_v5 }
  0x47   : > { %500 = vmatmul.f32.gmra.mxu3 %v395_v35  ;;  %1099 = vmatpush.msrb.mxu0 %v4487_v6  ;;  %v368_v35 = vld [vmem:[#allocation2 + $0xb8] sm:$0xff] }
  0x48   : > { %428 = vmatmul.f32.gmra.mxu0 %v347_v36  ;;  %4081 = vmatpush.msrb.mxu3 %v4504_v9  ;;  %v402_v36 = vld [vmem:[#allocation2 + $0x1c8] sm:$0xff] }
  0x49   : > { %541 = vmatmul.f32.gmra.mxu1 %v348_v37  ;;  %1100 = vmatpush.msrb.mxu0 %v4497_v8  ;;  %v369_v37 = vld [vmem:[#allocation2 + $0xc0] sm:$0xff] }
  0x4a   : > { %4082 = vmatpush.msrb.mxu3 %v4514_v11  ;;  %1212 = vmatpush.msrb.mxu1 %v4494_v7 }
  0x4b   : > { %1101 = vmatpush.msrb.mxu0 %v4507_v10  ;;  %1457 = vmatpush.msrb.mxu2 %v4466_v1 }
  0x4c   : > { %4083 = vmatpush.msrb.mxu3 %v4527_v14  ;;  %1213 = vmatpush.msrb.mxu1 %v4504_v9 }
  0x4d   : > { %1102 = vmatpush.msrb.mxu0 %v4517_v12  ;;  %1458 = vmatpush.msrb.mxu2 %v4474_v3 }
  0x4e   : > { %4084 = vmatpush.msrb.mxu3 %v4534_v16  ;;  %1214 = vmatpush.msrb.mxu1 %v4514_v11 }
  0x4f   : > { %503 = vmatmul.f32.gmra.mxu3 %v397_v38  ;;  %1103 = vmatpush.msrb.mxu0 %v4523_v13  ;;  %v370_v38 = vld [vmem:[#allocation2 + $0xc8] sm:$0xff] }
  0x50   : > { %431 = vmatmul.f32.gmra.mxu0 %v349_v39  ;;  %4085 = vmatpush.msrb.mxu3 %v4544_v17  ;;  %v404_v39 = vld [vmem:[#allocation2 + $0x1d8] sm:$0xff] }
  0x51   : > { %544 = vmatmul.f32.gmra.mxu1 %v350_v40  ;;  %1104 = vmatpush.msrb.mxu0 %v4530_v15  ;;  %v371_v40 = vld [vmem:[#allocation2 + $0xd0] sm:$0xff] }
  0x52   : > { %4086 = vmatpush.msrb.mxu3 %v4554_v19  ;;  %1215 = vmatpush.msrb.mxu1 %v4527_v14 }
  0x53   : > { %1105 = vmatpush.msrb.mxu0 %v4547_v18  ;;  %1459 = vmatpush.msrb.mxu2 %v4487_v6 }
  0x54   : > { %4087 = vmatpush.msrb.mxu3 %v4564_v21  ;;  %1216 = vmatpush.msrb.mxu1 %v4534_v16 }
  0x55   : > { %1106 = vmatpush.msrb.mxu0 %v4557_v20  ;;  %1460 = vmatpush.msrb.mxu2 %v4497_v8 }
  0x56   : > { %4088 = vmatpush.msrb.mxu3 %v4574_v23  ;;  %1217 = vmatpush.msrb.mxu1 %v4544_v17 }
  0x57   : > { %506 = vmatmul.f32.gmra.mxu3 %v399_v41  ;;  %1107 = vmatpush.msrb.mxu0 %v4567_v22  ;;  %v372_v41 = vld [vmem:[#allocation2 + $0xd8] sm:$0xff] }
  0x58   : > { %434 = vmatmul.f32.gmra.mxu0 %v351_v42  ;;  %4089 = vmatpush.msrb.mxu3 %v4584_v25  ;;  %v672_v42 = vld [vmem:[#allocation2 + $0x200] sm:$0xff] }
  0x59   : > { %547 = vmatmul.f32.gmra.mxu1 %v352_v43  ;;  %1108 = vmatpush.msrb.mxu0 %v4577_v24  ;;  %v406_v43 = vld [vmem:[#allocation2 + $0x1e8] sm:$0xff] }
  0x5a   : > { %4090 = vmatpush.msrb.mxu3 %v4594_v27  ;;  %1218 = vmatpush.msrb.mxu1 %v4554_v19 }
  0x5b   : > { %1109 = vmatpush.msrb.mxu0 %v4587_v26  ;;  %1461 = vmatpush.msrb.mxu2 %v4507_v10 }
  0x5c   : > { %4091 = vmatpush.msrb.mxu3 %v4604_v29  ;;  %1219 = vmatpush.msrb.mxu1 %v4564_v21 }
  0x5d   : > { %1110 = vmatpush.msrb.mxu0 %v4597_v28  ;;  %1462 = vmatpush.msrb.mxu2 %v4517_v12 }
  0x5e   : > { %4092 = vmatpush.msrb.mxu3 %v4614_v32  ;;  %1220 = vmatpush.msrb.mxu1 %v4574_v23 }
  0x5f   : > { %509 = vmatmul.f32.gmra.mxu3 %v401_v44  ;;  %1111 = vmatpush.msrb.mxu0 %v4607_v30  ;;  %v373_v44 = vld [vmem:[#allocation2 + $0xe0] sm:$0xff] }
  0x60   : > { %437 = vmatmul.f32.gmra.mxu0 %v353_v45  ;;  %4093 = vmatpush.msra.mxu3 %v4463_v0  ;;  %v374_v45 = vld [vmem:[#allocation2 + $0xe8] sm:$0xff] }
  0x61   : > { %550 = vmatmul.f32.gmra.mxu1 %v354_v46  ;;  %1816 = vmatpush.msra.mxu0 %v4463_v0  ;;  %v674_v46 = vld [vmem:[#allocation2 + $0x210] sm:$0xff] }
  0x62   : > { %4094 = vmatpush.msra.mxu3 %v4466_v1  ;;  %1221 = vmatpush.msrb.mxu1 %v4584_v25 }
  0x63   : > { %1817 = vmatpush.msra.mxu0 %v4466_v1  ;;  %1463 = vmatpush.msrb.mxu2 %v4523_v13 }
  0x64   : > { %4095 = vmatpush.msra.mxu3 %v4474_v3  ;;  %1222 = vmatpush.msrb.mxu1 %v4594_v27 }
  0x65   : > { %1818 = vmatpush.msra.mxu0 %v4474_v3  ;;  %1464 = vmatpush.msrb.mxu2 %v4530_v15 }
  0x66   : > { %4096 = vmatpush.msra.mxu3 %v4487_v6  ;;  %1223 = vmatpush.msrb.mxu1 %v4604_v29 }
  0x67   : > { %512 = vmatmul.f32.gmra.mxu3 %v403_v47  ;;  %1465 = vmatpush.msrb.mxu2 %v4547_v18  ;;  %v408_v47 = vld [vmem:[#allocation2 + $0x1f8] sm:$0xff] }
  0x68   : > { %440 = vmatmul.f32.gmra.mxu0 %v355_v48  ;;  %4097 = vmatpush.msra.mxu3 %v4497_v8  ;;  %v375_v48 = vld [vmem:[#allocation2 + $0xf0] sm:$0xff] }
  0x69   : > { %553 = vmatmul.f32.gmra.mxu1 %v356_v49  ;;  %1819 = vmatpush.msra.mxu0 %v4487_v6  ;;  %v376_v49 = vld [vmem:[#allocation2 + $0xf8] sm:$0xff] }
  0x6a   : > { %4098 = vmatpush.msra.mxu3 %v4507_v10  ;;  %1224 = vmatpush.msrb.mxu1 %v4614_v32 }
  0x6b   : > { %1466 = vmatpush.msrb.mxu2 %v4557_v20  ;;  %1820 = vmatpush.msra.mxu0 %v4497_v8 }
  0x6c   : > { %1929 = vmatpush.msra.mxu1 %v4471_v2  ;;  %4099 = vmatpush.msra.mxu3 %v4517_v12 }
  0x6d   : > { %1467 = vmatpush.msrb.mxu2 %v4567_v22  ;;  %1821 = vmatpush.msra.mxu0 %v4507_v10 }
  0x6e   : > { %1930 = vmatpush.msra.mxu1 %v4478_v4  ;;  %4100 = vmatpush.msra.mxu3 %v4523_v13 }
  0x6f   : > { %515 = vmatmul.f32.gmra.mxu3 %v405_v50  ;;  %1468 = vmatpush.msrb.mxu2 %v4577_v24  ;;  %v676_v50 = vld [vmem:[#allocation2 + $0x220] sm:$0xff] }
  0x70   : > { %1931 = vmatpush.msra.mxu1 %v4484_v5  ;;  %443 = vmatmul.f32.gmra.mxu0 %v357_v51  ;;  %v720_v51 = vld [vmem:[#allocation2 + $0x380] sm:$0xff] }
  0x71   : > { %4101 = vmatpush.msra.mxu3 %v4530_v15  ;;  %556 = vmatmul.f32.gmra.mxu1 %v358_v52 }
  0x72   : > { %1932 = vmatpush.msra.mxu1 %v4494_v7  ;;  %1469 = vmatpush.msrb.mxu2 %v4587_v26 }
  0x73   : > { %4102 = vmatpush.msra.mxu3 %v4547_v18  ;;  %1822 = vmatpush.msra.mxu0 %v4517_v12 }
  0x74   : > { %1933 = vmatpush.msra.mxu1 %v4504_v9  ;;  %1470 = vmatpush.msrb.mxu2 %v4597_v28 }
  0x75   : > { %4103 = vmatpush.msra.mxu3 %v4557_v20  ;;  %1823 = vmatpush.msra.mxu0 %v4523_v13 }
  0x76   : > { %1934 = vmatpush.msra.mxu1 %v4514_v11  ;;  %1471 = vmatpush.msrb.mxu2 %v4607_v30 }
  0x77   : > { %4104 = vmatpush.msra.mxu3 %v4567_v22  ;;  %1824 = vmatpush.msra.mxu0 %v4530_v15 }
  0x78   : > { %518 = vmatmul.f32.gmra.mxu3 %v407_v53  ;;  %446 = vmatmul.f32.gmra.mxu0 %v359_v54  ;;  %v377_v53 = vld [vmem:[#allocation2 + $0x100] sm:$0xff] }
  0x79   : > { %4105 = vmatpush.msra.mxu3 %v4577_v24  ;;  %559 = vmatmul.f32.gmra.mxu1 %v360_v55  ;;  %v378_v55 = vld [vmem:[#allocation2 + $0x108] sm:$0xff] }
  0x7a   : > { %1935 = vmatpush.msra.mxu1 %v4527_v14  ;;  %1825 = vmatpush.msra.mxu0 %v4547_v18 }
  0x7b   : > { %4106 = vmatpush.msra.mxu3 %v4587_v26  ;;  %752 = vmatmul.f32.vlgmr.msra.gmra.mxu2 %v672_v42  ;;  %v383_v42 = vld [vmem:[#allocation2 + $0x130] sm:$0xff] }
  0x7c   : > { %1936 = vmatpush.msra.mxu1 %v4534_v16  ;;  %1826 = vmatpush.msra.mxu0 %v4557_v20 }
  0x7d   : > { %4107 = vmatpush.msra.mxu3 %v4597_v28  ;;  %2176 = vmatpush.msra.mxu2 %v4463_v0 }
  0x7e   : > { %1937 = vmatpush.msra.mxu1 %v4544_v17  ;;  %1827 = vmatpush.msra.mxu0 %v4567_v22 }
  0x7f   : > { %4108 = vmatpush.msra.mxu3 %v4607_v30  ;;  %2177 = vmatpush.msra.mxu2 %v4466_v1 }
  0x80   : > { %610 = vmatmul.f32.vlgmr.msrb.gmra.mxu3 %v394_v56  ;;  %449 = vmatmul.f32.gmra.mxu0 %v361_v57  ;;  %v678_v57 = vld [vmem:[#allocation2 + $0x230] sm:$0xff] }
  0x81   : > { %849 = vmatpush.msrb.mxu3 %v4471_v2  ;;  %562 = vmatmul.f32.gmra.mxu1 %v362_v58  ;;  %v722_v58 = vld [vmem:[#allocation2 + $0x390] sm:$0xff] }
  0x82   : > { %1828 = vmatpush.msra.mxu0 %v4577_v24  ;;  %1938 = vmatpush.msra.mxu1 %v4554_v19 }
  0x83   : > { %850 = vmatpush.msrb.mxu3 %v4478_v4  ;;  %2178 = vmatpush.msra.mxu2 %v4474_v3 }
  0x84   : > { %1829 = vmatpush.msra.mxu0 %v4587_v26  ;;  %1939 = vmatpush.msra.mxu1 %v4564_v21 }
  0x85   : > { %851 = vmatpush.msrb.mxu3 %v4484_v5  ;;  %2179 = vmatpush.msra.mxu2 %v4487_v6 }
  0x86   : > { %1830 = vmatpush.msra.mxu0 %v4597_v28  ;;  %1940 = vmatpush.msra.mxu1 %v4574_v23 }
  0x87   : > { %852 = vmatpush.msrb.mxu3 %v4494_v7  ;;  %755 = vmatmul.f32.gmra.mxu2 %v674_v46  ;;  %v684_v46 = vld [vmem:[#allocation2 + $0x260] sm:$0xff] }
  0x88   : > { %613 = vmatmul.f32.gmra.mxu3 %v396_v59  ;;  %1831 = vmatpush.msra.mxu0 %v4607_v30 }
  0x89   : > { %452 = vmatmul.f32.gmra.mxu0 %v363_v60  ;;  %853 = vmatpush.msrb.mxu3 %v4504_v9  ;;  %v379_v60 = vld [vmem:[#allocation2 + $0x110] sm:$0xff] }
  0x8a   : > { %565 = vmatmul.f32.gmra.mxu1 %v364_v61  ;;  %2180 = vmatpush.msra.mxu2 %v4497_v8 }
  0x8b   : > { %854 = vmatpush.msrb.mxu3 %v4514_v11  ;;  %1941 = vmatpush.msra.mxu1 %v4584_v25 }
  0x8c   : > { %2181 = vmatpush.msra.mxu2 %v4507_v10 }
  0x8d   : > { %855 = vmatpush.msrb.mxu3 %v4527_v14  ;;  %1942 = vmatpush.msra.mxu1 %v4594_v27 }
  0x8e   : > { %2182 = vmatpush.msra.mxu2 %v4517_v12 }
  0x8f   : > { %856 = vmatpush.msrb.mxu3 %v4534_v16  ;;  %1943 = vmatpush.msra.mxu1 %v4604_v29 }
  0x90   : > { %616 = vmatmul.f32.gmra.mxu3 %v398_v62  ;;  %2183 = vmatpush.msra.mxu2 %v4523_v13  ;;  %v380_v62 = vld [vmem:[#allocation2 + $0x118] sm:$0xff] }
  0x91   : > { %455 = vmatmul.f32.gmra.mxu0 %v365_v63  ;;  %857 = vmatpush.msrb.mxu3 %v4544_v17 }
  0x92   : > { %568 = vmatmul.f32.gmra.mxu1 %v366_v31  ;;  %758 = vmatmul.f32.gmra.mxu2 %v676_v50  ;;  %v680_v31 = vld [vmem:[#allocation2 + $0x240] sm:$0xff] }
  0x93   : > { %858 = vmatpush.msrb.mxu3 %v4554_v19  ;;  %1944 = vmatpush.msra.mxu1 %v4614_v32 }
  0x94   : > { %2184 = vmatpush.msra.mxu2 %v4530_v15 }
  0x95   : > { %859 = vmatpush.msrb.mxu3 %v4564_v21 }
  0x96   : > { %2185 = vmatpush.msra.mxu2 %v4547_v18 }
  0x97   : > { %860 = vmatpush.msrb.mxu3 %v4574_v23 }
  0x98   : > { %619 = vmatmul.f32.gmra.mxu3 %v400_v33  ;;  %2186 = vmatpush.msra.mxu2 %v4557_v20  ;;  %v724_v33 = vld [vmem:[#allocation2 + $0x3a0] sm:$0xff] }
  0x99   : > { %458 = vmatmul.f32.gmra.mxu0 %v367_v34  ;;  %861 = vmatpush.msrb.mxu3 %v4584_v25 }
  0x9a   : > { %571 = vmatmul.f32.gmra.mxu1 %v368_v35  ;;  %761 = vmatmul.f32.gmra.mxu2 %v678_v57  ;;  %v381_v35 = vld [vmem:[#allocation2 + $0x120] sm:$0xff]  ;;  %v730_v57 = vld [vmem:[#allocation2 + $0x3d0] sm:$0xff] }
  0x9b   : > { %862 = vmatpush.msrb.mxu3 %v4594_v27  ;;  %2187 = vmatpush.msra.mxu2 %v4567_v22 }
  0x9d   : > { %863 = vmatpush.msrb.mxu3 %v4604_v29  ;;  %2188 = vmatpush.msra.mxu2 %v4577_v24 }
  0x9f   : > { %864 = vmatpush.msrb.mxu3 %v4614_v32  ;;  %2189 = vmatpush.msra.mxu2 %v4587_v26 }
  0xa0   : > { %622 = vmatmul.f32.gmra.mxu3 %v402_v36 }
  0xa1   : > { %461 = vmatmul.f32.gmra.mxu0 %v369_v37  ;;  %2190 = vmatpush.msra.mxu2 %v4597_v28  ;;  %v382_v37 = vld [vmem:[#allocation2 + $0x128] sm:$0xff] }
  0xa2   : > { %574 = vmatmul.f32.gmra.mxu1 %v370_v38  ;;  %764 = vmatmul.f32.gmra.mxu2 %v680_v31  ;;  %v388_v31 = vld [vmem:[#allocation2 + $0x158] sm:$0xff] }
  0xa3   : > { %2191 = vmatpush.msra.mxu2 %v4607_v30 }
  0xa8   : > { %625 = vmatmul.f32.gmra.mxu3 %v404_v39  ;;  %v682_v39 = vld [vmem:[#allocation2 + $0x250] sm:$0xff] }
  0xa9   : > { %464 = vmatmul.f32.gmra.mxu0 %v371_v40  ;;  %v726_v40 = vld [vmem:[#allocation2 + $0x3b0] sm:$0xff] }
  0xaa   : > { %577 = vmatmul.f32.gmra.mxu1 %v372_v41  ;;  %767 = vmatmul.f32.gmra.mxu2 %v682_v39 }
  0xb0   : > { %628 = vmatmul.f32.gmra.mxu3 %v406_v43 }
  0xb1   : > { %467 = vmatmul.f32.gmra.mxu0 %v373_v44  ;;  %v384_v44 = vld [vmem:[#allocation2 + $0x138] sm:$0xff] }
  0xb2   : > { %580 = vmatmul.f32.gmra.mxu1 %v374_v45  ;;  %770 = vmatmul.f32.gmra.mxu2 %v684_v46 }
  0xb8   : > { %631 = vmatmul.f32.gmra.mxu3 %v408_v47  ;;  %v728_v47 = vld [vmem:[#allocation2 + $0x3c0] sm:$0xff] }
  0xb9   : > { %470 = vmatmul.f32.gmra.mxu0 %v375_v48 }
  0xba   : > { %583 = vmatmul.f32.gmra.mxu1 %v376_v49  ;;  %v385_v49 = vld [vmem:[#allocation2 + $0x140] sm:$0xff] }
  0xbd   : > { %v4759_v52 = vpop.f32.mrf.mxu0 }
  0xbe   : > { %v4761_v54 = vpop.f32.mrf.mxu1 }
  0xc0   : > { %824 = vmatmul.f32.vlgmr.msra.gmra.mxu3 %v720_v51  ;;  %v386_v51 = vld [vmem:[#allocation2 + $0x148] sm:$0xff] }
  0xc1   : > { %473 = vmatmul.f32.gmra.mxu0 %v377_v53  ;;  %1569 = vmatpush.msra.mxu3 %v4471_v2 }
  0xc2   : > { %586 = vmatmul.f32.gmra.mxu1 %v378_v55  ;;  %v4766_v56 = vpop.f32.mrf.mxu3  ;;  %v686_v55 = vld [vmem:[#allocation2 + $0x270] sm:$0xff] }
  0xc3   : > { %1570 = vmatpush.msra.mxu3 %v4478_v4  ;;  %773 = vmatmul.f32.gmra.mxu2 %v686_v55  ;;  %v391_v55 = vld [vmem:[#allocation2 + $0x170] sm:$0xff] }
  0xc5   : > { %1571 = vmatpush.msra.mxu3 %v4484_v5  ;;  %v4771_v59 = vpop.f32.mrf.mxu0 }
  0xc6   : > { %v4773_v61 = vpop.f32.mrf.mxu1 }
  0xc7   : > { %1572 = vmatpush.msra.mxu3 %v4494_v7 }
  0xc8   : > { %827 = vmatmul.f32.gmra.mxu3 %v722_v58 }
  0xc9   : > { %476 = vmatmul.f32.gmra.mxu0 %v379_v60  ;;  %1573 = vmatpush.msra.mxu3 %v4504_v9  ;;  %v387_v60 = vld [vmem:[#allocation2 + $0x150] sm:$0xff] }
  0xca   : > { %589 = vmatmul.f32.gmra.mxu1 %v380_v62  ;;  %v4779_v63 = vpop.f32.mrf.mxu3 }
  0xcb   : > { %1574 = vmatpush.msra.mxu3 %v4514_v11 }
  0xcd   : > { %1575 = vmatpush.msra.mxu3 %v4527_v14  ;;  %v4784_v34 = vpop.f32.mrf.mxu0 }
  0xce   : > { %v4786_v36 = vpop.f32.mrf.mxu1 }
  0xcf   : > { %1576 = vmatpush.msra.mxu3 %v4534_v16 }
  0xd0   : > { %830 = vmatmul.f32.gmra.mxu3 %v724_v33 }
  0xd1   : > { %479 = vmatmul.f32.gmra.mxu0 %v381_v35  ;;  %1577 = vmatpush.msra.mxu3 %v4544_v17  ;;  %v688_v35 = vld [vmem:[#allocation2 + $0x280] sm:$0xff] }
  0xd2   : > { %592 = vmatmul.f32.gmra.mxu1 %v382_v37  ;;  %v4791_v38 = vpop.f32.mrf.mxu3  ;;  %776 = vmatmul.f32.gmra.mxu2 %v688_v35  ;;  %v732_v37 = vld [vmem:[#allocation2 + $0x3e0] sm:$0xff] }
  0xd3   : > { %1578 = vmatpush.msra.mxu3 %v4554_v19  ;;  %v692_v35 = vld [vmem:[#allocation2 + $0x2a0] sm:$0xff] }
  0xd5   : > { %1579 = vmatpush.msra.mxu3 %v4564_v21  ;;  %v4795_v41 = vpop.f32.mrf.mxu0 }
  0xd6   : > { %6915 = vst [vmem:[#allocation12_spill] sm:$0xff] %v4795_v41  ;;  %v4797_v43 = vpop.f32.mrf.mxu1 }
  0xd7   : > { %6916 = vst [vmem:[#allocation13_spill] sm:$0xff] %v4797_v43  ;;  %1580 = vmatpush.msra.mxu3 %v4574_v23 }
  0xd8   : > { %833 = vmatmul.f32.gmra.mxu3 %v726_v40  ;;  %v389_v40 = vld [vmem:[#allocation2 + $0x160] sm:$0xff] }
  0xd9   : > { %482 = vmatmul.f32.gmra.mxu0 %v383_v42  ;;  %1581 = vmatpush.msra.mxu3 %v4584_v25 }
  0xda   : > { %595 = vmatmul.f32.gmra.mxu1 %v384_v44  ;;  %v4801_v45 = vpop.f32.mrf.mxu3  ;;  %v390_v44 = vld [vmem:[#allocation2 + $0x168] sm:$0xff] }
  0xdb   : > { %1582 = vmatpush.msra.mxu3 %v4594_v27 }
  0xdd   : > { %1583 = vmatpush.msra.mxu3 %v4604_v29  ;;  %v4805_v48 = vpop.f32.mrf.mxu0 }
  0xde   : > { %6917 = vst [vmem:[#allocation14_spill] sm:$0xff] %v4805_v48  ;;  %v4807_v50 = vpop.f32.mrf.mxu1  ;;  %v1071_v48 = vld [vmem:[#allocation2 + $0x538] sm:$0xff] }
  0xdf   : > { %6918 = vst [vmem:[#allocation15_spill] sm:$0xff] %v4807_v50  ;;  %1584 = vmatpush.msra.mxu3 %v4614_v32 }
  0xe0   : > { %836 = vmatmul.f32.gmra.mxu3 %v728_v47  ;;  %v690_v47 = vld [vmem:[#allocation2 + $0x290] sm:$0xff] }
  0xe1   : > { %485 = vmatmul.f32.gmra.mxu0 %v385_v49  ;;  %779 = vmatmul.f32.gmra.mxu2 %v690_v47  ;;  %v734_v49 = vld [vmem:[#allocation2 + $0x3f0] sm:$0xff]  ;;  %v1033_v47 = vld [vmem:[#allocation2 + $0x408] sm:$0xff] }
  0xe2   : > { %598 = vmatmul.f32.gmra.mxu1 %v386_v51  ;;  %v4810_v53 = vpop.f32.mrf.mxu3 }
  0xe5   : > { %v4812_v58 = vpop.f32.mrf.mxu0 }
  0xe6   : > { %6919 = vst [vmem:[#allocation16_spill] sm:$0xff] %v4812_v58  ;;  %v4814_v62 = vpop.f32.mrf.mxu1  ;;  %v711_v58 = vld [vmem:[#allocation2 + $0x338] sm:$0xff] }
  0xe7   : > { %6920 = vst [vmem:[#allocation17_spill] sm:$0xff] %v4814_v62  ;;  %v1402_v62 = vld [vmem:[#allocation2 + $0x650] sm:$0xff] }
  0xe8   : > { %839 = vmatmul.f32.gmra.mxu3 %v730_v57 }
  0xe9   : > { %488 = vmatmul.f32.gmra.mxu0 %v387_v60  ;;  %v392_v60 = vld [vmem:[#allocation2 + $0x178] sm:$0xff]  ;;  %782 = vmatmul.f32.gmra.mxu2 %v692_v35 }
  0xea   : > { %601 = vmatmul.f32.gmra.mxu1 %v388_v31  ;;  %v4816_v33 = vpop.f32.mrf.mxu3  ;;  %v675_v35 = vld [vmem:[#allocation2 + $0x218] sm:$0xff] }
  0xed   : > { %v4818_v39 = vpop.f32.mrf.mxu0 }
  0xee   : > { %6921 = vst [vmem:[#allocation18_spill] sm:$0xff] %v4818_v39  ;;  %v4820_v42 = vpop.f32.mrf.mxu1  ;;  %v1068_v39 = vld [vmem:[#allocation2 + $0x520] sm:$0xff] }
  0xef   : > { %6922 = vst [vmem:[#allocation19_spill] sm:$0xff] %v4820_v42 }
  0xf0   : > { %842 = vmatmul.f32.gmra.mxu3 %v732_v37  ;;  %v673_v37 = vld [vmem:[#allocation2 + $0x208] sm:$0xff] }
  0xf1   : > { %491 = vmatmul.f32.gmra.mxu0 %v389_v40 }
  0xf2   : > { %604 = vmatmul.f32.gmra.mxu1 %v390_v44  ;;  %v4822_v46 = vpop.f32.mrf.mxu3  ;;  %v1032_v44 = vld [vmem:[#allocation2 + $0x400] sm:$0xff] }
  0xf5   : > { %v4824_v51 = vpop.f32.mrf.mxu0 }
  0xf6   : > { %6923 = vst [vmem:[#allocation20_spill] sm:$0xff] %v4824_v51  ;;  %v4826_v57 = vpop.f32.mrf.mxu1  ;;  %v5079_v51 = vld [vmem:[%s4460_s28] sm:$0xff] }
  0xf7   : > { %6924 = vst [vmem:[#allocation21_spill] sm:$0xff] %v4826_v57  ;;  %v1400_v57 = vld [vmem:[#allocation2 + $0x640] sm:$0xff] }
  0xf8   : > { %845 = vmatmul.f32.gmra.mxu3 %v734_v49 }
  0xf9   : > { %494 = vmatmul.f32.gmra.mxu0 %v391_v55  ;;  %v694_v55 = vld [vmem:[#allocation2 + $0x2b0] sm:$0xff] }
  0xfa   : > { %607 = vmatmul.f32.gmra.mxu1 %v392_v60  ;;  %785 = vmatmul.f32.gmra.mxu2 %v694_v55  ;;  %v685_v55 = vld [vmem:[#allocation2 + $0x268] sm:$0xff] }
  0xfb   : > { %v4828_v31 = vpop.f32.mrf.mxu3 }
  0xfd   : > { %v4830_v40 = vpop.f32.mrf.mxu0 }
  0xfe   : > { %6925 = vst [vmem:[#allocation22_spill] sm:$0xff] %v4830_v40  ;;  %v4832_v42 = vpop.f32.mrf.mxu1  ;;  %v5069_v40 = vld [vmem:[%s4460_s28 + $0x10] sm:$0xff] }
  0xff   : > { %6926 = vst [vmem:[#allocation23_spill] sm:$0xff] %v4832_v42 }
 0x100   : > { %865 = vmatmul.f32.vlgmr.msrb.gmra.mxu3 %v673_v37 }
 0x101   : > { %1112 = vmatmul.f32.vlgmr.msrb.gmra.mxu0 %v1032_v44  ;;  %2289 = vmatpush.msrb.mxu3 %v4471_v2 }
 0x102   : > { %1225 = vmatmul.f32.vlgmr.msrb.gmra.mxu1 %v1033_v47  ;;  %2536 = vmatpush.msrb.mxu0 %v4463_v0  ;;  %v1034_v0 = vld [vmem:[#allocation2 + $0x410] sm:$0xff] }
 0x103   : > { %v611_v49 = vpop.f32.mrf.mxu3  ;;  %2649 = vmatpush.msrb.mxu1 %v4471_v2  ;;  %2290 = vmatpush.msrb.mxu3 %v4478_v4  ;;  %v1035_v2 = vld [vmem:[#allocation2 + $0x418] sm:$0xff] }
 0x104   : > { %v4839_v60 = vadd.f32 %v611_v49, %v4766_v56  ;;  %2537 = vmatpush.msrb.mxu0 %v4466_v1  ;;  %v704_v49 = vld [vmem:[#allocation2 + $0x300] sm:$0xff] }
 0x105   : > { %2650 = vmatpush.msrb.mxu1 %v4478_v4  ;;  %2291 = vmatpush.msrb.mxu3 %v4484_v5  ;;  %v696_v4 = vld [vmem:[#allocation2 + $0x2c0] sm:$0xff] }
 0x106   : > { %v4844_v37 = vpop.f32.mrf.mxu0  ;;  %2538 = vmatpush.msrb.mxu0 %v4474_v3  ;;  %788 = vmatmul.f32.gmra.mxu2 %v696_v4  ;;  %v706_v4 = vld [vmem:[#allocation2 + $0x310] sm:$0xff] }
 0x107   : > { %6927 = vst [vmem:[#allocation24_spill] sm:$0xff] %v4844_v37  ;;  %v4847_v44 = vpop.f32.mrf.mxu1  ;;  %2651 = vmatpush.msrb.mxu1 %v4484_v5  ;;  %2292 = vmatpush.msrb.mxu3 %v4494_v7  ;;  %v677_v5 = vld [vmem:[#allocation2 + $0x228] sm:$0xff]  ;;  %v5059_v37 = vld [vmem:[%s4460_s28 + $0x18] sm:$0xff] }
 0x108   : > { %6928 = vst [vmem:[#allocation25_spill] sm:$0xff] %v4847_v44  ;;  %868 = vmatmul.f32.gmra.mxu3 %v675_v35  ;;  %2539 = vmatpush.msrb.mxu0 %v4487_v6  ;;  %v1044_v35 = vld [vmem:[#allocation2 + $0x460] sm:$0xff] }
 0x109   : > { %1115 = vmatmul.f32.gmra.mxu0 %v1034_v0  ;;  %2652 = vmatpush.msrb.mxu1 %v4494_v7  ;;  %v1036_v7 = vld [vmem:[#allocation2 + $0x420] sm:$0xff]  ;;  %v1045_v0 = vld [vmem:[#allocation2 + $0x468] sm:$0xff] }
 0x10a   : > { %1228 = vmatmul.f32.gmra.mxu1 %v1035_v2  ;;  %2293 = vmatpush.msrb.mxu3 %v4504_v9  ;;  %v4924_v2 = vpop.f32.mrf.mxu2  ;;  %v5055_v44 = vld [vmem:[%s4460_s28 + $0x20] sm:$0xff] }
 0x10b   : > { %v614_v1 = vpop.f32.mrf.mxu3  ;;  %2540 = vmatpush.msrb.mxu0 %v4497_v8  ;;  %2653 = vmatpush.msrb.mxu1 %v4504_v9  ;;  %v1037_v8 = vld [vmem:[#allocation2 + $0x428] sm:$0xff] }
 0x10c   : > { %v4857_v3 = vadd.f32 %v614_v1, %v4779_v63  ;;  %2294 = vmatpush.msrb.mxu3 %v4514_v11 }
 0x10d   : > { %2541 = vmatpush.msrb.mxu0 %v4507_v10  ;;  %2654 = vmatpush.msrb.mxu1 %v4514_v11  ;;  %v698_v10 = vld [vmem:[#allocation2 + $0x2d0] sm:$0xff] }
 0x10e   : > { %v4862_v6 = vpop.f32.mrf.mxu0  ;;  %2295 = vmatpush.msrb.mxu3 %v4527_v14  ;;  %791 = vmatmul.f32.gmra.mxu2 %v698_v10  ;;  %v1047_v10 = vld [vmem:[#allocation2 + $0x478] sm:$0xff] }
 0x10f   : > { %6929 = vst [vmem:[#allocation26_spill] sm:$0xff] %v4862_v6  ;;  %v4865_v56 = vpop.f32.mrf.mxu1  ;;  %2542 = vmatpush.msrb.mxu0 %v4517_v12  ;;  %2655 = vmatpush.msrb.mxu1 %v4527_v14  ;;  %v679_v12 = vld [vmem:[#allocation2 + $0x238] sm:$0xff]  ;;  %v1398_v6 = vld [vmem:[#allocation2 + $0x630] sm:$0xff] }
 0x110   : > { %6930 = vst [vmem:[#allocation27_spill] sm:$0xff] %v4865_v56  ;;  %871 = vmatmul.f32.gmra.mxu3 %v677_v5 }
 0x111   : > { %1118 = vmatmul.f32.gmra.mxu0 %v1036_v7  ;;  %2296 = vmatpush.msrb.mxu3 %v4534_v16 }
 0x112   : > { %1231 = vmatmul.f32.gmra.mxu1 %v1037_v8  ;;  %2543 = vmatpush.msrb.mxu0 %v4523_v13  ;;  %v1038_v13 = vld [vmem:[#allocation2 + $0x430] sm:$0xff] }
 0x113   : > { %v617_v9 = vpop.f32.mrf.mxu3  ;;  %2656 = vmatpush.msrb.mxu1 %v4534_v16  ;;  %2297 = vmatpush.msrb.mxu3 %v4544_v17  ;;  %v1039_v16 = vld [vmem:[#allocation2 + $0x438] sm:$0xff]  ;;  %v1046_v8 = vld [vmem:[#allocation2 + $0x470] sm:$0xff] }
 0x114   : > { %v4874_v11 = vadd.f32 %v617_v9, %v4791_v38  ;;  %2544 = vmatpush.msrb.mxu0 %v4530_v15 }
 0x115   : > { %2657 = vmatpush.msrb.mxu1 %v4544_v17  ;;  %2298 = vmatpush.msrb.mxu3 %v4554_v19  ;;  %v700_v17 = vld [vmem:[#allocation2 + $0x2e0] sm:$0xff] }
 0x116   : > { %v4879_v14 = vpop.f32.mrf.mxu0  ;;  %2545 = vmatpush.msrb.mxu0 %v4547_v18  ;;  %794 = vmatmul.f32.gmra.mxu2 %v700_v17 }
 0x117   : > { %6931 = vst [vmem:[#allocation28_spill] sm:$0xff] %v4879_v14  ;;  %v4882_v63 = vpop.f32.mrf.mxu1  ;;  %2658 = vmatpush.msrb.mxu1 %v4554_v19  ;;  %2299 = vmatpush.msrb.mxu3 %v4564_v21  ;;  %v681_v19 = vld [vmem:[#allocation2 + $0x248] sm:$0xff]  ;;  %v5045_v14 = vld [vmem:[%s4460_s28 + $0x30] sm:$0xff] }
 0x118   : > { %6932 = vst [vmem:[#allocation29_spill] sm:$0xff] %v4882_v63  ;;  %874 = vmatmul.f32.gmra.mxu3 %v679_v12  ;;  %2546 = vmatpush.msrb.mxu0 %v4557_v20  ;;  %v4933_v12 = vpop.f32.mrf.mxu2 }
 0x119   : > { %1121 = vmatmul.f32.gmra.mxu0 %v1038_v13  ;;  %2659 = vmatpush.msrb.mxu1 %v4564_v21  ;;  %v1040_v21 = vld [vmem:[#allocation2 + $0x440] sm:$0xff] }
 0x11a   : > { %1234 = vmatmul.f32.gmra.mxu1 %v1039_v16  ;;  %2300 = vmatpush.msrb.mxu3 %v4574_v23  ;;  %v708_v16 = vld [vmem:[#allocation2 + $0x320] sm:$0xff] }
 0x11b   : > { %v620_v15 = vpop.f32.mrf.mxu3  ;;  %2547 = vmatpush.msrb.mxu0 %v4567_v22  ;;  %2660 = vmatpush.msrb.mxu1 %v4574_v23  ;;  %v1041_v22 = vld [vmem:[#allocation2 + $0x448] sm:$0xff] }
 0x11c   : > { %v4892_v18 = vadd.f32 %v620_v15, %v4801_v45  ;;  %2301 = vmatpush.msrb.mxu3 %v4584_v25  ;;  %v1042_v45 = vld [vmem:[#allocation2 + $0x450] sm:$0xff] }
 0x11d   : > { %2548 = vmatpush.msrb.mxu0 %v4577_v24  ;;  %2661 = vmatpush.msrb.mxu1 %v4584_v25  ;;  %v702_v24 = vld [vmem:[#allocation2 + $0x2f0] sm:$0xff] }
 0x11e   : > { %v4897_v20 = vpop.f32.mrf.mxu0  ;;  %2302 = vmatpush.msrb.mxu3 %v4594_v27  ;;  %797 = vmatmul.f32.gmra.mxu2 %v702_v24 }
 0x11f   : > { %6933 = vst [vmem:[#allocation30_spill] sm:$0xff] %v4897_v20  ;;  %v4900_v38 = vpop.f32.mrf.mxu1  ;;  %2549 = vmatpush.msrb.mxu0 %v4587_v26  ;;  %2662 = vmatpush.msrb.mxu1 %v4594_v27  ;;  %v683_v26 = vld [vmem:[#allocation2 + $0x258] sm:$0xff] }
 0x120   : > { %6934 = vst [vmem:[#allocation31_spill] sm:$0xff] %v4900_v38  ;;  %877 = vmatmul.f32.gmra.mxu3 %v681_v19  ;;  %v1048_v19 = vld [vmem:[#allocation2 + $0x480] sm:$0xff]  ;;  %v5035_v38 = vld [vmem:[%s4460_s28 + $0x38] sm:$0xff] }
 0x121   : > { %1124 = vmatmul.f32.gmra.mxu0 %v1040_v21  ;;  %2303 = vmatpush.msrb.mxu3 %v4604_v29 }
 0x122   : > { %1237 = vmatmul.f32.gmra.mxu1 %v1041_v22  ;;  %2550 = vmatpush.msrb.mxu0 %v4597_v28  ;;  %v1043_v28 = vld [vmem:[#allocation2 + $0x458] sm:$0xff]  ;;  %v1049_v22 = vld [vmem:[#allocation2 + $0x488] sm:$0xff] }
 0x123   : > { %v623_v23 = vpop.f32.mrf.mxu3  ;;  %2663 = vmatpush.msrb.mxu1 %v4604_v29  ;;  %2304 = vmatpush.msrb.mxu3 %v4614_v32 }
 0x124   : > { %v4909_v25 = vadd.f32 %v623_v23, %v4810_v53  ;;  %2551 = vmatpush.msrb.mxu0 %v4607_v30  ;;  %v4942_v23 = vpop.f32.mrf.mxu2 }
 0x125   : > { %2664 = vmatpush.msrb.mxu1 %v4614_v32 }
 0x126   : > { %v4913_v27 = vpop.f32.mrf.mxu0  ;;  %800 = vmatmul.f32.gmra.mxu2 %v704_v49  ;;  %v1051_v49 = vld [vmem:[#allocation2 + $0x498] sm:$0xff] }
 0x127   : > { %6935 = vst [vmem:[#allocation32_spill] sm:$0xff] %v4913_v27  ;;  %v4915_v47 = vpop.f32.mrf.mxu1  ;;  %v705_v27 = vld [vmem:[#allocation2 + $0x308] sm:$0xff] }
 0x128   : > { %6936 = vst [vmem:[#allocation33_spill] sm:$0xff] %v4915_v47  ;;  %880 = vmatmul.f32.gmra.mxu3 %v683_v26  ;;  %v710_v26 = vld [vmem:[#allocation2 + $0x330] sm:$0xff]  ;;  %v1396_v47 = vld [vmem:[#allocation2 + $0x620] sm:$0xff] }
 0x129   : > { %1127 = vmatmul.f32.gmra.mxu0 %v1042_v45  ;;  %v691_v45 = vld [vmem:[#allocation2 + $0x298] sm:$0xff] }
 0x12a   : > { %1240 = vmatmul.f32.gmra.mxu1 %v1043_v28  ;;  %v1050_v28 = vld [vmem:[#allocation2 + $0x490] sm:$0xff] }
 0x12b   : > { %v626_v29 = vpop.f32.mrf.mxu3 }
 0x12c   : > { %v4918_v53 = vadd.f32 %v626_v29, %v4816_v33  ;;  %v687_v33 = vld [vmem:[#allocation2 + $0x278] sm:$0xff] }
 0x12e   : > { %v4920_v30 = vpop.f32.mrf.mxu0  ;;  %803 = vmatmul.f32.gmra.mxu2 %v706_v4 }
 0x12f   : > { %6937 = vst [vmem:[#allocation34_spill] sm:$0xff] %v4920_v30  ;;  %v4922_v32 = vpop.f32.mrf.mxu1  ;;  %v5021_v30 = vld [vmem:[%s4460_s28 + $0x50] sm:$0xff] }
 0x130   : > { %6938 = vst [vmem:[#allocation35_spill] sm:$0xff] %v4922_v32  ;;  %883 = vmatmul.f32.gmra.mxu3 %v685_v55  ;;  %v4950_v55 = vpop.f32.mrf.mxu2 }
 0x131   : > { %1130 = vmatmul.f32.gmra.mxu0 %v1044_v35 }
 0x132   : > { %1243 = vmatmul.f32.gmra.mxu1 %v1045_v0  ;;  %v712_v0 = vld [vmem:[#allocation2 + $0x340] sm:$0xff] }
 0x133   : > { %v629_v1 = vpop.f32.mrf.mxu3 }
 0x134   : > { %v4927_v5 = vadd.f32 %v629_v1, %v4822_v46  ;;  %v689_v46 = vld [vmem:[#allocation2 + $0x288] sm:$0xff] }
 0x135   : > { %v693_v1 = vld [vmem:[#allocation2 + $0x2a8] sm:$0xff] }
 0x136   : > { %v4929_v7 = vpop.f32.mrf.mxu0  ;;  %806 = vmatmul.f32.gmra.mxu2 %v708_v16 }
 0x137   : > { %6939 = vst [vmem:[#allocation36_spill] sm:$0xff] %v4929_v7  ;;  %v4931_v9 = vpop.f32.mrf.mxu1 }
 0x138   : > { %6940 = vst [vmem:[#allocation37_spill] sm:$0xff] %v4931_v9  ;;  %886 = vmatmul.f32.gmra.mxu3 %v687_v33  ;;  %v1052_v33 = vld [vmem:[#allocation2 + $0x4a0] sm:$0xff]  ;;  %v5011_v9 = vld [vmem:[%s4460_s28 + $0x58] sm:$0xff] }
 0x139   : > { %1133 = vmatmul.f32.gmra.mxu0 %v1046_v8 }
 0x13a   : > { %1246 = vmatmul.f32.gmra.mxu1 %v1047_v10  ;;  %v1053_v10 = vld [vmem:[#allocation2 + $0x4a8] sm:$0xff] }
 0x13b   : > { %v632_v13 = vpop.f32.mrf.mxu3 }
 0x13c   : > { %v4936_v15 = vadd.f32 %v632_v13, %v4828_v31  ;;  %v4958_v13 = vpop.f32.mrf.mxu2 }
 0x13d   : > { %6947 = vst [vmem:[#allocation44_spill] sm:$0xff] %v4958_v13 }
 0x13e   : > { %v4938_v17 = vpop.f32.mrf.mxu0  ;;  %809 = vmatmul.f32.gmra.mxu2 %v710_v26  ;;  %v1054_v26 = vld [vmem:[#allocation2 + $0x4b0] sm:$0xff] }
 0x13f   : > { %6941 = vst [vmem:[#allocation38_spill] sm:$0xff] %v4938_v17  ;;  %v4940_v21 = vpop.f32.mrf.mxu1  ;;  %v703_v17 = vld [vmem:[#allocation2 + $0x2f8] sm:$0xff] }
 0x140   : > { %6942 = vst [vmem:[#allocation39_spill] sm:$0xff] %v4940_v21  ;;  %889 = vmatmul.f32.gmra.mxu3 %v689_v46  ;;  %v714_v46 = vld [vmem:[#allocation2 + $0x350] sm:$0xff] }
 0x141   : > { %1136 = vmatmul.f32.gmra.mxu0 %v1048_v19  ;;  %v695_v19 = vld [vmem:[#allocation2 + $0x2b8] sm:$0xff]  ;;  %v1394_v21 = vld [vmem:[#allocation2 + $0x610] sm:$0xff] }
 0x142   : > { %1249 = vmatmul.f32.gmra.mxu1 %v1049_v22 }
 0x143   : > { %v4944_v24 = vpop.f32.mrf.mxu3 }
 0x146   : > { %v4946_v31 = vpop.f32.mrf.mxu0  ;;  %812 = vmatmul.f32.gmra.mxu2 %v712_v0 }
 0x147   : > { %6943 = vst [vmem:[#allocation40_spill] sm:$0xff] %v4946_v31  ;;  %v4948_v29 = vpop.f32.mrf.mxu1 }
 0x148   : > { %6944 = vst [vmem:[#allocation41_spill] sm:$0xff] %v4948_v29  ;;  %892 = vmatmul.f32.gmra.mxu3 %v691_v45 }
 0x149   : > { %1139 = vmatmul.f32.gmra.mxu0 %v1050_v28  ;;  %v1055_v28 = vld [vmem:[#allocation2 + $0x4b8] sm:$0xff] }
 0x14a   : > { %1252 = vmatmul.f32.gmra.mxu1 %v1051_v49  ;;  %v4966_v49 = vpop.f32.mrf.mxu2 }
 0x14b   : > { %v4952_v35 = vpop.f32.mrf.mxu3  ;;  %6950 = vst [vmem:[#allocation47_spill] sm:$0xff] %v4966_v49 }
 0x14e   : > { %v4954_v4 = vpop.f32.mrf.mxu0  ;;  %815 = vmatmul.f32.gmra.mxu2 %v714_v46  ;;  %v1056_v46 = vld [vmem:[#allocation2 + $0x4c0] sm:$0xff] }
 0x14f   : > { %6945 = vst [vmem:[#allocation42_spill] sm:$0xff] %v4954_v4  ;;  %v4956_v8 = vpop.f32.mrf.mxu1 }
 0x150   : > { %6946 = vst [vmem:[#allocation43_spill] sm:$0xff] %v4956_v8  ;;  %895 = vmatmul.f32.gmra.mxu3 %v693_v1  ;;  %v716_v1 = vld [vmem:[#allocation2 + $0x360] sm:$0xff] }
 0x151   : > { %1142 = vmatmul.f32.gmra.mxu0 %v1052_v33  ;;  %v697_v33 = vld [vmem:[#allocation2 + $0x2c8] sm:$0xff] }
 0x152   : > { %1255 = vmatmul.f32.gmra.mxu1 %v1053_v10  ;;  %v4974_v4 = vpop.f32.mrf.mxu2 }
 0x153   : > { %v4960_v16 = vpop.f32.mrf.mxu3  ;;  %6953 = vst [vmem:[#allocation50_spill] sm:$0xff] %v4974_v4 }
 0x156   : > { %v4962_v22 = vpop.f32.mrf.mxu0  ;;  %818 = vmatmul.f32.gmra.mxu2 %v716_v1  ;;  %v1058_v1 = vld [vmem:[#allocation2 + $0x4d0] sm:$0xff] }
 0x157   : > { %6948 = vst [vmem:[#allocation45_spill] sm:$0xff] %v4962_v22  ;;  %v4964_v45 = vpop.f32.mrf.mxu1  ;;  %v1057_v22 = vld [vmem:[#allocation2 + $0x4c8] sm:$0xff] }
 0x158   : > { %6949 = vst [vmem:[#allocation46_spill] sm:$0xff] %v4964_v45  ;;  %898 = vmatmul.f32.gmra.mxu3 %v695_v19  ;;  %v718_v19 = vld [vmem:[#allocation2 + $0x370] sm:$0xff] }
 0x159   : > { %1145 = vmatmul.f32.gmra.mxu0 %v1054_v26  ;;  %v699_v26 = vld [vmem:[#allocation2 + $0x2d8] sm:$0xff] }
 0x15a   : > { %1258 = vmatmul.f32.gmra.mxu1 %v1055_v28 }
 0x15b   : > { %v4968_v0 = vpop.f32.mrf.mxu3 }
 0x15e   : > { %v4970_v10 = vpop.f32.mrf.mxu0  ;;  %821 = vmatmul.f32.gmra.mxu2 %v718_v19  ;;  %v4987_v19 = vld [vmem:[%s4460_s28 + $0x78] sm:$0xff] }
 0x15f   : > { %6951 = vst [vmem:[#allocation48_spill] sm:$0xff] %v4970_v10  ;;  %v4972_v8 = vpop.f32.mrf.mxu1  ;;  %v1059_v10 = vld [vmem:[#allocation2 + $0x4d8] sm:$0xff] }
 0x160   : > { %6952 = vst [vmem:[#allocation49_spill] sm:$0xff] %v4972_v8  ;;  %901 = vmatmul.f32.gmra.mxu3 %v697_v33  ;;  %v4982_v8 = vpop.f32.mrf.mxu2  ;;  %v1392_v33 = vld [vmem:[#allocation2 + $0x600] sm:$0xff] }
 0x161   : > { %1148 = vmatmul.f32.gmra.mxu0 %v1056_v46  ;;  %6956 = vst [vmem:[#allocation53_spill] sm:$0xff] %v4982_v8  ;;  %v701_v46 = vld [vmem:[#allocation2 + $0x2e8] sm:$0xff] }
 0x162   : > { %1261 = vmatmul.f32.gmra.mxu1 %v1057_v22 }
 0x163   : > { %v4976_v45 = vpop.f32.mrf.mxu3 }
 0x166   : > { %v4978_v28 = vpop.f32.mrf.mxu0  ;;  %1472 = vmatmul.f32.vlgmr.msrb.gmra.mxu2 %v1392_v33  ;;  %v5001_v33 = vld [vmem:[%s4460_s28 + $0x68] sm:$0xff] }
 0x167   : > { %6954 = vst [vmem:[#allocation51_spill] sm:$0xff] %v4978_v28  ;;  %v4980_v29 = vpop.f32.mrf.mxu1  ;;  %2896 = vmatpush.msrb.mxu2 %v4987_v19 }
 0x168   : > { %6955 = vst [vmem:[#allocation52_spill] sm:$0xff] %v4980_v29  ;;  %904 = vmatmul.f32.gmra.mxu3 %v699_v26  ;;  %v1060_v29 = vld [vmem:[#allocation2 + $0x4e0] sm:$0xff]  ;;  %v1061_v26 = vld [vmem:[#allocation2 + $0x4e8] sm:$0xff] }
 0x169   : > { %1151 = vmatmul.f32.gmra.mxu0 %v1058_v1  ;;  %v4994_v1 = vpop.f32.mrf.mxu2 }
 0x16a   : > { %1264 = vmatmul.f32.gmra.mxu1 %v1059_v10  ;;  %6959 = vst [vmem:[#allocation56_spill] sm:$0xff] %v4994_v1  ;;  %v4997_v10 = vld [vmem:[%s4460_s28 + $0x70] sm:$0xff] }
 0x16b   : > { %v4984_v22 = vpop.f32.mrf.mxu3  ;;  %2897 = vmatpush.msrb.mxu2 %v4997_v10 }
 0x16d   : > { %2898 = vmatpush.msrb.mxu2 %v5001_v33 }
 0x16e   : > { %v4990_v28 = vpop.f32.mrf.mxu0  ;;  %1475 = vmatmul.f32.gmra.mxu2 %v1394_v21  ;;  %v5025_v21 = vld [vmem:[%s4460_s28 + $0x48] sm:$0xff] }
 0x16f   : > { %6957 = vst [vmem:[#allocation54_spill] sm:$0xff] %v4990_v28  ;;  %v4992_v31 = vpop.f32.mrf.mxu1 }
 0x170   : > { %6958 = vst [vmem:[#allocation55_spill] sm:$0xff] %v4992_v31  ;;  %907 = vmatmul.f32.gmra.mxu3 %v701_v46  ;;  %v5007_v31 = vld [vmem:[%s4460_s28 + $0x60] sm:$0xff]  ;;  %v1062_v46 = vld [vmem:[#allocation2 + $0x4f0] sm:$0xff] }
 0x171   : > { %1154 = vmatmul.f32.gmra.mxu0 %v1060_v29  ;;  %2899 = vmatpush.msrb.mxu2 %v5007_v31  ;;  %v5018_v32 = vpop.f32.mrf.mxu2 }
 0x172   : > { %1267 = vmatmul.f32.gmra.mxu1 %v1061_v26  ;;  %v1063_v26 = vld [vmem:[#allocation2 + $0x4f8] sm:$0xff]  ;;  %6962 = vst [vmem:[#allocation59_spill] sm:$0xff] %v5018_v32 }
 0x173   : > { %v5004_v28 = vpop.f32.mrf.mxu3  ;;  %2900 = vmatpush.msrb.mxu2 %v5011_v9 }
 0x175   : > { %2901 = vmatpush.msrb.mxu2 %v5021_v30 }
 0x176   : > { %v5014_v29 = vpop.f32.mrf.mxu0  ;;  %1478 = vmatmul.f32.gmra.mxu2 %v1396_v47  ;;  %v5049_v47 = vld [vmem:[%s4460_s28 + $0x28] sm:$0xff] }
 0x177   : > { %6960 = vst [vmem:[#allocation57_spill] sm:$0xff] %v5014_v29  ;;  %v5016_v7 = vpop.f32.mrf.mxu1  ;;  %2902 = vmatpush.msrb.mxu2 %v5025_v21 }
 0x178   : > { %6961 = vst [vmem:[#allocation58_spill] sm:$0xff] %v5016_v7  ;;  %910 = vmatmul.f32.gmra.mxu3 %v703_v17  ;;  %v5031_v7 = vld [vmem:[%s4460_s28 + $0x40] sm:$0xff] }
 0x179   : > { %1157 = vmatmul.f32.gmra.mxu0 %v1062_v46  ;;  %2903 = vmatpush.msrb.mxu2 %v5031_v7  ;;  %v1064_v46 = vld [vmem:[#allocation2 + $0x500] sm:$0xff]  ;;  %v5042_v63 = vpop.f32.mrf.mxu2 }
 0x17a   : > { %1270 = vmatmul.f32.gmra.mxu1 %v1063_v26  ;;  %v1065_v26 = vld [vmem:[#allocation2 + $0x508] sm:$0xff]  ;;  %6963 = vst [vmem:[#allocation60_spill] sm:$0xff] %v5042_v63  ;;  %v707_v63 = vld [vmem:[#allocation2 + $0x318] sm:$0xff] }
 0x17b   : > { %v5028_v29 = vpop.f32.mrf.mxu3  ;;  %2904 = vmatpush.msrb.mxu2 %v5035_v38 }
 0x17d   : > { %2905 = vmatpush.msrb.mxu2 %v5045_v14 }
 0x17e   : > { %v5038_v17 = vpop.f32.mrf.mxu0  ;;  %1481 = vmatmul.f32.gmra.mxu2 %v1398_v6  ;;  %v5073_v6 = vld [vmem:[%s4460_s28 + $0x8] sm:$0xff] }
 0x17f   : > { %v5040_v20 = vpop.f32.mrf.mxu1  ;;  %2906 = vmatpush.msrb.mxu2 %v5049_v47 }
 0x180   : > { %913 = vmatmul.f32.gmra.mxu3 %v705_v27 }
 0x181   : > { %1160 = vmatmul.f32.gmra.mxu0 %v1064_v46  ;;  %2907 = vmatpush.msrb.mxu2 %v5055_v44  ;;  %v1066_v46 = vld [vmem:[#allocation2 + $0x510] sm:$0xff]  ;;  %v5066_v42 = vpop.f32.mrf.mxu2 }
 0x182   : > { %1273 = vmatmul.f32.gmra.mxu1 %v1065_v26  ;;  %v1067_v26 = vld [vmem:[#allocation2 + $0x518] sm:$0xff]  ;;  %6964 = vst [vmem:[#allocation61_spill] sm:$0xff] %v5066_v42  ;;  %v709_v42 = vld [vmem:[#allocation2 + $0x328] sm:$0xff] }
 0x183   : > { %v5052_v56 = vpop.f32.mrf.mxu3  ;;  %2908 = vmatpush.msrb.mxu2 %v5059_v37 }
 0x185   : > { %2909 = vmatpush.msrb.mxu2 %v5069_v40 }
 0x186   : > { %v5062_v27 = vpop.f32.mrf.mxu0  ;;  %1484 = vmatmul.f32.gmra.mxu2 %v1400_v57  ;;  %v1070_v57 = vld [vmem:[#allocation2 + $0x530] sm:$0xff] }
 0x187   : > { %v5064_v32 = vpop.f32.mrf.mxu1  ;;  %2910 = vmatpush.msrb.mxu2 %v5073_v6 }
 0x188   : > { %916 = vmatmul.f32.gmra.mxu3 %v707_v63  ;;  %v1069_v63 = vld [vmem:[#allocation2 + $0x528] sm:$0xff] }
 0x189   : > { %1163 = vmatmul.f32.gmra.mxu0 %v1066_v46  ;;  %2911 = vmatpush.msrb.mxu2 %v5079_v51  ;;  %v5086_v46 = vpop.f32.mrf.mxu2 }
 0x18a   : > { %1276 = vmatmul.f32.gmra.mxu1 %v1067_v26  ;;  %6965 = vst [vmem:[#allocation62_spill] sm:$0xff] %v5086_v46 }
 0x18b   : > { %v5076_v1 = vpop.f32.mrf.mxu3 }
 0x18e   : > { %v5082_v8 = vpop.f32.mrf.mxu0  ;;  %1487 = vmatmul.f32.gmra.mxu2 %v1402_v62  ;;  %v1072_v62 = vld [vmem:[#allocation2 + $0x540] sm:$0xff] }
 0x18f   : > { %v5084_v4 = vpop.f32.mrf.mxu1 }
 0x190   : > { %919 = vmatmul.f32.gmra.mxu3 %v709_v42  ;;  %v713_v42 = vld [vmem:[#allocation2 + $0x348] sm:$0xff] }
 0x191   : > { %1166 = vmatmul.f32.gmra.mxu0 %v1068_v39  ;;  %v5094_v13 = vpop.f32.mrf.mxu2  ;;  %v1404_v39 = vld [vmem:[#allocation2 + $0x660] sm:$0xff] }
 0x192   : > { %1279 = vmatmul.f32.gmra.mxu1 %v1069_v63  ;;  %6968 = vst [vmem:[#allocation65_spill] sm:$0xff] %v5094_v13 }
 0x193   : > { %v5088_v26 = vpop.f32.mrf.mxu3 }
 0x196   : > { %v5090_v49 = vpop.f32.mrf.mxu0  ;;  %1490 = vmatmul.f32.gmra.mxu2 %v1404_v39  ;;  %v1074_v39 = vld [vmem:[#allocation2 + $0x550] sm:$0xff] }
 0x197   : > { %6966 = vst [vmem:[#allocation63_spill] sm:$0xff] %v5090_v49  ;;  %v5092_v50 = vpop.f32.mrf.mxu1  ;;  %v1073_v49 = vld [vmem:[#allocation2 + $0x548] sm:$0xff] }
 0x198   : > { %6967 = vst [vmem:[#allocation64_spill] sm:$0xff] %v5092_v50  ;;  %922 = vmatmul.f32.gmra.mxu3 %v711_v58  ;;  %v1406_v58 = vld [vmem:[#allocation2 + $0x670] sm:$0xff] }
 0x199   : > { %1169 = vmatmul.f32.gmra.mxu0 %v1070_v57  ;;  %v5102_v41 = vpop.f32.mrf.mxu2 }
 0x19a   : > { %1282 = vmatmul.f32.gmra.mxu1 %v1071_v48  ;;  %6972 = vst [vmem:[#allocation69_spill] sm:$0xff] %v5102_v41  ;;  %v715_v48 = vld [vmem:[#allocation2 + $0x358] sm:$0xff] }
 0x19b   : > { %v5096_v46 = vpop.f32.mrf.mxu3 }
 0x19c   : > { %6969 = vst [vmem:[#allocation66_spill] sm:$0xff] %v5096_v46 }
 0x19e   : > { %v5098_v63 = vpop.f32.mrf.mxu0  ;;  %1493 = vmatmul.f32.gmra.mxu2 %v1406_v58  ;;  %v1076_v58 = vld [vmem:[#allocation2 + $0x560] sm:$0xff] }
 0x19f   : > { %6970 = vst [vmem:[#allocation67_spill] sm:$0xff] %v5098_v63  ;;  %v5100_v43 = vpop.f32.mrf.mxu1  ;;  %v1075_v63 = vld [vmem:[#allocation2 + $0x558] sm:$0xff] }
 0x1a0   : > { %6971 = vst [vmem:[#allocation68_spill] sm:$0xff] %v5100_v43  ;;  %925 = vmatmul.f32.gmra.mxu3 %v713_v42  ;;  %v1408_v42 = vld [vmem:[#allocation2 + $0x680] sm:$0xff] }
 0x1a1   : > { %1172 = vmatmul.f32.gmra.mxu0 %v1072_v62  ;;  %v5110_v46 = vpop.f32.mrf.mxu2 }
 0x1a2   : > { %1285 = vmatmul.f32.gmra.mxu1 %v1073_v49  ;;  %6976 = vst [vmem:[#allocation73_spill] sm:$0xff] %v5110_v46  ;;  %v717_v49 = vld [vmem:[#allocation2 + $0x368] sm:$0xff] }
 0x1a3   : > { %v5104_v13 = vpop.f32.mrf.mxu3 }
 0x1a4   : > { %6973 = vst [vmem:[#allocation70_spill] sm:$0xff] %v5104_v13 }
 0x1a6   : > { %v5106_v57 = vpop.f32.mrf.mxu0  ;;  %1496 = vmatmul.f32.gmra.mxu2 %v1408_v42  ;;  %v1078_v42 = vld [vmem:[#allocation2 + $0x570] sm:$0xff] }
 0x1a7   : > { %6974 = vst [vmem:[#allocation71_spill] sm:$0xff] %v5106_v57  ;;  %v5108_v50 = vpop.f32.mrf.mxu1  ;;  %v1077_v57 = vld [vmem:[#allocation2 + $0x568] sm:$0xff] }
 0x1a8   : > { %6975 = vst [vmem:[#allocation72_spill] sm:$0xff] %v5108_v50  ;;  %928 = vmatmul.f32.gmra.mxu3 %v715_v48  ;;  %v1410_v48 = vld [vmem:[#allocation2 + $0x690] sm:$0xff] }
 0x1a9   : > { %1175 = vmatmul.f32.gmra.mxu0 %v1074_v39  ;;  %v5118_v13 = vpop.f32.mrf.mxu2 }
 0x1aa   : > { %1288 = vmatmul.f32.gmra.mxu1 %v1075_v63  ;;  %6980 = vst [vmem:[#allocation77_spill] sm:$0xff] %v5118_v13  ;;  %v719_v63 = vld [vmem:[#allocation2 + $0x378] sm:$0xff] }
 0x1ab   : > { %v5112_v41 = vpop.f32.mrf.mxu3 }
 0x1ac   : > { %6977 = vst [vmem:[#allocation74_spill] sm:$0xff] %v5112_v41 }
 0x1ae   : > { %v5114_v62 = vpop.f32.mrf.mxu0  ;;  %1499 = vmatmul.f32.gmra.mxu2 %v1410_v48  ;;  %v1080_v48 = vld [vmem:[#allocation2 + $0x580] sm:$0xff] }
 0x1af   : > { %6978 = vst [vmem:[#allocation75_spill] sm:$0xff] %v5114_v62  ;;  %v5116_v43 = vpop.f32.mrf.mxu1  ;;  %v1079_v62 = vld [vmem:[#allocation2 + $0x578] sm:$0xff] }
 0x1b0   : > { %6979 = vst [vmem:[#allocation76_spill] sm:$0xff] %v5116_v43  ;;  %931 = vmatmul.f32.gmra.mxu3 %v717_v49  ;;  %v1412_v49 = vld [vmem:[#allocation2 + $0x6a0] sm:$0xff] }
 0x1b1   : > { %1178 = vmatmul.f32.gmra.mxu0 %v1076_v58  ;;  %v5126_v41 = vpop.f32.mrf.mxu2 }
 0x1b2   : > { %1291 = vmatmul.f32.gmra.mxu1 %v1077_v57  ;;  %6984 = vst [vmem:[#allocation81_spill] sm:$0xff] %v5126_v41  ;;  %v721_v57 = vld [vmem:[#allocation2 + $0x388] sm:$0xff] }
 0x1b3   : > { %v5120_v46 = vpop.f32.mrf.mxu3 }
 0x1b4   : > { %6981 = vst [vmem:[#allocation78_spill] sm:$0xff] %v5120_v46 }
 0x1b6   : > { %v5122_v39 = vpop.f32.mrf.mxu0  ;;  %1502 = vmatmul.f32.gmra.mxu2 %v1412_v49  ;;  %v1082_v49 = vld [vmem:[#allocation2 + $0x590] sm:$0xff] }
 0x1b7   : > { %6982 = vst [vmem:[#allocation79_spill] sm:$0xff] %v5122_v39  ;;  %v5124_v50 = vpop.f32.mrf.mxu1  ;;  %v1081_v39 = vld [vmem:[#allocation2 + $0x588] sm:$0xff] }
 0x1b8   : > { %6983 = vst [vmem:[#allocation80_spill] sm:$0xff] %v5124_v50  ;;  %934 = vmatmul.f32.gmra.mxu3 %v719_v63  ;;  %v1414_v63 = vld [vmem:[#allocation2 + $0x6b0] sm:$0xff] }
 0x1b9   : > { %1181 = vmatmul.f32.gmra.mxu0 %v1078_v42  ;;  %v5134_v46 = vpop.f32.mrf.mxu2 }
 0x1ba   : > { %1294 = vmatmul.f32.gmra.mxu1 %v1079_v62  ;;  %6988 = vst [vmem:[#allocation85_spill] sm:$0xff] %v5134_v46  ;;  %v723_v62 = vld [vmem:[#allocation2 + $0x398] sm:$0xff] }
 0x1bb   : > { %v5128_v13 = vpop.f32.mrf.mxu3 }
 0x1bc   : > { %6985 = vst [vmem:[#allocation82_spill] sm:$0xff] %v5128_v13 }
 0x1be   : > { %v5130_v58 = vpop.f32.mrf.mxu0  ;;  %1505 = vmatmul.f32.gmra.mxu2 %v1414_v63  ;;  %v1084_v63 = vld [vmem:[#allocation2 + $0x5a0] sm:$0xff] }
 0x1bf   : > { %6986 = vst [vmem:[#allocation83_spill] sm:$0xff] %v5130_v58  ;;  %v5132_v43 = vpop.f32.mrf.mxu1  ;;  %v1083_v58 = vld [vmem:[#allocation2 + $0x598] sm:$0xff] }
 0x1c0   : > { %6987 = vst [vmem:[#allocation84_spill] sm:$0xff] %v5132_v43  ;;  %937 = vmatmul.f32.gmra.mxu3 %v721_v57  ;;  %v1416_v57 = vld [vmem:[#allocation2 + $0x6c0] sm:$0xff] }
 0x1c1   : > { %1184 = vmatmul.f32.gmra.mxu0 %v1080_v48  ;;  %v5142_v13 = vpop.f32.mrf.mxu2 }
 0x1c2   : > { %1297 = vmatmul.f32.gmra.mxu1 %v1081_v39  ;;  %6992 = vst [vmem:[#allocation89_spill] sm:$0xff] %v5142_v13  ;;  %v725_v39 = vld [vmem:[#allocation2 + $0x3a8] sm:$0xff] }
 0x1c3   : > { %v5136_v41 = vpop.f32.mrf.mxu3 }
 0x1c4   : > { %6989 = vst [vmem:[#allocation86_spill] sm:$0xff] %v5136_v41 }
 0x1c6   : > { %v5138_v42 = vpop.f32.mrf.mxu0  ;;  %1508 = vmatmul.f32.gmra.mxu2 %v1416_v57  ;;  %v1086_v57 = vld [vmem:[#allocation2 + $0x5b0] sm:$0xff] }
 0x1c7   : > { %6990 = vst [vmem:[#allocation87_spill] sm:$0xff] %v5138_v42  ;;  %v5140_v50 = vpop.f32.mrf.mxu1  ;;  %v1085_v42 = vld [vmem:[#allocation2 + $0x5a8] sm:$0xff] }
 0x1c8   : > { %6991 = vst [vmem:[#allocation88_spill] sm:$0xff] %v5140_v50  ;;  %940 = vmatmul.f32.gmra.mxu3 %v723_v62  ;;  %v1418_v62 = vld [vmem:[#allocation2 + $0x6d0] sm:$0xff] }
 0x1c9   : > { %1187 = vmatmul.f32.gmra.mxu0 %v1082_v49  ;;  %v5150_v41 = vpop.f32.mrf.mxu2 }
 0x1ca   : > { %1300 = vmatmul.f32.gmra.mxu1 %v1083_v58  ;;  %6996 = vst [vmem:[#allocation93_spill] sm:$0xff] %v5150_v41  ;;  %v727_v58 = vld [vmem:[#allocation2 + $0x3b8] sm:$0xff] }
 0x1cb   : > { %v5144_v46 = vpop.f32.mrf.mxu3 }
 0x1cc   : > { %6993 = vst [vmem:[#allocation90_spill] sm:$0xff] %v5144_v46 }
 0x1ce   : > { %v5146_v48 = vpop.f32.mrf.mxu0  ;;  %1511 = vmatmul.f32.gmra.mxu2 %v1418_v62  ;;  %v1088_v62 = vld [vmem:[#allocation2 + $0x5c0] sm:$0xff] }
 0x1cf   : > { %6994 = vst [vmem:[#allocation91_spill] sm:$0xff] %v5146_v48  ;;  %v5148_v43 = vpop.f32.mrf.mxu1  ;;  %v1087_v48 = vld [vmem:[#allocation2 + $0x5b8] sm:$0xff] }
 0x1d0   : > { %6995 = vst [vmem:[#allocation92_spill] sm:$0xff] %v5148_v43  ;;  %943 = vmatmul.f32.gmra.mxu3 %v725_v39  ;;  %v1420_v39 = vld [vmem:[#allocation2 + $0x6e0] sm:$0xff] }
 0x1d1   : > { %1190 = vmatmul.f32.gmra.mxu0 %v1084_v63  ;;  %v5158_v46 = vpop.f32.mrf.mxu2 }
 0x1d2   : > { %1303 = vmatmul.f32.gmra.mxu1 %v1085_v42  ;;  %7000 = vst [vmem:[#allocation97_spill] sm:$0xff] %v5158_v46  ;;  %v729_v42 = vld [vmem:[#allocation2 + $0x3c8] sm:$0xff] }
 0x1d3   : > { %v5152_v13 = vpop.f32.mrf.mxu3 }
 0x1d4   : > { %6997 = vst [vmem:[#allocation94_spill] sm:$0xff] %v5152_v13 }
 0x1d6   : > { %v5154_v49 = vpop.f32.mrf.mxu0  ;;  %1514 = vmatmul.f32.gmra.mxu2 %v1420_v39  ;;  %v1090_v39 = vld [vmem:[#allocation2 + $0x5d0] sm:$0xff] }
 0x1d7   : > { %6998 = vst [vmem:[#allocation95_spill] sm:$0xff] %v5154_v49  ;;  %v5156_v50 = vpop.f32.mrf.mxu1  ;;  %v1089_v49 = vld [vmem:[#allocation2 + $0x5c8] sm:$0xff] }
 0x1d8   : > { %6999 = vst [vmem:[#allocation96_spill] sm:$0xff] %v5156_v50  ;;  %946 = vmatmul.f32.gmra.mxu3 %v727_v58  ;;  %v1422_v58 = vld [vmem:[#allocation2 + $0x6f0] sm:$0xff] }
 0x1d9   : > { %1193 = vmatmul.f32.gmra.mxu0 %v1086_v57  ;;  %v5166_v13 = vpop.f32.mrf.mxu2 }
 0x1da   : > { %1306 = vmatmul.f32.gmra.mxu1 %v1087_v48  ;;  %7004 = vst [vmem:[#allocation101_spill] sm:$0xff] %v5166_v13  ;;  %v731_v48 = vld [vmem:[#allocation2 + $0x3d8] sm:$0xff] }
 0x1db   : > { %v5160_v41 = vpop.f32.mrf.mxu3 }
 0x1dc   : > { %7001 = vst [vmem:[#allocation98_spill] sm:$0xff] %v5160_v41 }
 0x1de   : > { %v5162_v63 = vpop.f32.mrf.mxu0  ;;  %1517 = vmatmul.f32.gmra.mxu2 %v1422_v58  ;;  %v1092_v58 = vld [vmem:[#allocation2 + $0x5e0] sm:$0xff] }
 0x1df   : > { %7002 = vst [vmem:[#allocation99_spill] sm:$0xff] %v5162_v63  ;;  %v5164_v43 = vpop.f32.mrf.mxu1  ;;  %v1091_v63 = vld [vmem:[#allocation2 + $0x5d8] sm:$0xff] }
 0x1e0   : > { %7003 = vst [vmem:[#allocation100_spill] sm:$0xff] %v5164_v43  ;;  %949 = vmatmul.f32.gmra.mxu3 %v729_v42  ;;  %v1424_v42 = vld [vmem:[#allocation2 + $0x700] sm:$0xff] }
 0x1e1   : > { %1196 = vmatmul.f32.gmra.mxu0 %v1088_v62  ;;  %v5174_v41 = vpop.f32.mrf.mxu2 }
 0x1e2   : > { %1309 = vmatmul.f32.gmra.mxu1 %v1089_v49  ;;  %7008 = vst [vmem:[#allocation105_spill] sm:$0xff] %v5174_v41  ;;  %v733_v49 = vld [vmem:[#allocation2 + $0x3e8] sm:$0xff] }
 0x1e3   : > { %v5168_v46 = vpop.f32.mrf.mxu3 }
 0x1e4   : > { %7005 = vst [vmem:[#allocation102_spill] sm:$0xff] %v5168_v46 }
 0x1e6   : > { %v5170_v57 = vpop.f32.mrf.mxu0  ;;  %1520 = vmatmul.f32.gmra.mxu2 %v1424_v42  ;;  %v1094_v42 = vld [vmem:[#allocation2 + $0x5f0] sm:$0xff] }
 0x1e7   : > { %7006 = vst [vmem:[#allocation103_spill] sm:$0xff] %v5170_v57  ;;  %v5172_v50 = vpop.f32.mrf.mxu1  ;;  %v1093_v57 = vld [vmem:[#allocation2 + $0x5e8] sm:$0xff] }
 0x1e8   : > { %7007 = vst [vmem:[#allocation104_spill] sm:$0xff] %v5172_v50  ;;  %952 = vmatmul.f32.gmra.mxu3 %v731_v48  ;;  %v1426_v48 = vld [vmem:[#allocation2 + $0x710] sm:$0xff] }
 0x1e9   : > { %1199 = vmatmul.f32.gmra.mxu0 %v1090_v39  ;;  %v5182_v46 = vpop.f32.mrf.mxu2 }
 0x1ea   : > { %1312 = vmatmul.f32.gmra.mxu1 %v1091_v63  ;;  %v735_v63 = vld [vmem:[#allocation2 + $0x3f8] sm:$0xff] }
 0x1eb   : > { %v5176_v13 = vpop.f32.mrf.mxu3 }
 0x1ec   : > { %7009 = vst [vmem:[#allocation106_spill] sm:$0xff] %v5176_v13 }
 0x1ee   : > { %v5178_v62 = vpop.f32.mrf.mxu0  ;;  %1523 = vmatmul.f32.gmra.mxu2 %v1426_v48 }
 0x1ef   : > { %7010 = vst [vmem:[#allocation107_spill] sm:$0xff] %v5178_v62  ;;  %v5180_v43 = vpop.f32.mrf.mxu1  ;;  %v1095_v62 = vld [vmem:[#allocation2 + $0x5f8] sm:$0xff] }
 0x1f0   : > { %7011 = vst [vmem:[#allocation108_spill] sm:$0xff] %v5180_v43  ;;  %955 = vmatmul.f32.gmra.mxu3 %v733_v49  ;;  %v1752_v43 = vld [vmem:[#allocation2 + $0x800] sm:$0xff] }
 0x1f1   : > { %1202 = vmatmul.f32.gmra.mxu0 %v1092_v58  ;;  %v5190_v13 = vpop.f32.mrf.mxu2  ;;  %v1393_v58 = vld [vmem:[#allocation2 + $0x608] sm:$0xff] }
 0x1f2   : > { %1315 = vmatmul.f32.gmra.mxu1 %v1093_v57  ;;  %v1428_v57 = vld [vmem:[#allocation2 + $0x720] sm:$0xff] }
 0x1f3   : > { %v5184_v41 = vpop.f32.mrf.mxu3 }
 0x1f4   : > { %7012 = vst [vmem:[#allocation109_spill] sm:$0xff] %v5184_v41  ;;  %v1753_v41 = vld [vmem:[#allocation2 + $0x808] sm:$0xff] }
 0x1f6   : > { %v5186_v39 = vpop.f32.mrf.mxu0  ;;  %1526 = vmatmul.f32.gmra.mxu2 %v1428_v57  ;;  %v4188_v57 = vld [vmem:[%s4460_s28 + $0xf0] sm:$0xff] }
 0x1f7   : > { %7013 = vst [vmem:[#allocation110_spill] sm:$0xff] %v5186_v39  ;;  %v5188_v50 = vpop.f32.mrf.mxu1 }
 0x1f8   : > { %7014 = vst [vmem:[#allocation111_spill] sm:$0xff] %v5188_v50  ;;  %958 = vmatmul.f32.gmra.mxu3 %v735_v63  ;;  %v4187_v63 = vld [vmem:[%s4460_s28 + $0xf8] sm:$0xff] }
 0x1f9   : > { %1205 = vmatmul.f32.gmra.mxu0 %v1094_v42  ;;  %v5198_v50 = vpop.f32.mrf.mxu2  ;;  %v1430_v42 = vld [vmem:[#allocation2 + $0x730] sm:$0xff] }
 0x1fa   : > { %1318 = vmatmul.f32.gmra.mxu1 %v1095_v62 }
 0x1fb   : > { %v5192_v49 = vpop.f32.mrf.mxu3 }
 0x1fe   : > { %v5194_v48 = vpop.f32.mrf.mxu0  ;;  %1529 = vmatmul.f32.gmra.mxu2 %v1430_v42  ;;  %v4190_v42 = vld [vmem:[%s4460_s28 + $0xe0] sm:$0xff] }
 0x1ff   : > { %7015 = vst [vmem:[#allocation112_spill] sm:$0xff] %v5194_v48  ;;  %v5196_v39 = vpop.f32.mrf.mxu1  ;;  %v4189_v48 = vld [vmem:[%s4460_s28 + $0xe8] sm:$0xff] }
 0x200   : > { %7016 = vst [vmem:[#allocation113_spill] sm:$0xff] %v5196_v39  ;;  %1585 = vmatmul.f32.vlgmr.msra.gmra.mxu3 %v1393_v58  ;;  %v1395_v39 = vld [vmem:[#allocation2 + $0x618] sm:$0xff] }
 0x201   : > { %1832 = vmatmul.f32.vlgmr.msra.gmra.mxu0 %v1752_v43  ;;  %3009 = vmatpush.msra.mxu3 %v4187_v63  ;;  %v1755_v58 = vld [vmem:[#allocation2 + $0x818] sm:$0xff] }
 0x202   : > { %1945 = vmatmul.f32.vlgmr.msra.gmra.mxu1 %v1753_v41  ;;  %3256 = vmatpush.msra.mxu0 %v4987_v19  ;;  %v1754_v41 = vld [vmem:[#allocation2 + $0x810] sm:$0xff] }
 0x203   : > { %v5202_v62 = vpop.f32.mrf.mxu3  ;;  %3369 = vmatpush.msra.mxu1 %v4187_v63  ;;  %3010 = vmatpush.msra.mxu3 %v4188_v57  ;;  %v5212_v63 = vpop.f32.mrf.mxu2 }
 0x204   : > { %3257 = vmatpush.msra.mxu0 %v4997_v10  ;;  %v4191_v10 = vld [vmem:[%s4460_s28 + $0xd8] sm:$0xff] }
 0x205   : > { %3370 = vmatpush.msra.mxu1 %v4188_v57  ;;  %3011 = vmatpush.msra.mxu3 %v4189_v48 }
 0x206   : > { %v5207_v43 = vpop.f32.mrf.mxu0  ;;  %3258 = vmatpush.msra.mxu0 %v5001_v33  ;;  %v1432_v33 = vld [vmem:[#allocation2 + $0x740] sm:$0xff] }
 0x207   : > { %7017 = vst [vmem:[#allocation114_spill] sm:$0xff] %v5207_v43  ;;  %v5210_v19 = vpop.f32.mrf.mxu1  ;;  %3371 = vmatpush.msra.mxu1 %v4189_v48  ;;  %3012 = vmatpush.msra.mxu3 %v4190_v42  ;;  %v1397_v48 = vld [vmem:[#allocation2 + $0x628] sm:$0xff] }
 0x208   : > { %7018 = vst [vmem:[#allocation115_spill] sm:$0xff] %v5210_v19  ;;  %1588 = vmatmul.f32.gmra.mxu3 %v1395_v39  ;;  %3259 = vmatpush.msra.mxu0 %v5007_v31  ;;  %v4192_v19 = vld [vmem:[%s4460_s28 + $0xd0] sm:$0xff]  ;;  %v1756_v39 = vld [vmem:[#allocation2 + $0x820] sm:$0xff] }
 0x209   : > { %1835 = vmatmul.f32.gmra.mxu0 %v1754_v41  ;;  %3372 = vmatpush.msra.mxu1 %v4190_v42  ;;  %v4193_v41 = vld [vmem:[%s4460_s28 + $0xc8] sm:$0xff] }
 0x20a   : > { %1948 = vmatmul.f32.gmra.mxu1 %v1755_v58  ;;  %3013 = vmatpush.msra.mxu3 %v4191_v10  ;;  %v1757_v42 = vld [vmem:[#allocation2 + $0x828] sm:$0xff] }
 0x20b   : > { %v5217_v57 = vpop.f32.mrf.mxu3  ;;  %3260 = vmatpush.msra.mxu0 %v5011_v9  ;;  %3373 = vmatpush.msra.mxu1 %v4191_v10  ;;  %v5227_v43 = vpop.f32.mrf.mxu2  ;;  %v4194_v9 = vld [vmem:[%s4460_s28 + $0xc0] sm:$0xff]  ;;  %v4195_v10 = vld [vmem:[%s4460_s28 + $0xb8] sm:$0xff] }
 0x20c   : > { %7019 = vst [vmem:[#allocation116_spill] sm:$0xff] %v5217_v57  ;;  %1532 = vmatmul.f32.gmra.mxu2 %v1432_v33  ;;  %3014 = vmatpush.msra.mxu3 %v4192_v19  ;;  %v4196_v33 = vld [vmem:[%s4460_s28 + $0xb0] sm:$0xff] }
 0x20d   : > { %3261 = vmatpush.msra.mxu0 %v5021_v30  ;;  %3374 = vmatpush.msra.mxu1 %v4192_v19  ;;  %v1434_v19 = vld [vmem:[#allocation2 + $0x750] sm:$0xff] }
 0x20e   : > { %v5222_v31 = vpop.f32.mrf.mxu0  ;;  %3015 = vmatpush.msra.mxu3 %v4193_v41 }
 0x20f   : > { %7020 = vst [vmem:[#allocation117_spill] sm:$0xff] %v5222_v31  ;;  %v5225_v58 = vpop.f32.mrf.mxu1  ;;  %3262 = vmatpush.msra.mxu0 %v5025_v21  ;;  %3375 = vmatpush.msra.mxu1 %v4193_v41  ;;  %v1399_v21 = vld [vmem:[#allocation2 + $0x638] sm:$0xff] }
 0x210   : > { %7021 = vst [vmem:[#allocation118_spill] sm:$0xff] %v5225_v58  ;;  %1591 = vmatmul.f32.gmra.mxu3 %v1397_v48  ;;  %v1759_v41 = vld [vmem:[#allocation2 + $0x838] sm:$0xff] }
 0x211   : > { %1838 = vmatmul.f32.gmra.mxu0 %v1756_v39  ;;  %3016 = vmatpush.msra.mxu3 %v4194_v9  ;;  %v1758_v39 = vld [vmem:[#allocation2 + $0x830] sm:$0xff] }
 0x212   : > { %1951 = vmatmul.f32.gmra.mxu1 %v1757_v42  ;;  %3263 = vmatpush.msra.mxu0 %v5031_v7 }
 0x213   : > { %v5232_v30 = vpop.f32.mrf.mxu3  ;;  %3376 = vmatpush.msra.mxu1 %v4194_v9  ;;  %3017 = vmatpush.msra.mxu3 %v4195_v10  ;;  %v5242_v42 = vpop.f32.mrf.mxu2  ;;  %v4197_v9 = vld [vmem:[%s4460_s28 + $0xa8] sm:$0xff] }
 0x214   : > { %7022 = vst [vmem:[#allocation119_spill] sm:$0xff] %v5232_v30  ;;  %1535 = vmatmul.f32.gmra.mxu2 %v1434_v19  ;;  %3264 = vmatpush.msra.mxu0 %v5035_v38  ;;  %v4198_v38 = vld [vmem:[%s4460_s28 + $0xa0] sm:$0xff] }
 0x215   : > { %3377 = vmatpush.msra.mxu1 %v4195_v10  ;;  %3018 = vmatpush.msra.mxu3 %v4196_v33  ;;  %v4199_v10 = vld [vmem:[%s4460_s28 + $0x98] sm:$0xff]  ;;  %v1772_v30 = vld [vmem:[#allocation2 + $0x8a0] sm:$0xff] }
 0x216   : > { %v5237_v48 = vpop.f32.mrf.mxu0  ;;  %3265 = vmatpush.msra.mxu0 %v5045_v14  ;;  %v1436_v14 = vld [vmem:[#allocation2 + $0x760] sm:$0xff] }
 0x217   : > { %7023 = vst [vmem:[#allocation120_spill] sm:$0xff] %v5237_v48  ;;  %v5240_v7 = vpop.f32.mrf.mxu1  ;;  %3378 = vmatpush.msra.mxu1 %v4196_v33  ;;  %3019 = vmatpush.msra.mxu3 %v4197_v9  ;;  %v1401_v33 = vld [vmem:[#allocation2 + $0x648] sm:$0xff] }
 0x218   : > { %7024 = vst [vmem:[#allocation121_spill] sm:$0xff] %v5240_v7  ;;  %1594 = vmatmul.f32.gmra.mxu3 %v1399_v21  ;;  %3266 = vmatpush.msra.mxu0 %v5049_v47  ;;  %v1760_v21 = vld [vmem:[#allocation2 + $0x840] sm:$0xff] }
 0x219   : > { %1841 = vmatmul.f32.gmra.mxu0 %v1758_v39  ;;  %3379 = vmatpush.msra.mxu1 %v4197_v9  ;;  %v4200_v39 = vld [vmem:[%s4460_s28 + $0x90] sm:$0xff]  ;;  %v1761_v9 = vld [vmem:[#allocation2 + $0x848] sm:$0xff] }
 0x21a   : > { %1954 = vmatmul.f32.gmra.mxu1 %v1759_v41  ;;  %3020 = vmatpush.msra.mxu3 %v4198_v38 }
 0x21b   : > { %v5247_v19 = vpop.f32.mrf.mxu3  ;;  %3267 = vmatpush.msra.mxu0 %v5055_v44  ;;  %3380 = vmatpush.msra.mxu1 %v4198_v38  ;;  %v5257_v7 = vpop.f32.mrf.mxu2  ;;  %v4201_v44 = vld [vmem:[%s4460_s28 + $0x88] sm:$0xff]  ;;  %v1438_v38 = vld [vmem:[#allocation2 + $0x770] sm:$0xff] }
 0x21c   : > { %7025 = vst [vmem:[#allocation122_spill] sm:$0xff] %v5247_v19  ;;  %1538 = vmatmul.f32.gmra.mxu2 %v1436_v14  ;;  %3021 = vmatpush.msra.mxu3 %v4199_v10  ;;  %v4202_v14 = vld [vmem:[%s4460_s28 + $0x80] sm:$0xff]  ;;  %v1771_v19 = vld [vmem:[#allocation2 + $0x898] sm:$0xff] }
 0x21d   : > { %3268 = vmatpush.msra.mxu0 %v5059_v37  ;;  %3381 = vmatpush.msra.mxu1 %v4199_v10  ;;  %v1403_v10 = vld [vmem:[#allocation2 + $0x658] sm:$0xff] }
 0x21e   : > { %v5252_v47 = vpop.f32.mrf.mxu0  ;;  %3022 = vmatpush.msra.mxu3 %v4200_v39 }
 0x21f   : > { %7026 = vst [vmem:[#allocation123_spill] sm:$0xff] %v5252_v47  ;;  %v5255_v41 = vpop.f32.mrf.mxu1  ;;  %3269 = vmatpush.msra.mxu0 %v5069_v40  ;;  %3382 = vmatpush.msra.mxu1 %v4200_v39  ;;  %v1763_v39 = vld [vmem:[#allocation2 + $0x858] sm:$0xff] }
 0x220   : > { %7027 = vst [vmem:[#allocation124_spill] sm:$0xff] %v5255_v41  ;;  %1597 = vmatmul.f32.gmra.mxu3 %v1401_v33  ;;  %v1762_v33 = vld [vmem:[#allocation2 + $0x850] sm:$0xff] }
 0x221   : > { %1844 = vmatmul.f32.gmra.mxu0 %v1760_v21  ;;  %3023 = vmatpush.msra.mxu3 %v4201_v44 }
 0x222   : > { %1957 = vmatmul.f32.gmra.mxu1 %v1761_v9  ;;  %3270 = vmatpush.msra.mxu0 %v5073_v6 }
 0x223   : > { %v5262_v37 = vpop.f32.mrf.mxu3  ;;  %3383 = vmatpush.msra.mxu1 %v4201_v44  ;;  %3024 = vmatpush.msra.mxu3 %v4202_v14  ;;  %v5270_v9 = vpop.f32.mrf.mxu2  ;;  %v1440_v44 = vld [vmem:[#allocation2 + $0x780] sm:$0xff] }
 0x224   : > { %7028 = vst [vmem:[#allocation125_spill] sm:$0xff] %v5262_v37  ;;  %1541 = vmatmul.f32.gmra.mxu2 %v1438_v38  ;;  %3271 = vmatpush.msra.mxu0 %v5079_v51  ;;  %v1405_v38 = vld [vmem:[#allocation2 + $0x668] sm:$0xff]  ;;  %v1764_v51 = vld [vmem:[#allocation2 + $0x860] sm:$0xff] }
 0x225   : > { %3384 = vmatpush.msra.mxu1 %v4202_v14 }
 0x226   : > { %v5266_v40 = vpop.f32.mrf.mxu0 }
 0x227   : > { %7029 = vst [vmem:[#allocation126_spill] sm:$0xff] %v5266_v40  ;;  %v5268_v21 = vpop.f32.mrf.mxu1  ;;  %v1765_v40 = vld [vmem:[#allocation2 + $0x868] sm:$0xff] }
 0x228   : > { %7030 = vst [vmem:[#allocation127_spill] sm:$0xff] %v5268_v21  ;;  %1600 = vmatmul.f32.gmra.mxu3 %v1403_v10  ;;  %v1442_v10 = vld [vmem:[#allocation2 + $0x790] sm:$0xff] }
 0x229   : > { %1847 = vmatmul.f32.gmra.mxu0 %v1762_v33  ;;  %v1407_v33 = vld [vmem:[#allocation2 + $0x678] sm:$0xff] }
 0x22a   : > { %1960 = vmatmul.f32.gmra.mxu1 %v1763_v39 }
 0x22b   : > { %v5272_v6 = vpop.f32.mrf.mxu3  ;;  %v5278_v47 = vpop.f32.mrf.mxu2 }
 0x22c   : > { %7031 = vst [vmem:[#allocation128_spill] sm:$0xff] %v5272_v6  ;;  %1544 = vmatmul.f32.gmra.mxu2 %v1440_v44  ;;  %v1766_v44 = vld [vmem:[#allocation2 + $0x870] sm:$0xff] }
 0x22e   : > { %v5274_v41 = vpop.f32.mrf.mxu0 }
 0x22f   : > { %7032 = vst [vmem:[#allocation129_spill] sm:$0xff] %v5274_v41  ;;  %v5276_v14 = vpop.f32.mrf.mxu1  ;;  %v1767_v41 = vld [vmem:[#allocation2 + $0x878] sm:$0xff] }
 0x230   : > { %7033 = vst [vmem:[#allocation130_spill] sm:$0xff] %v5276_v14  ;;  %1603 = vmatmul.f32.gmra.mxu3 %v1405_v38  ;;  %v1444_v38 = vld [vmem:[#allocation2 + $0x7a0] sm:$0xff] }
 0x231   : > { %1850 = vmatmul.f32.gmra.mxu0 %v1764_v51 }
 0x232   : > { %1963 = vmatmul.f32.gmra.mxu1 %v1765_v40  ;;  %v1409_v40 = vld [vmem:[#allocation2 + $0x688] sm:$0xff] }
 0x233   : > { %v5280_v21 = vpop.f32.mrf.mxu3  ;;  %v5286_v37 = vpop.f32.mrf.mxu2 }
 0x234   : > { %7034 = vst [vmem:[#allocation131_spill] sm:$0xff] %v5280_v21  ;;  %1547 = vmatmul.f32.gmra.mxu2 %v1442_v10  ;;  %v1768_v10 = vld [vmem:[#allocation2 + $0x880] sm:$0xff] }
 0x236   : > { %v5282_v39 = vpop.f32.mrf.mxu0 }
 0x237   : > { %7035 = vst [vmem:[#allocation132_spill] sm:$0xff] %v5282_v39  ;;  %v5284_v6 = vpop.f32.mrf.mxu1  ;;  %v1769_v39 = vld [vmem:[#allocation2 + $0x888] sm:$0xff] }
 0x238   : > { %7036 = vst [vmem:[#allocation133_spill] sm:$0xff] %v5284_v6  ;;  %1606 = vmatmul.f32.gmra.mxu3 %v1407_v33  ;;  %v1446_v33 = vld [vmem:[#allocation2 + $0x7b0] sm:$0xff] }
 0x239   : > { %1853 = vmatmul.f32.gmra.mxu0 %v1766_v44  ;;  %v5304_v44 = vld [vmem:[%s6908_s2 + $0x1] ss:$0 sm:$0xff] }
 0x23a   : > { %1966 = vmatmul.f32.gmra.mxu1 %v1767_v41  ;;  %v5299_v41 = vld [vmem:[%s6908_s2] ss:$0 sm:$0xff] }
 0x23b   : > { %v5288_v14 = vpop.f32.mrf.mxu3  ;;  %v5294_v48 = vpop.f32.mrf.mxu2 }
 0x23c   : > { %7037 = vst [vmem:[#allocation134_spill] sm:$0xff] %v5288_v14  ;;  %1550 = vmatmul.f32.gmra.mxu2 %v1444_v38 }
 0x23e   : > { %v5290_v51 = vpop.f32.mrf.mxu0 }
 0x23f   : > { %7038 = vst [vmem:[#allocation135_spill] sm:$0xff] %v5290_v51  ;;  %v5292_v21 = vpop.f32.mrf.mxu1  ;;  %v1770_v51 = vld [vmem:[#allocation2 + $0x890] sm:$0xff] }
 0x240   : > { %7039 = vst [vmem:[#allocation136_spill] sm:$0xff] %v5292_v21  ;;  %1609 = vmatmul.f32.gmra.mxu3 %v1409_v40  ;;  %v1411_v21 = vld [vmem:[#allocation2 + $0x698] sm:$0xff]  ;;  %v663_v40 = vmul.f32 %v5299_v41, %v4839_v60  ;;  %v1413_v60 = vld [vmem:[#allocation2 + $0x6a8] sm:$0xff] }
 0x241   : > { %1856 = vmatmul.f32.gmra.mxu0 %v1768_v10 }
 0x242   : > { %1969 = vmatmul.f32.gmra.mxu1 %v1769_v39 }
 0x243   : > { %v938_v6 = vpop.f32.mrf.mxu3  ;;  %v5314_v58 = vpop.f32.mrf.mxu2 }
 0x244   : > { %v939_v38 = vadd.f32 %v938_v6, %v4944_v24  ;;  %1553 = vmatmul.f32.gmra.mxu2 %v1446_v33  ;;  %v1448_v6 = vld [vmem:[#allocation2 + $0x7c0] sm:$0xff] }
 0x246   : > { %v991_v39 = vmul.f32 %v5304_v44, %v939_v38  ;;  %v5310_v10 = vpop.f32.mrf.mxu0  ;;  %v664_v38 = vmul.f32 %v5299_v41, %v4857_v3  ;;  %v1415_v3 = vld [vmem:[#allocation2 + $0x6b8] sm:$0xff] }
 0x247   : > { %7040 = vst [vmem:[#allocation137_spill] sm:$0xff] %v5310_v10  ;;  %v5312_v14 = vpop.f32.mrf.mxu1 }
 0x248   : > { %7041 = vst [vmem:[#allocation138_spill] sm:$0xff] %v5312_v14  ;;  %v5316_v31 = vadd.f32 %v991_v39, %v663_v40  ;;  %1612 = vmatmul.f32.gmra.mxu3 %v1411_v21  ;;  %v1773_v40 = vld [vmem:[#allocation2 + $0x8a8] sm:$0xff] }
 0x249   : > { %1859 = vmatmul.f32.gmra.mxu0 %v1770_v51  ;;  %v1450_v51 = vld [vmem:[#allocation2 + $0x7d0] sm:$0xff] }
 0x24a   : > { %1972 = vmatmul.f32.gmra.mxu1 %v1771_v19 }
 0x24b   : > { %v941_v24 = vpop.f32.mrf.mxu3  ;;  %v5326_v21 = vpop.f32.mrf.mxu2 }
 0x24c   : > { %v942_v33 = vadd.f32 %v941_v24, %v4952_v35  ;;  %1556 = vmatmul.f32.gmra.mxu2 %v1448_v6  ;;  %v665_v24 = vmul.f32 %v5299_v41, %v4874_v11  ;;  %v1417_v11 = vld [vmem:[#allocation2 + $0x6c8] sm:$0xff] }
 0x24e   : > { %v992_v10 = vmul.f32 %v5304_v44, %v942_v33  ;;  %v5322_v14 = vpop.f32.mrf.mxu0 }
 0x24f   : > { %7042 = vst [vmem:[#allocation139_spill] sm:$0xff] %v5322_v14  ;;  %v5324_v57 = vpop.f32.mrf.mxu1 }
 0x250   : > { %7043 = vst [vmem:[#allocation140_spill] sm:$0xff] %v5324_v57  ;;  %v5328_v19 = vadd.f32 %v992_v10, %v664_v38  ;;  %1615 = vmatmul.f32.gmra.mxu3 %v1413_v60  ;;  %v1774_v57 = vld [vmem:[#allocation2 + $0x8b0] sm:$0xff]  ;;  %v1775_v10 = vld [vmem:[#allocation2 + $0x8b8] sm:$0xff]  ;;  %v1452_v38 = vld [vmem:[#allocation2 + $0x7e0] sm:$0xff] }
 0x251   : > { %1862 = vmatmul.f32.gmra.mxu0 %v1772_v30 }
 0x252   : > { %1975 = vmatmul.f32.gmra.mxu1 %v1773_v40 }
 0x253   : > { %v944_v35 = vpop.f32.mrf.mxu3  ;;  %v5338_v60 = vpop.f32.mrf.mxu2 }
 0x254   : > { %v945_v39 = vadd.f32 %v944_v35, %v4960_v16  ;;  %1559 = vmatmul.f32.gmra.mxu2 %v1450_v51  ;;  %v666_v35 = vmul.f32 %v5299_v41, %v4892_v18  ;;  %v1419_v18 = vld [vmem:[#allocation2 + $0x6d8] sm:$0xff] }
 0x256   : > { %v993_v6 = vmul.f32 %v5304_v44, %v945_v39  ;;  %v5334_v33 = vpop.f32.mrf.mxu0 }
 0x257   : > { %7044 = vst [vmem:[#allocation141_spill] sm:$0xff] %v5334_v33  ;;  %v5336_v14 = vpop.f32.mrf.mxu1 }
 0x258   : > { %7045 = vst [vmem:[#allocation142_spill] sm:$0xff] %v5336_v14  ;;  %v5340_v30 = vadd.f32 %v993_v6, %v665_v24  ;;  %1618 = vmatmul.f32.gmra.mxu3 %v1415_v3  ;;  %v1776_v14 = vld [vmem:[#allocation2 + $0x8c0] sm:$0xff]  ;;  %v1777_v24 = vld [vmem:[#allocation2 + $0x8c8] sm:$0xff]  ;;  %v1454_v6 = vld [vmem:[#allocation2 + $0x7f0] sm:$0xff] }
 0x259   : > { %1865 = vmatmul.f32.gmra.mxu0 %v1774_v57 }
 0x25a   : > { %1978 = vmatmul.f32.gmra.mxu1 %v1775_v10 }
 0x25b   : > { %v947_v16 = vpop.f32.mrf.mxu3  ;;  %v5350_v3 = vpop.f32.mrf.mxu2 }
 0x25c   : > { %v948_v40 = vadd.f32 %v947_v16, %v4968_v0  ;;  %1562 = vmatmul.f32.gmra.mxu2 %v1452_v38  ;;  %v667_v16 = vmul.f32 %v5299_v41, %v4909_v25  ;;  %v1421_v25 = vld [vmem:[#allocation2 + $0x6e8] sm:$0xff] }
 0x25e   : > { %v994_v51 = vmul.f32 %v5304_v44, %v948_v40  ;;  %v5346_v39 = vpop.f32.mrf.mxu0 }
 0x25f   : > { %7046 = vst [vmem:[#allocation143_spill] sm:$0xff] %v5346_v39  ;;  %v5348_v33 = vpop.f32.mrf.mxu1 }
 0x260   : > { %7047 = vst [vmem:[#allocation144_spill] sm:$0xff] %v5348_v33  ;;  %v5352_v57 = vadd.f32 %v994_v51, %v666_v35  ;;  %1621 = vmatmul.f32.gmra.mxu3 %v1417_v11  ;;  %v1778_v33 = vld [vmem:[#allocation2 + $0x8d0] sm:$0xff]  ;;  %v1779_v35 = vld [vmem:[#allocation2 + $0x8d8] sm:$0xff]  ;;  %v2112_v51 = vld [vmem:[#allocation2 + $0xa00] sm:$0xff] }
 0x261   : > { %1868 = vmatmul.f32.gmra.mxu0 %v1776_v14 }
 0x262   : > { %1981 = vmatmul.f32.gmra.mxu1 %v1777_v24 }
 0x263   : > { %v950_v0 = vpop.f32.mrf.mxu3  ;;  %v5362_v11 = vpop.f32.mrf.mxu2 }
 0x264   : > { %v951_v10 = vadd.f32 %v950_v0, %v4976_v45  ;;  %1565 = vmatmul.f32.gmra.mxu2 %v1454_v6  ;;  %v668_v0 = vmul.f32 %v5299_v41, %v4918_v53  ;;  %v1423_v53 = vld [vmem:[#allocation2 + $0x6f8] sm:$0xff] }
 0x266   : > { %v995_v38 = vmul.f32 %v5304_v44, %v951_v10  ;;  %v5358_v40 = vpop.f32.mrf.mxu0 }
 0x267   : > { %7048 = vst [vmem:[#allocation145_spill] sm:$0xff] %v5358_v40  ;;  %v5360_v39 = vpop.f32.mrf.mxu1 }
 0x268   : > { %7049 = vst [vmem:[#allocation146_spill] sm:$0xff] %v5360_v39  ;;  %v5364_v14 = vadd.f32 %v995_v38, %v667_v16  ;;  %1624 = vmatmul.f32.gmra.mxu3 %v1419_v18  ;;  %v1780_v39 = vld [vmem:[#allocation2 + $0x8e0] sm:$0xff]  ;;  %v1781_v16 = vld [vmem:[#allocation2 + $0x8e8] sm:$0xff]  ;;  %v2114_v38 = vld [vmem:[#allocation2 + $0xa10] sm:$0xff] }
 0x269   : > { %1871 = vmatmul.f32.gmra.mxu0 %v1778_v33 }
 0x26a   : > { %1984 = vmatmul.f32.gmra.mxu1 %v1779_v35 }
 0x26b   : > { %v953_v45 = vpop.f32.mrf.mxu3  ;;  %v5374_v18 = vpop.f32.mrf.mxu2 }
 0x26c   : > { %v954_v24 = vadd.f32 %v953_v45, %v4984_v22  ;;  %2192 = vmatmul.f32.vlgmr.msra.gmra.mxu2 %v2112_v51  ;;  %v669_v45 = vmul.f32 %v5299_v41, %v4927_v5  ;;  %v2116_v5 = vld [vmem:[#allocation2 + $0xa20] sm:$0xff] }
 0x26e   : > { %v996_v6 = vmul.f32 %v5304_v44, %v954_v24  ;;  %v5370_v10 = vpop.f32.mrf.mxu0 }
 0x26f   : > { %7050 = vst [vmem:[#allocation147_spill] sm:$0xff] %v5370_v10  ;;  %v5372_v40 = vpop.f32.mrf.mxu1 }
 0x270   : > { %7051 = vst [vmem:[#allocation148_spill] sm:$0xff] %v5372_v40  ;;  %v5376_v33 = vadd.f32 %v996_v6, %v668_v0  ;;  %1627 = vmatmul.f32.gmra.mxu3 %v1421_v25  ;;  %v1782_v40 = vld [vmem:[#allocation2 + $0x8f0] sm:$0xff]  ;;  %v1783_v0 = vld [vmem:[#allocation2 + $0x8f8] sm:$0xff] }
 0x271   : > { %1874 = vmatmul.f32.gmra.mxu0 %v1780_v39 }
 0x272   : > { %1987 = vmatmul.f32.gmra.mxu1 %v1781_v16  ;;  %v540_v16 = vadd.f32 %v4761_v54, %v4759_v52  ;;  %v1784_v54 = vld [vmem:[#allocation2 + $0x900] sm:$0xff] }
 0x273   : > { %v956_v22 = vpop.f32.mrf.mxu3  ;;  %v5386_v25 = vpop.f32.mrf.mxu2 }
 0x274   : > { %v957_v35 = vadd.f32 %v956_v22, %v5004_v28  ;;  %2195 = vmatmul.f32.gmra.mxu2 %v2114_v38  ;;  %v867_v28 = vadd.f32 %v5052_v56, %v4924_v2  ;;  %v1425_v38 = vld [vmem:[#allocation2 + $0x708] sm:$0xff]  ;;  %v5403_v56 = vld [vmem:[%s6908_s2 + $0x2] ss:$0 sm:$0xff] }
 0x276   : > { %v997_v51 = vmul.f32 %v5304_v44, %v957_v35  ;;  %v5382_v24 = vpop.f32.mrf.mxu0  ;;  %v670_v35 = vmul.f32 %v5299_v41, %v4936_v15  ;;  %v639_v15 = vmul.f32 %v5299_v41, %v540_v16  ;;  %v543_v16 = vadd.f32 %v4773_v61, %v4771_v59 }
 0x277   : > { %v5384_v10 = vpop.f32.mrf.mxu1 }
 0x278   : > { %v5388_v39 = vadd.f32 %v997_v51, %v669_v45  ;;  %1630 = vmatmul.f32.gmra.mxu3 %v1423_v53  ;;  %v967_v45 = vmul.f32 %v5304_v44, %v867_v28  ;;  %v1785_v53 = vld [vmem:[#allocation2 + $0x908] sm:$0xff]  ;;  %v870_v28 = vadd.f32 %v5076_v1, %v4933_v12  ;;  %v1230_v12 = vadd.f32 %v5064_v32, %v5062_v27 }
 0x279   : > { %1877 = vmatmul.f32.gmra.mxu0 %v1782_v40  ;;  %v1227_v40 = vadd.f32 %v5040_v20, %v5038_v17  ;;  %v640_v59 = vmul.f32 %v5299_v41, %v543_v16  ;;  %v873_v32 = vadd.f32 %v5088_v26, %v4942_v23  ;;  %v1788_v23 = vld [vmem:[#allocation2 + $0x920] sm:$0xff] }
 0x27a   : > { %1990 = vmatmul.f32.gmra.mxu1 %v1783_v0  ;;  %v999_v20 = vadd.f32 %v967_v45, %v639_v15  ;;  %v1787_v15 = vld [vmem:[#allocation2 + $0x918] sm:$0xff] }
 0x27b   : > { %v959_v6 = vpop.f32.mrf.mxu3  ;;  %v5410_v51 = vpop.f32.mrf.mxu2  ;;  %v1327_v17 = vmul.f32 %v5403_v56, %v1227_v40  ;;  %v968_v40 = vmul.f32 %v5304_v44, %v870_v28  ;;  %v546_v28 = vadd.f32 %v4786_v36, %v4784_v34 }
 0x27c   : > { %v960_v22 = vadd.f32 %v959_v6, %v5028_v29  ;;  %2198 = vmatmul.f32.gmra.mxu2 %v2116_v5  ;;  %v5421_v6 = vld [vmem:[%s6908_s2 + $0x3] ss:$0 sm:$0xff] }
 0x27d   : > { %v1359_v45 = vadd.f32 %v1327_v17, %v999_v20  ;;  %v1328_v20 = vmul.f32 %v5403_v56, %v1230_v12  ;;  %v2120_v17 = vld [vmem:[#allocation2 + $0xa40] sm:$0xff]  ;;  %v1789_v12 = vld [vmem:[#allocation2 + $0x928] sm:$0xff]  ;;  %v641_v34 = vmul.f32 %v5299_v41, %v546_v28 }
 0x27e   : > { %v998_v2 = vmul.f32 %v5304_v44, %v960_v22  ;;  %v5406_v52 = vpop.f32.mrf.mxu0  ;;  %v2118_v22 = vld [vmem:[#allocation2 + $0xa30] sm:$0xff] }
 0x27f   : > { %v5408_v29 = vpop.f32.mrf.mxu1 }
 0x280   : > { %7052 = vst [vmem:[#allocation149_spill] sm:$0xff] %v5408_v29  ;;  %v5413_v0 = vadd.f32 %v998_v2, %v670_v35  ;;  %1633 = vmatmul.f32.gmra.mxu3 %v1425_v38  ;;  %v1427_v35 = vld [vmem:[#allocation2 + $0x718] sm:$0xff] }
 0x281   : > { %1880 = vmatmul.f32.gmra.mxu0 %v1784_v54  ;;  %v1786_v54 = vld [vmem:[#allocation2 + $0x910] sm:$0xff] }
 0x282   : > { %1993 = vmatmul.f32.gmra.mxu1 %v1785_v53 }
 0x283   : > { %v1586_v5 = vpop.f32.mrf.mxu3  ;;  %v5434_v29 = vpop.f32.mrf.mxu2 }
 0x284   : > { %v1587_v38 = vadd.f32 %v1586_v5, %v5182_v46  ;;  %2201 = vmatmul.f32.gmra.mxu2 %v2118_v22  ;;  %v1000_v46 = vadd.f32 %v968_v40, %v640_v59  ;;  %v1429_v22 = vld [vmem:[#allocation2 + $0x728] sm:$0xff]  ;;  %v2122_v59 = vld [vmem:[#allocation2 + $0xa50] sm:$0xff] }
 0x286   : > { %v1687_v1 = vmul.f32 %v5421_v6, %v1587_v38  ;;  %v5430_v2 = vpop.f32.mrf.mxu0  ;;  %v1360_v16 = vadd.f32 %v1328_v20, %v1000_v46  ;;  %v969_v38 = vmul.f32 %v5304_v44, %v873_v32  ;;  %v7054_v46 = vld [vmem:[#allocation12_spill] sm:$0xff]  ;;  %v7055_v20 = vld [vmem:[#allocation13_spill] sm:$0xff] }
 0x287   : > { %v5432_v53 = vpop.f32.mrf.mxu1  ;;  %v549_v32 = vadd.f32 %v7055_v20, %v7054_v46  ;;  %v2124_v20 = vld [vmem:[#allocation2 + $0xa60] sm:$0xff] }
 0x288   : > { %v5437_v61 = vadd.f32 %v1687_v1, %v1359_v45  ;;  %1636 = vmatmul.f32.gmra.mxu3 %v1427_v35  ;;  %v1233_v35 = vadd.f32 %v5084_v4, %v5082_v8  ;;  %v7053_v4 = vld [vmem:[#allocation66_spill] sm:$0xff] }
 0x289   : > { %1883 = vmatmul.f32.gmra.mxu0 %v1786_v54  ;;  %v876_v8 = vadd.f32 %v7053_v4, %v4950_v55  ;;  %v1790_v55 = vld [vmem:[#allocation2 + $0x930] sm:$0xff] }
 0x28a   : > { %1996 = vmatmul.f32.gmra.mxu1 %v1787_v15  ;;  %v1329_v54 = vmul.f32 %v5403_v56, %v1233_v35 }
 0x28b   : > { %v1589_v27 = vpop.f32.mrf.mxu3 }
 0x28c   : > { %v1590_v5 = vadd.f32 %v1589_v27, %v5190_v13  ;;  %2204 = vmatmul.f32.gmra.mxu2 %v2120_v17  ;;  %v1001_v13 = vadd.f32 %v969_v38, %v641_v34  ;;  %v1431_v17 = vld [vmem:[#allocation2 + $0x738] sm:$0xff] }
 0x28e   : > { %v1688_v45 = vmul.f32 %v5421_v6, %v1590_v5  ;;  %v5449_v40 = vpop.f32.mrf.mxu0  ;;  %v1361_v28 = vadd.f32 %v1329_v54, %v1001_v13  ;;  %v970_v5 = vmul.f32 %v5304_v44, %v876_v8  ;;  %v7060_v8 = vld [vmem:[#allocation44_spill] sm:$0xff] }
 0x28f   : > { %v5451_v26 = vpop.f32.mrf.mxu1  ;;  %v5453_v1 = vpop.f32.mrf.mxu2 }
 0x290   : > { %v5456_v36 = vadd.f32 %v1688_v45, %v1360_v16  ;;  %1639 = vmatmul.f32.gmra.mxu3 %v1429_v22  ;;  %v7056_v22 = vld [vmem:[#allocation63_spill] sm:$0xff]  ;;  %v7057_v16 = vld [vmem:[#allocation64_spill] sm:$0xff] }
 0x291   : > { %1886 = vmatmul.f32.gmra.mxu0 %v1788_v23  ;;  %v1236_v38 = vadd.f32 %v7057_v16, %v7056_v22  ;;  %v7063_v22 = vld [vmem:[#allocation15_spill] sm:$0xff] }
 0x292   : > { %1999 = vmatmul.f32.gmra.mxu1 %v1789_v12  ;;  %v1791_v12 = vld [vmem:[#allocation2 + $0x938] sm:$0xff] }
 0x293   : > { %v1592_v15 = vpop.f32.mrf.mxu3  ;;  %v1330_v54 = vmul.f32 %v5403_v56, %v1236_v38 }
 0x294   : > { %v1593_v27 = vadd.f32 %v1592_v15, %v5198_v50  ;;  %2207 = vmatmul.f32.gmra.mxu2 %v2122_v59  ;;  %v642_v50 = vmul.f32 %v5299_v41, %v549_v32  ;;  %v7061_v15 = vld [vmem:[#allocation70_spill] sm:$0xff]  ;;  %v1433_v32 = vld [vmem:[#allocation2 + $0x748] sm:$0xff] }
 0x295   : > { %v879_v59 = vadd.f32 %v7061_v15, %v7060_v8  ;;  %v1793_v15 = vld [vmem:[#allocation2 + $0x948] sm:$0xff] }
 0x296   : > { %v1689_v35 = vmul.f32 %v5421_v6, %v1593_v27  ;;  %v5468_v45 = vpop.f32.mrf.mxu0  ;;  %v1002_v13 = vadd.f32 %v970_v5, %v642_v50  ;;  %v7062_v27 = vld [vmem:[#allocation14_spill] sm:$0xff]  ;;  %v7065_v5 = vld [vmem:[#allocation68_spill] sm:$0xff] }
 0x297   : > { %7058 = vst [vmem:[#allocation66_spill] sm:$0xff] %v5468_v45  ;;  %v5470_v23 = vpop.f32.mrf.mxu1  ;;  %v5472_v34 = vpop.f32.mrf.mxu2  ;;  %v552_v16 = vadd.f32 %v7063_v22, %v7062_v27  ;;  %v2126_v22 = vld [vmem:[#allocation2 + $0xa70] sm:$0xff] }
 0x298   : > { %7059 = vst [vmem:[#allocation12_spill] sm:$0xff] %v5470_v23  ;;  %v5475_v4 = vadd.f32 %v1689_v35, %v1361_v28  ;;  %1642 = vmatmul.f32.gmra.mxu3 %v1431_v17  ;;  %v1362_v28 = vadd.f32 %v1330_v54, %v1002_v13  ;;  %v971_v17 = vmul.f32 %v5304_v44, %v879_v59  ;;  %v7064_v35 = vld [vmem:[#allocation67_spill] sm:$0xff] }
 0x299   : > { %1889 = vmatmul.f32.gmra.mxu0 %v1790_v55  ;;  %v1239_v55 = vadd.f32 %v7065_v5, %v7064_v35  ;;  %v7069_v59 = vld [vmem:[#allocation47_spill] sm:$0xff]  ;;  %v7071_v35 = vld [vmem:[#allocation16_spill] sm:$0xff]  ;;  %v7072_v5 = vld [vmem:[#allocation17_spill] sm:$0xff] }
 0x29a   : > { %2002 = vmatmul.f32.gmra.mxu1 %v1791_v12  ;;  %v1792_v12 = vld [vmem:[#allocation2 + $0x940] sm:$0xff] }
 0x29b   : > { %v1595_v46 = vpop.f32.mrf.mxu3  ;;  %v1331_v54 = vmul.f32 %v5403_v56, %v1239_v55 }
 0x29c   : > { %v1596_v23 = vadd.f32 %v1595_v46, %v5212_v63  ;;  %2210 = vmatmul.f32.gmra.mxu2 %v2124_v20  ;;  %v643_v63 = vmul.f32 %v5299_v41, %v552_v16  ;;  %v7070_v20 = vld [vmem:[#allocation74_spill] sm:$0xff] }
 0x29d   : > { %v1435_v16 = vld [vmem:[#allocation2 + $0x758] sm:$0xff] }
 0x29e   : > { %v1690_v38 = vmul.f32 %v5421_v6, %v1596_v23  ;;  %v5487_v50 = vpop.f32.mrf.mxu0  ;;  %v1003_v13 = vadd.f32 %v971_v17, %v643_v63  ;;  %v882_v23 = vadd.f32 %v7070_v20, %v7069_v59  ;;  %v7074_v17 = vld [vmem:[#allocation72_spill] sm:$0xff]  ;;  %v1795_v20 = vld [vmem:[#allocation2 + $0x958] sm:$0xff] }
 0x29f   : > { %7066 = vst [vmem:[#allocation13_spill] sm:$0xff] %v5487_v50  ;;  %v5489_v8 = vpop.f32.mrf.mxu1  ;;  %v5491_v45 = vpop.f32.mrf.mxu2 }
 0x2a0   : > { %7067 = vst [vmem:[#allocation63_spill] sm:$0xff] %v5489_v8  ;;  %v5494_v46 = vadd.f32 %v1690_v38, %v1362_v28  ;;  %1645 = vmatmul.f32.gmra.mxu3 %v1433_v32  ;;  %v555_v8 = vadd.f32 %v7072_v5, %v7071_v35  ;;  %v1363_v28 = vadd.f32 %v1331_v54, %v1003_v13  ;;  %v7073_v38 = vld [vmem:[#allocation71_spill] sm:$0xff] }
 0x2a1   : > { %1892 = vmatmul.f32.gmra.mxu0 %v1792_v12  ;;  %v972_v32 = vmul.f32 %v5304_v44, %v882_v23  ;;  %v1242_v12 = vadd.f32 %v7074_v17, %v7073_v38  ;;  %v7078_v23 = vld [vmem:[#allocation50_spill] sm:$0xff]  ;;  %v2128_v5 = vld [vmem:[#allocation2 + $0xa80] sm:$0xff] }
 0x2a2   : > { %7068 = vst [vmem:[#allocation64_spill] sm:$0xff] %v5494_v46  ;;  %2005 = vmatmul.f32.gmra.mxu1 %v1793_v15  ;;  %v1794_v15 = vld [vmem:[#allocation2 + $0x950] sm:$0xff]  ;;  %v7080_v38 = vld [vmem:[#allocation18_spill] sm:$0xff]  ;;  %v7081_v17 = vld [vmem:[#allocation19_spill] sm:$0xff] }
 0x2a3   : > { %v1598_v27 = vpop.f32.mrf.mxu3  ;;  %v1332_v54 = vmul.f32 %v5403_v56, %v1242_v12 }
 0x2a4   : > { %v1599_v50 = vadd.f32 %v1598_v27, %v5227_v43  ;;  %2213 = vmatmul.f32.gmra.mxu2 %v2126_v22  ;;  %v644_v43 = vmul.f32 %v5299_v41, %v555_v8  ;;  %v7079_v22 = vld [vmem:[#allocation78_spill] sm:$0xff]  ;;  %v1437_v8 = vld [vmem:[#allocation2 + $0x768] sm:$0xff] }
 0x2a6   : > { %v1691_v55 = vmul.f32 %v5421_v6, %v1599_v50  ;;  %v5506_v63 = vpop.f32.mrf.mxu0  ;;  %v1004_v13 = vadd.f32 %v972_v32, %v644_v43  ;;  %v885_v50 = vadd.f32 %v7079_v22, %v7078_v23  ;;  %v7083_v32 = vld [vmem:[#allocation76_spill] sm:$0xff] }
 0x2a7   : > { %7075 = vst [vmem:[#allocation44_spill] sm:$0xff] %v5506_v63  ;;  %v5508_v59 = vpop.f32.mrf.mxu1  ;;  %v5510_v46 = vpop.f32.mrf.mxu2  ;;  %v1797_v22 = vld [vmem:[#allocation2 + $0x968] sm:$0xff] }
 0x2a8   : > { %7076 = vst [vmem:[#allocation70_spill] sm:$0xff] %v5508_v59  ;;  %v5513_v27 = vadd.f32 %v1691_v55, %v1363_v28  ;;  %1648 = vmatmul.f32.gmra.mxu3 %v1435_v16  ;;  %v558_v59 = vadd.f32 %v7081_v17, %v7080_v38  ;;  %v1364_v28 = vadd.f32 %v1332_v54, %v1004_v13  ;;  %v7082_v55 = vld [vmem:[#allocation75_spill] sm:$0xff]  ;;  %v2130_v17 = vld [vmem:[#allocation2 + $0xa90] sm:$0xff] }
 0x2a9   : > { %1895 = vmatmul.f32.gmra.mxu0 %v1794_v15  ;;  %v973_v16 = vmul.f32 %v5304_v44, %v885_v50  ;;  %v1245_v15 = vadd.f32 %v7083_v32, %v7082_v55  ;;  %v7087_v50 = vld [vmem:[#allocation53_spill] sm:$0xff]  ;;  %v7089_v55 = vld [vmem:[#allocation20_spill] sm:$0xff] }
 0x2aa   : > { %7077 = vst [vmem:[#allocation14_spill] sm:$0xff] %v5513_v27  ;;  %2008 = vmatmul.f32.gmra.mxu1 %v1795_v20  ;;  %v1796_v20 = vld [vmem:[#allocation2 + $0x960] sm:$0xff]  ;;  %v7090_v32 = vld [vmem:[#allocation21_spill] sm:$0xff] }
 0x2ab   : > { %v1601_v35 = vpop.f32.mrf.mxu3  ;;  %v1333_v54 = vmul.f32 %v5403_v56, %v1245_v15 }
 0x2ac   : > { %v1602_v63 = vadd.f32 %v1601_v35, %v5242_v42  ;;  %2216 = vmatmul.f32.gmra.mxu2 %v2128_v5  ;;  %v645_v42 = vmul.f32 %v5299_v41, %v558_v59  ;;  %v7088_v5 = vld [vmem:[#allocation82_spill] sm:$0xff] }
 0x2ad   : > { %v1439_v59 = vld [vmem:[#allocation2 + $0x778] sm:$0xff] }
 0x2ae   : > { %v1692_v12 = vmul.f32 %v5421_v6, %v1602_v63  ;;  %v5525_v43 = vpop.f32.mrf.mxu0  ;;  %v1005_v13 = vadd.f32 %v973_v16, %v645_v42  ;;  %v888_v63 = vadd.f32 %v7088_v5, %v7087_v50  ;;  %v7092_v16 = vld [vmem:[#allocation80_spill] sm:$0xff]  ;;  %v1799_v5 = vld [vmem:[#allocation2 + $0x978] sm:$0xff] }
 0x2af   : > { %7084 = vst [vmem:[#allocation15_spill] sm:$0xff] %v5525_v43  ;;  %v5527_v23 = vpop.f32.mrf.mxu1  ;;  %v5529_v27 = vpop.f32.mrf.mxu2 }
 0x2b0   : > { %7085 = vst [vmem:[#allocation67_spill] sm:$0xff] %v5527_v23  ;;  %v5532_v35 = vadd.f32 %v1692_v12, %v1364_v28  ;;  %1651 = vmatmul.f32.gmra.mxu3 %v1437_v8  ;;  %v561_v23 = vadd.f32 %v7090_v32, %v7089_v55  ;;  %v1365_v28 = vadd.f32 %v1333_v54, %v1005_v13  ;;  %v7091_v12 = vld [vmem:[#allocation79_spill] sm:$0xff] }
 0x2b1   : > { %1898 = vmatmul.f32.gmra.mxu0 %v1796_v20  ;;  %v974_v8 = vmul.f32 %v5304_v44, %v888_v63  ;;  %v1248_v20 = vadd.f32 %v7092_v16, %v7091_v12  ;;  %v7096_v63 = vld [vmem:[#allocation56_spill] sm:$0xff]  ;;  %v2132_v32 = vld [vmem:[#allocation2 + $0xaa0] sm:$0xff]  ;;  %v7098_v12 = vld [vmem:[#allocation22_spill] sm:$0xff] }
 0x2b2   : > { %7086 = vst [vmem:[#allocation68_spill] sm:$0xff] %v5532_v35  ;;  %2011 = vmatmul.f32.gmra.mxu1 %v1797_v22  ;;  %v1798_v22 = vld [vmem:[#allocation2 + $0x970] sm:$0xff]  ;;  %v7099_v16 = vld [vmem:[#allocation23_spill] sm:$0xff] }
 0x2b3   : > { %v1604_v38 = vpop.f32.mrf.mxu3  ;;  %v1334_v54 = vmul.f32 %v5403_v56, %v1248_v20 }
 0x2b4   : > { %v1605_v43 = vadd.f32 %v1604_v38, %v5257_v7  ;;  %2219 = vmatmul.f32.gmra.mxu2 %v2130_v17  ;;  %v646_v7 = vmul.f32 %v5299_v41, %v561_v23  ;;  %v7097_v17 = vld [vmem:[#allocation86_spill] sm:$0xff]  ;;  %v1441_v23 = vld [vmem:[#allocation2 + $0x788] sm:$0xff] }
 0x2b6   : > { %v1693_v15 = vmul.f32 %v5421_v6, %v1605_v43  ;;  %v5544_v42 = vpop.f32.mrf.mxu0  ;;  %v1006_v13 = vadd.f32 %v974_v8, %v646_v7  ;;  %v891_v43 = vadd.f32 %v7097_v17, %v7096_v63  ;;  %v7101_v8 = vld [vmem:[#allocation84_spill] sm:$0xff] }
 0x2b7   : > { %7093 = vst [vmem:[#allocation47_spill] sm:$0xff] %v5544_v42  ;;  %v5546_v50 = vpop.f32.mrf.mxu1  ;;  %v5548_v35 = vpop.f32.mrf.mxu2  ;;  %v1801_v17 = vld [vmem:[#allocation2 + $0x988] sm:$0xff] }
 0x2b8   : > { %7094 = vst [vmem:[#allocation74_spill] sm:$0xff] %v5546_v50  ;;  %v5551_v38 = vadd.f32 %v1693_v15, %v1365_v28  ;;  %1654 = vmatmul.f32.gmra.mxu3 %v1439_v59  ;;  %v564_v50 = vadd.f32 %v7099_v16, %v7098_v12  ;;  %v1366_v28 = vadd.f32 %v1334_v54, %v1006_v13  ;;  %v7100_v15 = vld [vmem:[#allocation83_spill] sm:$0xff]  ;;  %v2134_v16 = vld [vmem:[#allocation2 + $0xab0] sm:$0xff] }
 0x2b9   : > { %1901 = vmatmul.f32.gmra.mxu0 %v1798_v22  ;;  %v975_v59 = vmul.f32 %v5304_v44, %v891_v43  ;;  %v1251_v22 = vadd.f32 %v7101_v8, %v7100_v15  ;;  %v7105_v43 = vld [vmem:[#allocation59_spill] sm:$0xff]  ;;  %v7107_v15 = vld [vmem:[#allocation24_spill] sm:$0xff]  ;;  %v7108_v8 = vld [vmem:[#allocation25_spill] sm:$0xff] }
 0x2ba   : > { %7095 = vst [vmem:[#allocation16_spill] sm:$0xff] %v5551_v38  ;;  %2014 = vmatmul.f32.gmra.mxu1 %v1799_v5  ;;  %v1800_v5 = vld [vmem:[#allocation2 + $0x980] sm:$0xff] }
 0x2bb   : > { %v1607_v55 = vpop.f32.mrf.mxu3  ;;  %v1335_v54 = vmul.f32 %v5403_v56, %v1251_v22 }
 0x2bc   : > { %v1608_v42 = vadd.f32 %v1607_v55, %v5270_v9  ;;  %2222 = vmatmul.f32.gmra.mxu2 %v2132_v32  ;;  %v647_v9 = vmul.f32 %v5299_v41, %v564_v50  ;;  %v7106_v32 = vld [vmem:[#allocation90_spill] sm:$0xff] }
 0x2bd   : > { %v1443_v50 = vld [vmem:[#allocation2 + $0x798] sm:$0xff] }
 0x2be   : > { %v1694_v20 = vmul.f32 %v5421_v6, %v1608_v42  ;;  %v5563_v7 = vpop.f32.mrf.mxu0  ;;  %v1007_v13 = vadd.f32 %v975_v59, %v647_v9  ;;  %v894_v42 = vadd.f32 %v7106_v32, %v7105_v43  ;;  %v7110_v59 = vld [vmem:[#allocation88_spill] sm:$0xff]  ;;  %v1803_v32 = vld [vmem:[#allocation2 + $0x998] sm:$0xff] }
 0x2bf   : > { %7102 = vst [vmem:[#allocation17_spill] sm:$0xff] %v5563_v7  ;;  %v5565_v63 = vpop.f32.mrf.mxu1  ;;  %v5567_v38 = vpop.f32.mrf.mxu2 }
 0x2c0   : > { %7103 = vst [vmem:[#allocation71_spill] sm:$0xff] %v5565_v63  ;;  %v5570_v55 = vadd.f32 %v1694_v20, %v1366_v28  ;;  %1657 = vmatmul.f32.gmra.mxu3 %v1441_v23  ;;  %v567_v63 = vadd.f32 %v7108_v8, %v7107_v15  ;;  %v1367_v28 = vadd.f32 %v1335_v54, %v1007_v13  ;;  %v7109_v20 = vld [vmem:[#allocation87_spill] sm:$0xff] }
 0x2c1   : > { %1904 = vmatmul.f32.gmra.mxu0 %v1800_v5  ;;  %v976_v23 = vmul.f32 %v5304_v44, %v894_v42  ;;  %v1254_v5 = vadd.f32 %v7110_v59, %v7109_v20  ;;  %v7114_v42 = vld [vmem:[#allocation60_spill] sm:$0xff]  ;;  %v2136_v8 = vld [vmem:[#allocation2 + $0xac0] sm:$0xff]  ;;  %v7116_v20 = vld [vmem:[#allocation26_spill] sm:$0xff] }
 0x2c2   : > { %7104 = vst [vmem:[#allocation72_spill] sm:$0xff] %v5570_v55  ;;  %2017 = vmatmul.f32.gmra.mxu1 %v1801_v17  ;;  %v1802_v17 = vld [vmem:[#allocation2 + $0x990] sm:$0xff]  ;;  %v7117_v59 = vld [vmem:[#allocation27_spill] sm:$0xff] }
 0x2c3   : > { %v1610_v12 = vpop.f32.mrf.mxu3  ;;  %v1336_v54 = vmul.f32 %v5403_v56, %v1254_v5 }
 0x2c4   : > { %v1611_v7 = vadd.f32 %v1610_v12, %v5278_v47  ;;  %2225 = vmatmul.f32.gmra.mxu2 %v2134_v16  ;;  %v648_v47 = vmul.f32 %v5299_v41, %v567_v63  ;;  %v7115_v16 = vld [vmem:[#allocation94_spill] sm:$0xff]  ;;  %v1445_v63 = vld [vmem:[#allocation2 + $0x7a8] sm:$0xff] }
 0x2c6   : > { %v1695_v22 = vmul.f32 %v5421_v6, %v1611_v7  ;;  %v5582_v9 = vpop.f32.mrf.mxu0  ;;  %v1008_v13 = vadd.f32 %v976_v23, %v648_v47  ;;  %v897_v7 = vadd.f32 %v7115_v16, %v7114_v42  ;;  %v7119_v23 = vld [vmem:[#allocation92_spill] sm:$0xff] }
 0x2c7   : > { %7111 = vst [vmem:[#allocation50_spill] sm:$0xff] %v5582_v9  ;;  %v5584_v43 = vpop.f32.mrf.mxu1  ;;  %v5586_v55 = vpop.f32.mrf.mxu2  ;;  %v1805_v16 = vld [vmem:[#allocation2 + $0x9a8] sm:$0xff] }
 0x2c8   : > { %7112 = vst [vmem:[#allocation78_spill] sm:$0xff] %v5584_v43  ;;  %v5589_v12 = vadd.f32 %v1695_v22, %v1367_v28  ;;  %1660 = vmatmul.f32.gmra.mxu3 %v1443_v50  ;;  %v570_v43 = vadd.f32 %v7117_v59, %v7116_v20  ;;  %v1368_v28 = vadd.f32 %v1336_v54, %v1008_v13  ;;  %v7118_v22 = vld [vmem:[#allocation91_spill] sm:$0xff]  ;;  %v2138_v59 = vld [vmem:[#allocation2 + $0xad0] sm:$0xff] }
 0x2c9   : > { %1907 = vmatmul.f32.gmra.mxu0 %v1802_v17  ;;  %v977_v50 = vmul.f32 %v5304_v44, %v897_v7  ;;  %v1257_v17 = vadd.f32 %v7119_v23, %v7118_v22  ;;  %v7123_v7 = vld [vmem:[#allocation61_spill] sm:$0xff]  ;;  %v7125_v22 = vld [vmem:[#allocation28_spill] sm:$0xff] }
 0x2ca   : > { %7113 = vst [vmem:[#allocation18_spill] sm:$0xff] %v5589_v12  ;;  %2020 = vmatmul.f32.gmra.mxu1 %v1803_v32  ;;  %v1804_v32 = vld [vmem:[#allocation2 + $0x9a0] sm:$0xff]  ;;  %v7126_v23 = vld [vmem:[#allocation29_spill] sm:$0xff] }
 0x2cb   : > { %v1613_v15 = vpop.f32.mrf.mxu3  ;;  %v1337_v54 = vmul.f32 %v5403_v56, %v1257_v17 }
 0x2cc   : > { %v1614_v9 = vadd.f32 %v1613_v15, %v5286_v37  ;;  %2228 = vmatmul.f32.gmra.mxu2 %v2136_v8  ;;  %v649_v37 = vmul.f32 %v5299_v41, %v570_v43  ;;  %v7124_v8 = vld [vmem:[#allocation98_spill] sm:$0xff] }
 0x2cd   : > { %v1447_v43 = vld [vmem:[#allocation2 + $0x7b8] sm:$0xff] }
 0x2ce   : > { %v1696_v5 = vmul.f32 %v5421_v6, %v1614_v9  ;;  %v5601_v47 = vpop.f32.mrf.mxu0  ;;  %v1009_v13 = vadd.f32 %v977_v50, %v649_v37  ;;  %v900_v9 = vadd.f32 %v7124_v8, %v7123_v7  ;;  %v7128_v50 = vld [vmem:[#allocation96_spill] sm:$0xff]  ;;  %v1807_v8 = vld [vmem:[#allocation2 + $0x9b8] sm:$0xff] }
 0x2cf   : > { %7120 = vst [vmem:[#allocation19_spill] sm:$0xff] %v5601_v47  ;;  %v5603_v42 = vpop.f32.mrf.mxu1  ;;  %v5605_v12 = vpop.f32.mrf.mxu2 }
 0x2d0   : > { %7121 = vst [vmem:[#allocation75_spill] sm:$0xff] %v5603_v42  ;;  %v5608_v15 = vadd.f32 %v1696_v5, %v1368_v28  ;;  %1663 = vmatmul.f32.gmra.mxu3 %v1445_v63  ;;  %v573_v42 = vadd.f32 %v7126_v23, %v7125_v22  ;;  %v1369_v28 = vadd.f32 %v1337_v54, %v1009_v13  ;;  %v7127_v5 = vld [vmem:[#allocation95_spill] sm:$0xff] }
 0x2d1   : > { %1910 = vmatmul.f32.gmra.mxu0 %v1804_v32  ;;  %v978_v63 = vmul.f32 %v5304_v44, %v900_v9  ;;  %v1260_v32 = vadd.f32 %v7128_v50, %v7127_v5  ;;  %v7132_v9 = vld [vmem:[#allocation62_spill] sm:$0xff]  ;;  %v2140_v23 = vld [vmem:[#allocation2 + $0xae0] sm:$0xff] }
 0x2d2   : > { %7122 = vst [vmem:[#allocation76_spill] sm:$0xff] %v5608_v15  ;;  %2023 = vmatmul.f32.gmra.mxu1 %v1805_v16  ;;  %v1806_v16 = vld [vmem:[#allocation2 + $0x9b0] sm:$0xff]  ;;  %v7134_v5 = vld [vmem:[#allocation30_spill] sm:$0xff]  ;;  %v7135_v50 = vld [vmem:[#allocation31_spill] sm:$0xff] }
 0x2d3   : > { %v1616_v20 = vpop.f32.mrf.mxu3  ;;  %v1338_v54 = vmul.f32 %v5403_v56, %v1260_v32 }
 0x2d4   : > { %v1617_v47 = vadd.f32 %v1616_v20, %v5294_v48  ;;  %2231 = vmatmul.f32.gmra.mxu2 %v2138_v59  ;;  %v650_v48 = vmul.f32 %v5299_v41, %v573_v42  ;;  %v7133_v59 = vld [vmem:[#allocation102_spill] sm:$0xff]  ;;  %v1449_v42 = vld [vmem:[#allocation2 + $0x7c8] sm:$0xff] }
 0x2d6   : > { %v1697_v17 = vmul.f32 %v5421_v6, %v1617_v47  ;;  %v5620_v37 = vpop.f32.mrf.mxu0  ;;  %v1010_v13 = vadd.f32 %v978_v63, %v650_v48  ;;  %v903_v47 = vadd.f32 %v7133_v59, %v7132_v9  ;;  %v7137_v63 = vld [vmem:[#allocation100_spill] sm:$0xff] }
 0x2d7   : > { %7129 = vst [vmem:[#allocation53_spill] sm:$0xff] %v5620_v37  ;;  %v5622_v7 = vpop.f32.mrf.mxu1  ;;  %v5624_v15 = vpop.f32.mrf.mxu2  ;;  %v1809_v59 = vld [vmem:[#allocation2 + $0x9c8] sm:$0xff] }
 0x2d8   : > { %7130 = vst [vmem:[#allocation82_spill] sm:$0xff] %v5622_v7  ;;  %v5627_v20 = vadd.f32 %v1697_v17, %v1369_v28  ;;  %1666 = vmatmul.f32.gmra.mxu3 %v1447_v43  ;;  %v576_v7 = vadd.f32 %v7135_v50, %v7134_v5  ;;  %v1370_v28 = vadd.f32 %v1338_v54, %v1010_v13  ;;  %v7136_v17 = vld [vmem:[#allocation99_spill] sm:$0xff]  ;;  %v2142_v50 = vld [vmem:[#allocation2 + $0xaf0] sm:$0xff] }
 0x2d9   : > { %1913 = vmatmul.f32.gmra.mxu0 %v1806_v16  ;;  %v979_v43 = vmul.f32 %v5304_v44, %v903_v47  ;;  %v1263_v16 = vadd.f32 %v7137_v63, %v7136_v17  ;;  %v7141_v47 = vld [vmem:[#allocation65_spill] sm:$0xff]  ;;  %v7143_v17 = vld [vmem:[#allocation32_spill] sm:$0xff] }
 0x2da   : > { %7131 = vst [vmem:[#allocation20_spill] sm:$0xff] %v5627_v20  ;;  %2026 = vmatmul.f32.gmra.mxu1 %v1807_v8  ;;  %v1808_v8 = vld [vmem:[#allocation2 + $0x9c0] sm:$0xff]  ;;  %v7144_v63 = vld [vmem:[#allocation33_spill] sm:$0xff] }
 0x2db   : > { %v1619_v22 = vpop.f32.mrf.mxu3  ;;  %v1339_v54 = vmul.f32 %v5403_v56, %v1263_v16 }
 0x2dc   : > { %v1620_v37 = vadd.f32 %v1619_v22, %v5314_v58  ;;  %2234 = vmatmul.f32.gmra.mxu2 %v2140_v23  ;;  %v651_v58 = vmul.f32 %v5299_v41, %v576_v7  ;;  %v7142_v23 = vld [vmem:[#allocation106_spill] sm:$0xff] }
 0x2dd   : > { %v1451_v7 = vld [vmem:[#allocation2 + $0x7d8] sm:$0xff] }
 0x2de   : > { %v1698_v32 = vmul.f32 %v5421_v6, %v1620_v37  ;;  %v5639_v48 = vpop.f32.mrf.mxu0  ;;  %v1011_v13 = vadd.f32 %v979_v43, %v651_v58  ;;  %v906_v37 = vadd.f32 %v7142_v23, %v7141_v47  ;;  %v7146_v43 = vld [vmem:[#allocation104_spill] sm:$0xff]  ;;  %v1811_v23 = vld [vmem:[#allocation2 + $0x9d8] sm:$0xff] }
 0x2df   : > { %7138 = vst [vmem:[#allocation21_spill] sm:$0xff] %v5639_v48  ;;  %v5641_v9 = vpop.f32.mrf.mxu1  ;;  %v5643_v20 = vpop.f32.mrf.mxu2 }
 0x2e0   : > { %7139 = vst [vmem:[#allocation79_spill] sm:$0xff] %v5641_v9  ;;  %v5646_v22 = vadd.f32 %v1698_v32, %v1370_v28  ;;  %1669 = vmatmul.f32.gmra.mxu3 %v1449_v42  ;;  %v579_v9 = vadd.f32 %v7144_v63, %v7143_v17  ;;  %v1371_v28 = vadd.f32 %v1339_v54, %v1011_v13  ;;  %v7145_v32 = vld [vmem:[#allocation103_spill] sm:$0xff] }
 0x2e1   : > { %1916 = vmatmul.f32.gmra.mxu0 %v1808_v8  ;;  %v980_v42 = vmul.f32 %v5304_v44, %v906_v37  ;;  %v1266_v8 = vadd.f32 %v7146_v43, %v7145_v32  ;;  %v7150_v37 = vld [vmem:[#allocation69_spill] sm:$0xff]  ;;  %v2144_v63 = vld [vmem:[#allocation2 + $0xb00] sm:$0xff]  ;;  %v7152_v32 = vld [vmem:[#allocation34_spill] sm:$0xff] }
 0x2e2   : > { %7140 = vst [vmem:[#allocation80_spill] sm:$0xff] %v5646_v22  ;;  %2029 = vmatmul.f32.gmra.mxu1 %v1809_v59  ;;  %v1810_v59 = vld [vmem:[#allocation2 + $0x9d0] sm:$0xff]  ;;  %v7153_v43 = vld [vmem:[#allocation35_spill] sm:$0xff] }
 0x2e3   : > { %v1622_v5 = vpop.f32.mrf.mxu3  ;;  %v1340_v54 = vmul.f32 %v5403_v56, %v1266_v8 }
 0x2e4   : > { %v1623_v48 = vadd.f32 %v1622_v5, %v5326_v21  ;;  %2237 = vmatmul.f32.gmra.mxu2 %v2142_v50  ;;  %v652_v21 = vmul.f32 %v5299_v41, %v579_v9  ;;  %v7151_v50 = vld [vmem:[#allocation109_spill] sm:$0xff]  ;;  %v1453_v9 = vld [vmem:[#allocation2 + $0x7e8] sm:$0xff] }
 0x2e6   : > { %v1699_v16 = vmul.f32 %v5421_v6, %v1623_v48  ;;  %v5658_v58 = vpop.f32.mrf.mxu0  ;;  %v1012_v13 = vadd.f32 %v980_v42, %v652_v21  ;;  %v909_v48 = vadd.f32 %v7151_v50, %v7150_v37  ;;  %v7155_v42 = vld [vmem:[#allocation108_spill] sm:$0xff] }
 0x2e7   : > { %7147 = vst [vmem:[#allocation56_spill] sm:$0xff] %v5658_v58  ;;  %v5660_v47 = vpop.f32.mrf.mxu1  ;;  %v5662_v22 = vpop.f32.mrf.mxu2  ;;  %v1813_v50 = vld [vmem:[#allocation2 + $0x9e8] sm:$0xff] }
 0x2e8   : > { %7148 = vst [vmem:[#allocation86_spill] sm:$0xff] %v5660_v47  ;;  %v5665_v5 = vadd.f32 %v1699_v16, %v1371_v28  ;;  %1672 = vmatmul.f32.gmra.mxu3 %v1451_v7  ;;  %v582_v47 = vadd.f32 %v7153_v43, %v7152_v32  ;;  %v1372_v28 = vadd.f32 %v1340_v54, %v1012_v13  ;;  %v7154_v16 = vld [vmem:[#allocation107_spill] sm:$0xff]  ;;  %v2146_v32 = vld [vmem:[#allocation2 + $0xb10] sm:$0xff]  ;;  %v7159_v43 = vld [vmem:[#allocation36_spill] sm:$0xff] }
 0x2e9   : > { %1919 = vmatmul.f32.gmra.mxu0 %v1810_v59  ;;  %v981_v7 = vmul.f32 %v5304_v44, %v909_v48  ;;  %v1269_v59 = vadd.f32 %v7155_v42, %v7154_v16  ;;  %v7158_v48 = vld [vmem:[#allocation73_spill] sm:$0xff] }
 0x2ea   : > { %7149 = vst [vmem:[#allocation22_spill] sm:$0xff] %v5665_v5  ;;  %2032 = vmatmul.f32.gmra.mxu1 %v1811_v23  ;;  %v1812_v23 = vld [vmem:[#allocation2 + $0x9e0] sm:$0xff]  ;;  %v7160_v16 = vld [vmem:[#allocation37_spill] sm:$0xff] }
 0x2eb   : > { %v1625_v17 = vpop.f32.mrf.mxu3  ;;  %v1341_v54 = vmul.f32 %v5403_v56, %v1269_v59  ;;  %v585_v42 = vadd.f32 %v7160_v16, %v7159_v43  ;;  %v2148_v43 = vld [vmem:[#allocation2 + $0xb20] sm:$0xff]  ;;  %v7166_v16 = vld [vmem:[#allocation38_spill] sm:$0xff] }
 0x2ec   : > { %v1626_v58 = vadd.f32 %v1625_v17, %v5338_v60  ;;  %2240 = vmatmul.f32.gmra.mxu2 %v2144_v63  ;;  %v653_v60 = vmul.f32 %v5299_v41, %v582_v47  ;;  %v1455_v47 = vld [vmem:[#allocation2 + $0x7f8] sm:$0xff] }
 0x2ee   : > { %v1700_v8 = vmul.f32 %v5421_v6, %v1626_v58  ;;  %v5677_v21 = vpop.f32.mrf.mxu0  ;;  %v1013_v13 = vadd.f32 %v981_v7, %v653_v60  ;;  %v912_v58 = vadd.f32 %v5192_v49, %v7158_v48  ;;  %v7162_v7 = vld [vmem:[#allocation111_spill] sm:$0xff]  ;;  %v1814_v49 = vld [vmem:[#allocation2 + $0x9f0] sm:$0xff]  ;;  %v1815_v48 = vld [vmem:[#allocation2 + $0x9f8] sm:$0xff] }
 0x2ef   : > { %7156 = vst [vmem:[#allocation23_spill] sm:$0xff] %v5677_v21  ;;  %v5679_v37 = vpop.f32.mrf.mxu1  ;;  %v5681_v5 = vpop.f32.mrf.mxu2 }
 0x2f0   : > { %7157 = vst [vmem:[#allocation83_spill] sm:$0xff] %v5679_v37  ;;  %v5684_v17 = vadd.f32 %v1700_v8, %v1372_v28  ;;  %1675 = vmatmul.f32.gmra.mxu3 %v1453_v9  ;;  %v1373_v28 = vadd.f32 %v1341_v54, %v1013_v13  ;;  %v982_v9 = vmul.f32 %v5304_v44, %v912_v58  ;;  %v7161_v8 = vld [vmem:[#allocation110_spill] sm:$0xff]  ;;  %v7165_v58 = vld [vmem:[#allocation77_spill] sm:$0xff] }
 0x2f1   : > { %1922 = vmatmul.f32.gmra.mxu0 %v1812_v23  ;;  %v1272_v23 = vadd.f32 %v7162_v7, %v7161_v8  ;;  %v7167_v8 = vld [vmem:[#allocation39_spill] sm:$0xff] }
 0x2f2   : > { %2035 = vmatmul.f32.gmra.mxu1 %v1813_v50  ;;  %v588_v7 = vadd.f32 %v7167_v8, %v7166_v16  ;;  %v2150_v16 = vld [vmem:[#allocation2 + $0xb30] sm:$0xff]  ;;  %v7175_v8 = vld [vmem:[#allocation40_spill] sm:$0xff] }
 0x2f3   : > { %v1628_v63 = vpop.f32.mrf.mxu3  ;;  %v1342_v54 = vmul.f32 %v5403_v56, %v1272_v23 }
 0x2f4   : > { %v1629_v37 = vadd.f32 %v1628_v63, %v5350_v3  ;;  %2243 = vmatmul.f32.gmra.mxu2 %v2146_v32  ;;  %v654_v3 = vmul.f32 %v5299_v41, %v585_v42  ;;  %v2113_v42 = vld [vmem:[#allocation2 + $0xa08] sm:$0xff] }
 0x2f6   : > { %v1701_v59 = vmul.f32 %v5421_v6, %v1629_v37  ;;  %v5696_v60 = vpop.f32.mrf.mxu0  ;;  %v1014_v13 = vadd.f32 %v982_v9, %v654_v3  ;;  %v915_v37 = vadd.f32 %v5202_v62, %v7165_v58  ;;  %v7169_v9 = vld [vmem:[#allocation113_spill] sm:$0xff]  ;;  %v2472_v62 = vld [vmem:[#allocation2 + $0xc00] sm:$0xff]  ;;  %v2473_v58 = vld [vmem:[#allocation2 + $0xc08] sm:$0xff] }
 0x2f7   : > { %7163 = vst [vmem:[#allocation84_spill] sm:$0xff] %v5696_v60  ;;  %v5698_v50 = vpop.f32.mrf.mxu1  ;;  %v5700_v21 = vpop.f32.mrf.mxu2 }
 0x2f8   : > { %7164 = vst [vmem:[#allocation59_spill] sm:$0xff] %v5698_v50  ;;  %v5703_v63 = vadd.f32 %v1701_v59, %v1373_v28  ;;  %1678 = vmatmul.f32.gmra.mxu3 %v1455_v47  ;;  %v1374_v28 = vadd.f32 %v1342_v54, %v1014_v13  ;;  %v983_v47 = vmul.f32 %v5304_v44, %v915_v37  ;;  %v7168_v59 = vld [vmem:[#allocation112_spill] sm:$0xff]  ;;  %v7173_v54 = vld [vmem:[#allocation81_spill] sm:$0xff] }
 0x2f9   : > { %1925 = vmatmul.f32.gmra.mxu0 %v1814_v49  ;;  %v1275_v49 = vadd.f32 %v7169_v9, %v7168_v59  ;;  %v7174_v37 = vld [vmem:[#allocation116_spill] sm:$0xff]  ;;  %v7176_v59 = vld [vmem:[#allocation41_spill] sm:$0xff] }
 0x2fa   : > { %2038 = vmatmul.f32.gmra.mxu1 %v1815_v48  ;;  %v591_v9 = vadd.f32 %v7176_v59, %v7175_v8  ;;  %v7183_v8 = vld [vmem:[#allocation119_spill] sm:$0xff] }
 0x2fb   : > { %v1631_v32 = vpop.f32.mrf.mxu3  ;;  %v1343_v13 = vmul.f32 %v5403_v56, %v1275_v49  ;;  %v7178_v49 = vld [vmem:[#allocation115_spill] sm:$0xff] }
 0x2fc   : > { %v1632_v50 = vadd.f32 %v1631_v32, %v5362_v11  ;;  %2246 = vmatmul.f32.gmra.mxu2 %v2148_v43  ;;  %v655_v11 = vmul.f32 %v5299_v41, %v588_v7  ;;  %v2115_v41 = vld [vmem:[#allocation2 + $0xa18] sm:$0xff] }
 0x2fe   : > { %v1702_v23 = vmul.f32 %v5421_v6, %v1632_v50  ;;  %v5715_v3 = vpop.f32.mrf.mxu0  ;;  %v1015_v44 = vadd.f32 %v983_v47, %v655_v11  ;;  %v918_v50 = vadd.f32 %v7174_v37, %v7173_v54  ;;  %v7177_v47 = vld [vmem:[#allocation114_spill] sm:$0xff]  ;;  %v2474_v11 = vld [vmem:[#allocation2 + $0xc10] sm:$0xff] }
 0x2ff   : > { %7170 = vst [vmem:[#allocation90_spill] sm:$0xff] %v5715_v3  ;;  %v5717_v48 = vpop.f32.mrf.mxu1  ;;  %v5719_v60 = vpop.f32.mrf.mxu2 }
 0x300   : > { %7171 = vst [vmem:[#allocation24_spill] sm:$0xff] %v5717_v48  ;;  %v5722_v32 = vadd.f32 %v1702_v23, %v1374_v28  ;;  %2305 = vmatmul.f32.vlgmr.msrb.gmra.mxu3 %v2113_v42  ;;  %v1375_v7 = vadd.f32 %v1343_v13, %v1015_v44  ;;  %v5733_v42 = vld [vmem:[%s6908_s2 + $0x1] ss:$0 sm:$0xff]  ;;  %v1278_v23 = vadd.f32 %v7178_v49, %v7177_v47  ;;  %v5748_v44 = vld [vmem:[%s6908_s2] ss:$0 sm:$0xff] }
 0x301   : > { %2552 = vmatmul.f32.vlgmr.msrb.gmra.mxu0 %v2472_v62  ;;  %v984_v28 = vmul.f32 %v5733_v42, %v918_v50  ;;  %v656_v13 = vmul.f32 %v5748_v44, %v591_v9  ;;  %v2152_v49 = vld [vmem:[#allocation2 + $0xb40] sm:$0xff]  ;;  %v2117_v9 = vld [vmem:[#allocation2 + $0xa28] sm:$0xff] }
 0x302   : > { %7172 = vst [vmem:[#allocation25_spill] sm:$0xff] %v5722_v32  ;;  %2665 = vmatmul.f32.vlgmr.msrb.gmra.mxu1 %v2473_v58 }
 0x303   : > { %v1634_v43 = vpop.f32.mrf.mxu3 }
 0x304   : > { %v1635_v48 = vadd.f32 %v1634_v43, %v5374_v18  ;;  %2249 = vmatmul.f32.gmra.mxu2 %v2150_v16  ;;  %v2475_v18 = vld [vmem:[#allocation2 + $0xc18] sm:$0xff]  ;;  %v1344_v43 = vmul.f32 %v5403_v56, %v1278_v23  ;;  %v7182_v16 = vld [vmem:[#allocation85_spill] sm:$0xff] }
 0x305   : > { %v921_v59 = vadd.f32 %v7183_v8, %v7182_v16  ;;  %v2477_v8 = vld [vmem:[#allocation2 + $0xc28] sm:$0xff] }
 0x306   : > { %v1703_v62 = vmul.f32 %v5421_v6, %v1635_v48  ;;  %v5739_v58 = vpop.f32.mrf.mxu0  ;;  %v1016_v48 = vadd.f32 %v984_v28, %v656_v13  ;;  %v7187_v28 = vld [vmem:[#allocation118_spill] sm:$0xff] }
 0x307   : > { %7179 = vst [vmem:[#allocation87_spill] sm:$0xff] %v5739_v58  ;;  %v5741_v54 = vpop.f32.mrf.mxu1  ;;  %v5743_v37 = vpop.f32.mrf.mxu2  ;;  %v7185_v58 = vld [vmem:[#allocation43_spill] sm:$0xff] }
 0x308   : > { %7180 = vst [vmem:[#allocation88_spill] sm:$0xff] %v5741_v54  ;;  %v5751_v50 = vadd.f32 %v1703_v62, %v1375_v7  ;;  %2308 = vmatmul.f32.gmra.mxu3 %v2115_v41  ;;  %v7184_v54 = vld [vmem:[#allocation42_spill] sm:$0xff]  ;;  %v1376_v7 = vadd.f32 %v1344_v43, %v1016_v48  ;;  %v985_v41 = vmul.f32 %v5733_v42, %v921_v59  ;;  %v7186_v62 = vld [vmem:[#allocation117_spill] sm:$0xff] }
 0x309   : > { %2555 = vmatmul.f32.gmra.mxu0 %v2474_v11  ;;  %v594_v3 = vadd.f32 %v7185_v58, %v7184_v54  ;;  %v1281_v11 = vadd.f32 %v7187_v28, %v7186_v62  ;;  %v7191_v43 = vld [vmem:[#allocation89_spill] sm:$0xff]  ;;  %v7192_v59 = vld [vmem:[#allocation122_spill] sm:$0xff] }
 0x30a   : > { %7181 = vst [vmem:[#allocation60_spill] sm:$0xff] %v5751_v50  ;;  %2668 = vmatmul.f32.gmra.mxu1 %v2475_v18  ;;  %v2476_v18 = vld [vmem:[#allocation2 + $0xc20] sm:$0xff]  ;;  %v7193_v62 = vld [vmem:[#allocation45_spill] sm:$0xff]  ;;  %v7194_v28 = vld [vmem:[#allocation46_spill] sm:$0xff] }
 0x30b   : > { %v1637_v47 = vpop.f32.mrf.mxu3  ;;  %v1345_v48 = vmul.f32 %v5403_v56, %v1281_v11 }
 0x30c   : > { %v1638_v32 = vadd.f32 %v1637_v47, %v5386_v25  ;;  %2252 = vmatmul.f32.gmra.mxu2 %v2152_v49  ;;  %v657_v25 = vmul.f32 %v5748_v44, %v594_v3  ;;  %v2154_v49 = vld [vmem:[#allocation2 + $0xb50] sm:$0xff]  ;;  %v2119_v3 = vld [vmem:[#allocation2 + $0xa38] sm:$0xff] }
 0x30e   : > { %v1704_v23 = vmul.f32 %v5421_v6, %v1638_v32  ;;  %v5763_v13 = vpop.f32.mrf.mxu0  ;;  %v1017_v54 = vadd.f32 %v985_v41, %v657_v25  ;;  %v924_v32 = vadd.f32 %v7192_v59, %v7191_v43  ;;  %v7196_v41 = vld [vmem:[#allocation121_spill] sm:$0xff]  ;;  %v2479_v59 = vld [vmem:[#allocation2 + $0xc38] sm:$0xff] }
 0x30f   : > { %7188 = vst [vmem:[#allocation94_spill] sm:$0xff] %v5763_v13  ;;  %v5765_v16 = vpop.f32.mrf.mxu1  ;;  %v5767_v50 = vpop.f32.mrf.mxu2 }
 0x310   : > { %7189 = vst [vmem:[#allocation26_spill] sm:$0xff] %v5765_v16  ;;  %v5770_v58 = vadd.f32 %v1704_v23, %v1376_v7  ;;  %2311 = vmatmul.f32.gmra.mxu3 %v2117_v9  ;;  %v597_v16 = vadd.f32 %v7194_v28, %v7193_v62  ;;  %v1377_v7 = vadd.f32 %v1345_v48, %v1017_v54  ;;  %v7195_v23 = vld [vmem:[#allocation120_spill] sm:$0xff]  ;;  %v2156_v28 = vld [vmem:[#allocation2 + $0xb60] sm:$0xff] }
 0x311   : > { %2558 = vmatmul.f32.gmra.mxu0 %v2476_v18  ;;  %v986_v9 = vmul.f32 %v5733_v42, %v924_v32  ;;  %v1284_v18 = vadd.f32 %v7196_v41, %v7195_v23  ;;  %v7200_v32 = vld [vmem:[#allocation93_spill] sm:$0xff]  ;;  %v7202_v23 = vld [vmem:[#allocation48_spill] sm:$0xff] }
 0x312   : > { %7190 = vst [vmem:[#allocation27_spill] sm:$0xff] %v5770_v58  ;;  %2671 = vmatmul.f32.gmra.mxu1 %v2477_v8  ;;  %v2478_v8 = vld [vmem:[#allocation2 + $0xc30] sm:$0xff] }
 0x313   : > { %v1640_v47 = vpop.f32.mrf.mxu3  ;;  %v1346_v48 = vmul.f32 %v5403_v56, %v1284_v18  ;;  %v7203_v41 = vld [vmem:[#allocation49_spill] sm:$0xff] }
 0x314   : > { %v1641_v13 = vadd.f32 %v1640_v47, %v5410_v51  ;;  %2255 = vmatmul.f32.gmra.mxu2 %v2154_v49  ;;  %v658_v51 = vmul.f32 %v5748_v44, %v597_v16  ;;  %v7201_v49 = vld [vmem:[#allocation125_spill] sm:$0xff]  ;;  %v2121_v16 = vld [vmem:[#allocation2 + $0xa48] sm:$0xff] }
 0x316   : > { %v1705_v11 = vmul.f32 %v5421_v6, %v1641_v13  ;;  %v5782_v25 = vpop.f32.mrf.mxu0  ;;  %v1018_v54 = vadd.f32 %v986_v9, %v658_v51  ;;  %v927_v13 = vadd.f32 %v7201_v49, %v7200_v32  ;;  %v7205_v9 = vld [vmem:[#allocation124_spill] sm:$0xff] }
 0x317   : > { %7197 = vst [vmem:[#allocation91_spill] sm:$0xff] %v5782_v25  ;;  %v5784_v43 = vpop.f32.mrf.mxu1  ;;  %v5786_v58 = vpop.f32.mrf.mxu2  ;;  %v2481_v49 = vld [vmem:[#allocation2 + $0xc48] sm:$0xff] }
 0x318   : > { %7198 = vst [vmem:[#allocation92_spill] sm:$0xff] %v5784_v43  ;;  %v5789_v47 = vadd.f32 %v1705_v11, %v1377_v7  ;;  %2314 = vmatmul.f32.gmra.mxu3 %v2119_v3  ;;  %v600_v43 = vadd.f32 %v7203_v41, %v7202_v23  ;;  %v1378_v7 = vadd.f32 %v1346_v48, %v1018_v54  ;;  %v7204_v11 = vld [vmem:[#allocation123_spill] sm:$0xff]  ;;  %v2158_v41 = vld [vmem:[#allocation2 + $0xb70] sm:$0xff] }
 0x319   : > { %2561 = vmatmul.f32.gmra.mxu0 %v2478_v8  ;;  %v987_v3 = vmul.f32 %v5733_v42, %v927_v13  ;;  %v1287_v8 = vadd.f32 %v7205_v9, %v7204_v11  ;;  %v7209_v13 = vld [vmem:[#allocation97_spill] sm:$0xff]  ;;  %v7211_v11 = vld [vmem:[#allocation51_spill] sm:$0xff]  ;;  %v7212_v9 = vld [vmem:[#allocation52_spill] sm:$0xff] }
 0x31a   : > { %7199 = vst [vmem:[#allocation61_spill] sm:$0xff] %v5789_v47  ;;  %2674 = vmatmul.f32.gmra.mxu1 %v2479_v59  ;;  %v2480_v59 = vld [vmem:[#allocation2 + $0xc40] sm:$0xff] }
 0x31b   : > { %v1643_v62 = vpop.f32.mrf.mxu3  ;;  %v1347_v48 = vmul.f32 %v5403_v56, %v1287_v8 }
 0x31c   : > { %v1644_v25 = vadd.f32 %v1643_v62, %v5434_v29  ;;  %2258 = vmatmul.f32.gmra.mxu2 %v2156_v28  ;;  %v659_v29 = vmul.f32 %v5748_v44, %v600_v43  ;;  %v7210_v28 = vld [vmem:[#allocation128_spill] sm:$0xff]  ;;  %v2123_v43 = vld [vmem:[#allocation2 + $0xa58] sm:$0xff] }
 0x31e   : > { %v1706_v18 = vmul.f32 %v5421_v6, %v1644_v25  ;;  %v5801_v51 = vpop.f32.mrf.mxu0  ;;  %v1019_v54 = vadd.f32 %v987_v3, %v659_v29  ;;  %v930_v25 = vadd.f32 %v7210_v28, %v7209_v13  ;;  %v7214_v3 = vld [vmem:[#allocation127_spill] sm:$0xff]  ;;  %v2483_v28 = vld [vmem:[#allocation2 + $0xc58] sm:$0xff] }
 0x31f   : > { %7206 = vst [vmem:[#allocation98_spill] sm:$0xff] %v5801_v51  ;;  %v5803_v32 = vpop.f32.mrf.mxu1  ;;  %v5805_v47 = vpop.f32.mrf.mxu2 }
 0x320   : > { %7207 = vst [vmem:[#allocation28_spill] sm:$0xff] %v5803_v32  ;;  %v5808_v62 = vadd.f32 %v1706_v18, %v1378_v7  ;;  %2317 = vmatmul.f32.gmra.mxu3 %v2121_v16  ;;  %v603_v32 = vadd.f32 %v7212_v9, %v7211_v11  ;;  %v1379_v7 = vadd.f32 %v1347_v48, %v1019_v54  ;;  %v7213_v18 = vld [vmem:[#allocation126_spill] sm:$0xff]  ;;  %v2160_v9 = vld [vmem:[#allocation2 + $0xb80] sm:$0xff] }
 0x321   : > { %2564 = vmatmul.f32.gmra.mxu0 %v2480_v59  ;;  %v988_v16 = vmul.f32 %v5733_v42, %v930_v25  ;;  %v1290_v59 = vadd.f32 %v7214_v3, %v7213_v18  ;;  %v7217_v25 = vld [vmem:[#allocation101_spill] sm:$0xff]  ;;  %v7219_v18 = vld [vmem:[#allocation54_spill] sm:$0xff]  ;;  %v7220_v3 = vld [vmem:[#allocation55_spill] sm:$0xff] }
 0x322   : > { %7208 = vst [vmem:[#allocation29_spill] sm:$0xff] %v5808_v62  ;;  %2677 = vmatmul.f32.gmra.mxu1 %v2481_v49  ;;  %v2482_v49 = vld [vmem:[#allocation2 + $0xc50] sm:$0xff] }
 0x323   : > { %v1646_v23 = vpop.f32.mrf.mxu3  ;;  %v1348_v48 = vmul.f32 %v5403_v56, %v1290_v59 }
 0x324   : > { %v1647_v51 = vadd.f32 %v1646_v23, %v5453_v1  ;;  %2261 = vmatmul.f32.gmra.mxu2 %v2158_v41  ;;  %v660_v1 = vmul.f32 %v5748_v44, %v603_v32  ;;  %v7218_v41 = vld [vmem:[#allocation131_spill] sm:$0xff]  ;;  %v2125_v32 = vld [vmem:[#allocation2 + $0xa68] sm:$0xff] }
 0x326   : > { %v1707_v8 = vmul.f32 %v5421_v6, %v1647_v51  ;;  %v5820_v29 = vpop.f32.mrf.mxu0  ;;  %v1020_v54 = vadd.f32 %v988_v16, %v660_v1  ;;  %v933_v51 = vadd.f32 %v7218_v41, %v7217_v25  ;;  %v7222_v16 = vld [vmem:[#allocation130_spill] sm:$0xff]  ;;  %v2485_v25 = vld [vmem:[#allocation2 + $0xc68] sm:$0xff] }
 0x327   : > { %7215 = vst [vmem:[#allocation95_spill] sm:$0xff] %v5820_v29  ;;  %v5822_v13 = vpop.f32.mrf.mxu1  ;;  %v5824_v62 = vpop.f32.mrf.mxu2 }
 0x328   : > { %7216 = vst [vmem:[#allocation96_spill] sm:$0xff] %v5822_v13  ;;  %v5827_v23 = vadd.f32 %v1707_v8, %v1379_v7  ;;  %2320 = vmatmul.f32.gmra.mxu3 %v2123_v43  ;;  %v606_v13 = vadd.f32 %v7220_v3, %v7219_v18  ;;  %v1380_v7 = vadd.f32 %v1348_v48, %v1020_v54  ;;  %v7221_v8 = vld [vmem:[#allocation129_spill] sm:$0xff]  ;;  %v5851_v48 = vld [vmem:[%s6908_s2 + $0x2] ss:$0 sm:$0xff] }
 0x329   : > { %2567 = vmatmul.f32.gmra.mxu0 %v2482_v49  ;;  %v989_v43 = vmul.f32 %v5733_v42, %v933_v51  ;;  %v1293_v49 = vadd.f32 %v7222_v16, %v7221_v8  ;;  %v7226_v51 = vld [vmem:[#allocation134_spill] sm:$0xff]  ;;  %v2162_v3 = vld [vmem:[#allocation2 + $0xb90] sm:$0xff] }
 0x32a   : > { %2680 = vmatmul.f32.gmra.mxu1 %v2483_v28  ;;  %v2484_v28 = vld [vmem:[#allocation2 + $0xc60] sm:$0xff]  ;;  %v7227_v8 = vld [vmem:[#allocation57_spill] sm:$0xff] }
 0x32b   : > { %v1649_v11 = vpop.f32.mrf.mxu3 }
 0x32c   : > { %v1650_v29 = vadd.f32 %v1649_v11, %v5472_v34  ;;  %2264 = vmatmul.f32.gmra.mxu2 %v2160_v9  ;;  %v661_v34 = vmul.f32 %v5748_v44, %v606_v13  ;;  %v7228_v13 = vld [vmem:[#allocation58_spill] sm:$0xff] }
 0x32e   : > { %v1708_v56 = vmul.f32 %v5421_v6, %v1650_v29  ;;  %v5839_v59 = vpop.f32.mrf.mxu0  ;;  %v1021_v54 = vadd.f32 %v989_v43, %v661_v34  ;;  %v1349_v6 = vmul.f32 %v5851_v48, %v1293_v49  ;;  %v7225_v29 = vld [vmem:[#allocation105_spill] sm:$0xff]  ;;  %v2127_v43 = vld [vmem:[#allocation2 + $0xa78] sm:$0xff]  ;;  %v5865_v49 = vld [vmem:[%s6908_s2 + $0x3] ss:$0 sm:$0xff] }
 0x32f   : > { %7223 = vst [vmem:[#allocation62_spill] sm:$0xff] %v5839_v59  ;;  %v5841_v1 = vpop.f32.mrf.mxu1  ;;  %v5843_v41 = vpop.f32.mrf.mxu2  ;;  %v936_v9 = vadd.f32 %v7226_v51, %v7225_v29  ;;  %v7230_v34 = vld [vmem:[#allocation133_spill] sm:$0xff] }
 0x330   : > { %7224 = vst [vmem:[#allocation102_spill] sm:$0xff] %v5841_v1  ;;  %v5846_v11 = vadd.f32 %v1708_v56, %v1380_v7  ;;  %2323 = vmatmul.f32.gmra.mxu3 %v2125_v32  ;;  %v609_v7 = vadd.f32 %v7228_v13, %v7227_v8  ;;  %v1381_v16 = vadd.f32 %v1349_v6, %v1021_v54  ;;  %v2486_v51 = vld [vmem:[#allocation2 + $0xc70] sm:$0xff]  ;;  %v2164_v13 = vld [vmem:[#allocation2 + $0xba0] sm:$0xff] }
 0x331   : > { %2570 = vmatmul.f32.gmra.mxu0 %v2484_v28  ;;  %v990_v56 = vmul.f32 %v5733_v42, %v936_v9  ;;  %v7229_v28 = vld [vmem:[#allocation132_spill] sm:$0xff] }
 0x332   : > { %2683 = vmatmul.f32.gmra.mxu1 %v2485_v25  ;;  %v1296_v1 = vadd.f32 %v7230_v34, %v7229_v28  ;;  %v662_v42 = vmul.f32 %v5748_v44, %v609_v7  ;;  %v2129_v28 = vld [vmem:[#allocation2 + $0xa88] sm:$0xff] }
 0x333   : > { %v1652_v18 = vpop.f32.mrf.mxu3 }
 0x334   : > { %v1653_v32 = vadd.f32 %v1652_v18, %v5491_v45  ;;  %2267 = vmatmul.f32.gmra.mxu2 %v2162_v3  ;;  %v2487_v45 = vld [vmem:[#allocation2 + $0xc78] sm:$0xff]  ;;  %v1022_v6 = vadd.f32 %v990_v56, %v662_v42  ;;  %v1350_v9 = vmul.f32 %v5851_v48, %v1296_v1  ;;  %v2489_v56 = vld [vmem:[#allocation2 + $0xc88] sm:$0xff] }
 0x336   : > { %v1709_v25 = vmul.f32 %v5865_v49, %v1653_v32  ;;  %v5868_v29 = vpop.f32.mrf.mxu0  ;;  %v1382_v34 = vadd.f32 %v1350_v9, %v1022_v6  ;;  %v7235_v6 = vld [vmem:[#allocation137_spill] sm:$0xff]  ;;  %v7236_v9 = vld [vmem:[#allocation138_spill] sm:$0xff] }
 0x337   : > { %7231 = vst [vmem:[#allocation30_spill] sm:$0xff] %v5868_v29  ;;  %v5870_v8 = vpop.f32.mrf.mxu1  ;;  %v5872_v18 = vpop.f32.mrf.mxu2  ;;  %v7234_v29 = vld [vmem:[#allocation136_spill] sm:$0xff] }
 0x338   : > { %7232 = vst [vmem:[#allocation31_spill] sm:$0xff] %v5870_v8  ;;  %v5875_v54 = vadd.f32 %v1709_v25, %v1381_v16  ;;  %2326 = vmatmul.f32.gmra.mxu3 %v2127_v43  ;;  %v7233_v8 = vld [vmem:[#allocation135_spill] sm:$0xff] }
 0x339   : > { %2573 = vmatmul.f32.gmra.mxu0 %v2486_v51  ;;  %v1299_v59 = vadd.f32 %v7234_v29, %v7233_v8  ;;  %v2488_v43 = vld [vmem:[#allocation2 + $0xc80] sm:$0xff]  ;;  %v2131_v8 = vld [vmem:[#allocation2 + $0xa98] sm:$0xff] }
 0x33a   : > { %2686 = vmatmul.f32.gmra.mxu1 %v2487_v45  ;;  %v2166_v45 = vld [vmem:[#allocation2 + $0xbb0] sm:$0xff] }
 0x33b   : > { %v1655_v3 = vpop.f32.mrf.mxu3 }
 0x33c   : > { %v1656_v32 = vadd.f32 %v1655_v3, %v5510_v46  ;;  %2270 = vmatmul.f32.gmra.mxu2 %v2164_v13  ;;  %v1351_v46 = vmul.f32 %v5851_v48, %v1299_v59  ;;  %v1302_v3 = vadd.f32 %v7236_v9, %v7235_v6  ;;  %v2491_v59 = vld [vmem:[#allocation2 + $0xc98] sm:$0xff]  ;;  %v7239_v6 = vld [vmem:[#allocation140_spill] sm:$0xff] }
 0x33e   : > { %v1710_v44 = vmul.f32 %v5865_v49, %v1656_v32  ;;  %v5882_v7 = vpop.f32.mrf.mxu0  ;;  %v1383_v42 = vadd.f32 %v1351_v46, %v5316_v31 }
 0x33f   : > { %v5884_v16 = vpop.f32.mrf.mxu1  ;;  %v5886_v1 = vpop.f32.mrf.mxu2 }
 0x340   : > { %v5888_v25 = vadd.f32 %v1710_v44, %v1382_v34  ;;  %2329 = vmatmul.f32.gmra.mxu3 %v2129_v28  ;;  %v2490_v28 = vld [vmem:[#allocation2 + $0xc90] sm:$0xff] }
 0x341   : > { %2576 = vmatmul.f32.gmra.mxu0 %v2488_v43 }
 0x342   : > { %2689 = vmatmul.f32.gmra.mxu1 %v2489_v56  ;;  %v2168_v56 = vld [vmem:[#allocation2 + $0xbc0] sm:$0xff] }
 0x343   : > { %v1658_v51 = vpop.f32.mrf.mxu3 }
 0x344   : > { %v1659_v29 = vadd.f32 %v1658_v51, %v5529_v27  ;;  %2273 = vmatmul.f32.gmra.mxu2 %v2166_v45  ;;  %v1352_v27 = vmul.f32 %v5851_v48, %v1302_v3  ;;  %v2133_v51 = vld [vmem:[#allocation2 + $0xaa8] sm:$0xff] }
 0x345   : > { %v2493_v3 = vld [vmem:[#allocation2 + $0xca8] sm:$0xff] }
 0x346   : > { %v1711_v13 = vmul.f32 %v5865_v49, %v1659_v29  ;;  %v5896_v32 = vpop.f32.mrf.mxu0  ;;  %v1384_v45 = vadd.f32 %v1352_v27, %v5328_v19  ;;  %v7238_v29 = vld [vmem:[#allocation139_spill] sm:$0xff]  ;;  %v2170_v27 = vld [vmem:[#allocation2 + $0xbd0] sm:$0xff] }
 0x347   : > { %v5898_v34 = vpop.f32.mrf.mxu1  ;;  %v5900_v44 = vpop.f32.mrf.mxu2  ;;  %v1305_v9 = vadd.f32 %v7239_v6, %v7238_v29  ;;  %v7242_v29 = vld [vmem:[#allocation141_spill] sm:$0xff]  ;;  %v7243_v6 = vld [vmem:[#allocation142_spill] sm:$0xff] }
 0x348   : > { %7237 = vst [vmem:[#allocation99_spill] sm:$0xff] %v5898_v34  ;;  %v5902_v43 = vadd.f32 %v1711_v13, %v1383_v42  ;;  %2332 = vmatmul.f32.gmra.mxu3 %v2131_v8  ;;  %v2492_v8 = vld [vmem:[#allocation2 + $0xca0] sm:$0xff] }
 0x349   : > { %2579 = vmatmul.f32.gmra.mxu0 %v2490_v28 }
 0x34a   : > { %2692 = vmatmul.f32.gmra.mxu1 %v2491_v59 }
 0x34b   : > { %v1661_v31 = vpop.f32.mrf.mxu3 }
 0x34c   : > { %v1662_v46 = vadd.f32 %v1661_v31, %v5548_v35  ;;  %2276 = vmatmul.f32.gmra.mxu2 %v2168_v56  ;;  %v1353_v35 = vmul.f32 %v5851_v48, %v1305_v9  ;;  %v2135_v56 = vld [vmem:[#allocation2 + $0xab8] sm:$0xff] }
 0x34d   : > { %v2495_v9 = vld [vmem:[#allocation2 + $0xcb8] sm:$0xff] }
 0x34e   : > { %v1712_v34 = vmul.f32 %v5865_v49, %v1662_v46  ;;  %v5910_v42 = vpop.f32.mrf.mxu0  ;;  %v1385_v46 = vadd.f32 %v1353_v35, %v5340_v30  ;;  %v2172_v35 = vld [vmem:[#allocation2 + $0xbe0] sm:$0xff] }
 0x34f   : > { %7240 = vst [vmem:[#allocation100_spill] sm:$0xff] %v5910_v42  ;;  %v5912_v13 = vpop.f32.mrf.mxu1  ;;  %v5914_v28 = vpop.f32.mrf.mxu2 }
 0x350   : > { %7241 = vst [vmem:[#allocation65_spill] sm:$0xff] %v5912_v13  ;;  %v5916_v59 = vadd.f32 %v1712_v34, %v1384_v45  ;;  %2335 = vmatmul.f32.gmra.mxu3 %v2133_v51  ;;  %v1308_v13 = vadd.f32 %v7243_v6, %v7242_v29  ;;  %v2494_v51 = vld [vmem:[#allocation2 + $0xcb0] sm:$0xff]  ;;  %v7246_v29 = vld [vmem:[#allocation143_spill] sm:$0xff]  ;;  %v7247_v6 = vld [vmem:[#allocation144_spill] sm:$0xff] }
 0x351   : > { %2582 = vmatmul.f32.gmra.mxu0 %v2492_v8 }
 0x352   : > { %2695 = vmatmul.f32.gmra.mxu1 %v2493_v3 }
 0x353   : > { %v1664_v19 = vpop.f32.mrf.mxu3 }
 0x354   : > { %v1665_v31 = vadd.f32 %v1664_v19, %v5567_v38  ;;  %2279 = vmatmul.f32.gmra.mxu2 %v2170_v27  ;;  %v1354_v38 = vmul.f32 %v5851_v48, %v1308_v13  ;;  %v2137_v27 = vld [vmem:[#allocation2 + $0xac8] sm:$0xff] }
 0x355   : > { %v2497_v13 = vld [vmem:[#allocation2 + $0xcc8] sm:$0xff] }
 0x356   : > { %v1713_v42 = vmul.f32 %v5865_v49, %v1665_v31  ;;  %v5924_v34 = vpop.f32.mrf.mxu0  ;;  %v1386_v31 = vadd.f32 %v1354_v38, %v5352_v57  ;;  %v2174_v38 = vld [vmem:[#allocation2 + $0xbf0] sm:$0xff] }
 0x357   : > { %7244 = vst [vmem:[#allocation106_spill] sm:$0xff] %v5924_v34  ;;  %v5926_v45 = vpop.f32.mrf.mxu1  ;;  %v5928_v8 = vpop.f32.mrf.mxu2 }
 0x358   : > { %7245 = vst [vmem:[#allocation32_spill] sm:$0xff] %v5926_v45  ;;  %v5930_v3 = vadd.f32 %v1713_v42, %v1385_v46  ;;  %2338 = vmatmul.f32.gmra.mxu3 %v2135_v56  ;;  %v1311_v45 = vadd.f32 %v7247_v6, %v7246_v29  ;;  %v2496_v56 = vld [vmem:[#allocation2 + $0xcc0] sm:$0xff]  ;;  %v7250_v29 = vld [vmem:[#allocation145_spill] sm:$0xff]  ;;  %v7251_v6 = vld [vmem:[#allocation146_spill] sm:$0xff] }
 0x359   : > { %2585 = vmatmul.f32.gmra.mxu0 %v2494_v51 }
 0x35a   : > { %2698 = vmatmul.f32.gmra.mxu1 %v2495_v9 }
 0x35b   : > { %v1667_v30 = vpop.f32.mrf.mxu3 }
 0x35c   : > { %v1668_v19 = vadd.f32 %v1667_v30, %v5586_v55  ;;  %2282 = vmatmul.f32.gmra.mxu2 %v2172_v35  ;;  %v1355_v55 = vmul.f32 %v5851_v48, %v1311_v45  ;;  %v2139_v35 = vld [vmem:[#allocation2 + $0xad8] sm:$0xff] }
 0x35d   : > { %v2499_v45 = vld [vmem:[#allocation2 + $0xcd8] sm:$0xff] }
 0x35e   : > { %v1714_v34 = vmul.f32 %v5865_v49, %v1668_v19  ;;  %v5938_v42 = vpop.f32.mrf.mxu0  ;;  %v1387_v19 = vadd.f32 %v1355_v55, %v5364_v14  ;;  %v2832_v55 = vld [vmem:[#allocation2 + $0xe00] sm:$0xff] }
 0x35f   : > { %7248 = vst [vmem:[#allocation33_spill] sm:$0xff] %v5938_v42  ;;  %v5940_v46 = vpop.f32.mrf.mxu1  ;;  %v5942_v51 = vpop.f32.mrf.mxu2 }
 0x360   : > { %7249 = vst [vmem:[#allocation103_spill] sm:$0xff] %v5940_v46  ;;  %v5944_v9 = vadd.f32 %v1714_v34, %v1386_v31  ;;  %2341 = vmatmul.f32.gmra.mxu3 %v2137_v27  ;;  %v1314_v46 = vadd.f32 %v7251_v6, %v7250_v29  ;;  %v2498_v27 = vld [vmem:[#allocation2 + $0xcd0] sm:$0xff]  ;;  %v7254_v29 = vld [vmem:[#allocation147_spill] sm:$0xff]  ;;  %v7255_v6 = vld [vmem:[#allocation148_spill] sm:$0xff] }
 0x361   : > { %2588 = vmatmul.f32.gmra.mxu0 %v2496_v56 }
 0x362   : > { %2701 = vmatmul.f32.gmra.mxu1 %v2497_v13 }
 0x363   : > { %v1670_v57 = vpop.f32.mrf.mxu3 }
 0x364   : > { %v1671_v30 = vadd.f32 %v1670_v57, %v5605_v12  ;;  %2285 = vmatmul.f32.gmra.mxu2 %v2174_v38  ;;  %v1356_v12 = vmul.f32 %v5851_v48, %v1314_v46  ;;  %v2141_v38 = vld [vmem:[#allocation2 + $0xae8] sm:$0xff] }
 0x365   : > { %v2501_v46 = vld [vmem:[#allocation2 + $0xce8] sm:$0xff] }
 0x366   : > { %v1715_v42 = vmul.f32 %v5865_v49, %v1671_v30  ;;  %v5952_v34 = vpop.f32.mrf.mxu0  ;;  %v1388_v30 = vadd.f32 %v1356_v12, %v5376_v33 }
 0x367   : > { %7252 = vst [vmem:[#allocation104_spill] sm:$0xff] %v5952_v34  ;;  %v5954_v31 = vpop.f32.mrf.mxu1  ;;  %v5956_v56 = vpop.f32.mrf.mxu2 }
 0x368   : > { %7253 = vst [vmem:[#allocation69_spill] sm:$0xff] %v5954_v31  ;;  %v5958_v13 = vadd.f32 %v1715_v42, %v1387_v19  ;;  %2344 = vmatmul.f32.gmra.mxu3 %v2139_v35  ;;  %v1317_v31 = vadd.f32 %v7255_v6, %v7254_v29  ;;  %v2500_v35 = vld [vmem:[#allocation2 + $0xce0] sm:$0xff]  ;;  %v2502_v6 = vld [vmem:[#allocation2 + $0xcf0] sm:$0xff] }
 0x369   : > { %2591 = vmatmul.f32.gmra.mxu0 %v2498_v27 }
 0x36a   : > { %2704 = vmatmul.f32.gmra.mxu1 %v2499_v45  ;;  %v1357_v33 = vmul.f32 %v5851_v48, %v1317_v31  ;;  %v2503_v31 = vld [vmem:[#allocation2 + $0xcf8] sm:$0xff] }
 0x36b   : > { %v1673_v14 = vpop.f32.mrf.mxu3 }
 0x36c   : > { %v1674_v57 = vadd.f32 %v1673_v14, %v5624_v15  ;;  %2912 = vmatmul.f32.vlgmr.msrb.gmra.mxu2 %v2832_v55  ;;  %v3551_v15 = vld [vmem:[#allocation4] sm:$0x7]  ;;  %v2834_v14 = vld [vmem:[#allocation2 + $0xe10] sm:$0xff]  ;;  %v1389_v29 = vadd.f32 %v1357_v33, %v5388_v39 }
 0x36d   : > { %4024 = vmatpush.msk.msra.mxu2 %vm3649_vm0, %v3551_v15  ;;  %v2836_v33 = vld [vmem:[#allocation2 + $0xe20] sm:$0xff] }
 0x36e   : > { %v1716_v34 = vmul.f32 %v5865_v49, %v1674_v57  ;;  %v5966_v42 = vpop.f32.mrf.mxu0  ;;  %v2143_v57 = vld [vmem:[#allocation2 + $0xaf8] sm:$0xff] }
 0x36f   : > { %v5968_v19 = vpop.f32.mrf.mxu1  ;;  %v5970_v27 = vpop.f32.mrf.mxu2 }
 0x370   : > { %v5972_v45 = vadd.f32 %v1716_v34, %v1388_v30  ;;  %2347 = vmatmul.f32.gmra.mxu3 %v2141_v38  ;;  %v1320_v34 = vadd.f32 %v5384_v10, %v5382_v24  ;;  %v2145_v24 = vld [vmem:[#allocation2 + $0xb08] sm:$0xff] }
 0x371   : > { %2594 = vmatmul.f32.gmra.mxu0 %v2500_v35 }
 0x372   : > { %2707 = vmatmul.f32.gmra.mxu1 %v2501_v46 }
 0x373   : > { %v1676_v12 = vpop.f32.mrf.mxu3 }
 0x374   : > { %v1677_v55 = vadd.f32 %v1676_v12, %v5643_v20  ;;  %2915 = vmatmul.f32.gmra.mxu2 %v2834_v14  ;;  %v1358_v20 = vmul.f32 %v5851_v48, %v1320_v34  ;;  %v7256_v14 = vld [vmem:[#allocation149_spill] sm:$0xff]  ;;  %v2504_v34 = vld [vmem:[#allocation2 + $0xd00] sm:$0xff] }
 0x376   : > { %v1717_v38 = vmul.f32 %v5865_v49, %v1677_v55  ;;  %v5980_v30 = vpop.f32.mrf.mxu0  ;;  %v1390_v12 = vadd.f32 %v1358_v20, %v5413_v0  ;;  %v1947_v55 = vadd.f32 %v7256_v14, %v5406_v52  ;;  %v6011_v0 = vld [vmem:[%s6908_s2 + $0x5] ss:$0 sm:$0xff]  ;;  %v2838_v20 = vld [vmem:[#allocation2 + $0xe30] sm:$0xff] }
 0x377   : > { %v5982_v35 = vpop.f32.mrf.mxu1  ;;  %v5984_v46 = vpop.f32.mrf.mxu2 }
 0x378   : > { %v5986_v15 = vadd.f32 %v1717_v38, %v1389_v29  ;;  %2350 = vmatmul.f32.gmra.mxu3 %v2143_v57  ;;  %v5996_v29 = vld [vmem:[%s6908_s2 + $0x4] ss:$0 sm:$0xff] }
 0x379   : > { %2597 = vmatmul.f32.gmra.mxu0 %v2502_v6  ;;  %v2047_v52 = vmul.f32 %v5996_v29, %v1947_v55  ;;  %v2506_v55 = vld [vmem:[#allocation2 + $0xd10] sm:$0xff] }
 0x37a   : > { %2710 = vmatmul.f32.gmra.mxu1 %v2503_v31 }
 0x37b   : > { %v1679_v39 = vpop.f32.mrf.mxu3 }
 0x37c   : > { %v1680_v10 = vadd.f32 %v1679_v39, %v5662_v22  ;;  %2918 = vmatmul.f32.gmra.mxu2 %v2836_v33  ;;  %v2505_v22 = vld [vmem:[#allocation2 + $0xd08] sm:$0xff]  ;;  %v2147_v33 = vld [vmem:[#allocation2 + $0xb18] sm:$0xff] }
 0x37e   : > { %v1718_v57 = vmul.f32 %v5865_v49, %v1680_v10  ;;  %v5999_v48 = vpop.f32.mrf.mxu0  ;;  %v2079_v10 = vadd.f32 %v2047_v52, %v5437_v61  ;;  %v2840_v52 = vld [vmem:[#allocation2 + $0xe40] sm:$0xff] }
 0x37f   : > { %v6001_v38 = vpop.f32.mrf.mxu1  ;;  %v6003_v6 = vpop.f32.mrf.mxu2 }
 0x380   : > { %7257 = vst [vmem:[#allocation109_spill] sm:$0xff] %v6001_v38  ;;  %v6005_v31 = vadd.f32 %v1718_v57, %v1390_v12  ;;  %2353 = vmatmul.f32.gmra.mxu3 %v2145_v24  ;;  %v1950_v24 = vadd.f32 %v5432_v53, %v5430_v2  ;;  %v2149_v53 = vld [vmem:[#allocation2 + $0xb28] sm:$0xff] }
 0x381   : > { %2600 = vmatmul.f32.gmra.mxu0 %v2504_v34  ;;  %v2507_v34 = vld [vmem:[#allocation2 + $0xd18] sm:$0xff] }
 0x382   : > { %2713 = vmatmul.f32.gmra.mxu1 %v2505_v22 }
 0x383   : > { %v2306_v49 = vpop.f32.mrf.mxu3 }
 0x384   : > { %v2307_v39 = vadd.f32 %v2306_v49, %v5681_v5  ;;  %2921 = vmatmul.f32.gmra.mxu2 %v2838_v20  ;;  %v2048_v5 = vmul.f32 %v5996_v29, %v1950_v24  ;;  %v1953_v20 = vadd.f32 %v5451_v26, %v5449_v40  ;;  %v2509_v24 = vld [vmem:[#allocation2 + $0xd28] sm:$0xff]  ;;  %v2151_v26 = vld [vmem:[#allocation2 + $0xb38] sm:$0xff] }
 0x386   : > { %v2407_v12 = vmul.f32 %v6011_v0, %v2307_v39  ;;  %v6018_v14 = vpop.f32.mrf.mxu0  ;;  %v2080_v49 = vadd.f32 %v2048_v5, %v5456_v36  ;;  %v2842_v5 = vld [vmem:[#allocation2 + $0xe50] sm:$0xff] }
 0x387   : > { %v6020_v57 = vpop.f32.mrf.mxu1  ;;  %v6022_v22 = vpop.f32.mrf.mxu2 }
 0x388   : > { %v6024_v38 = vadd.f32 %v2407_v12, %v2079_v10  ;;  %2356 = vmatmul.f32.gmra.mxu3 %v2147_v33  ;;  %v2508_v33 = vld [vmem:[#allocation2 + $0xd20] sm:$0xff] }
 0x389   : > { %2603 = vmatmul.f32.gmra.mxu0 %v2506_v55 }
 0x38a   : > { %2716 = vmatmul.f32.gmra.mxu1 %v2507_v34 }
 0x38b   : > { %v2309_v61 = vpop.f32.mrf.mxu3 }
 0x38c   : > { %v2310_v2 = vadd.f32 %v2309_v61, %v5700_v21  ;;  %2924 = vmatmul.f32.gmra.mxu2 %v2840_v52  ;;  %v2049_v21 = vmul.f32 %v5996_v29, %v1953_v20  ;;  %v7261_v52 = vld [vmem:[#allocation66_spill] sm:$0xff] }
 0x38d   : > { %v2511_v20 = vld [vmem:[#allocation2 + $0xd38] sm:$0xff] }
 0x38e   : > { %v2408_v39 = vmul.f32 %v6011_v0, %v2310_v2  ;;  %v6032_v10 = vpop.f32.mrf.mxu0  ;;  %v2081_v61 = vadd.f32 %v2049_v21, %v5475_v4  ;;  %v7262_v2 = vld [vmem:[#allocation12_spill] sm:$0xff]  ;;  %v2844_v21 = vld [vmem:[#allocation2 + $0xe60] sm:$0xff] }
 0x38f   : > { %7258 = vst [vmem:[#allocation34_spill] sm:$0xff] %v6032_v10  ;;  %v6034_v12 = vpop.f32.mrf.mxu1  ;;  %v6036_v55 = vpop.f32.mrf.mxu2 }
 0x390   : > { %7259 = vst [vmem:[#allocation35_spill] sm:$0xff] %v6034_v12  ;;  %v6038_v34 = vadd.f32 %v2408_v39, %v2080_v49  ;;  %2359 = vmatmul.f32.gmra.mxu3 %v2149_v53  ;;  %v1956_v12 = vadd.f32 %v7262_v2, %v7261_v52  ;;  %v2510_v53 = vld [vmem:[#allocation2 + $0xd30] sm:$0xff] }
 0x391   : > { %2606 = vmatmul.f32.gmra.mxu0 %v2508_v33  ;;  %v7267_v2 = vld [vmem:[#allocation13_spill] sm:$0xff] }
 0x392   : > { %7260 = vst [vmem:[#allocation107_spill] sm:$0xff] %v6038_v34  ;;  %2719 = vmatmul.f32.gmra.mxu1 %v2509_v24 }
 0x393   : > { %v2312_v36 = vpop.f32.mrf.mxu3 }
 0x394   : > { %v2313_v40 = vadd.f32 %v2312_v36, %v5719_v60  ;;  %2927 = vmatmul.f32.gmra.mxu2 %v2842_v5  ;;  %v2050_v60 = vmul.f32 %v5996_v29, %v1956_v12  ;;  %v2153_v5 = vld [vmem:[#allocation2 + $0xb48] sm:$0xff] }
 0x395   : > { %v2513_v12 = vld [vmem:[#allocation2 + $0xd48] sm:$0xff] }
 0x396   : > { %v2409_v10 = vmul.f32 %v6011_v0, %v2313_v40  ;;  %v6046_v49 = vpop.f32.mrf.mxu0  ;;  %v7266_v40 = vld [vmem:[#allocation64_spill] sm:$0xff] }
 0x397   : > { %7263 = vst [vmem:[#allocation108_spill] sm:$0xff] %v6046_v49  ;;  %v6048_v39 = vpop.f32.mrf.mxu1  ;;  %v6050_v33 = vpop.f32.mrf.mxu2  ;;  %v2082_v52 = vadd.f32 %v2050_v60, %v7266_v40 }
 0x398   : > { %7264 = vst [vmem:[#allocation73_spill] sm:$0xff] %v6048_v39  ;;  %v6052_v24 = vadd.f32 %v2409_v10, %v2081_v61  ;;  %2362 = vmatmul.f32.gmra.mxu3 %v2151_v26  ;;  %v7268_v39 = vld [vmem:[#allocation63_spill] sm:$0xff] }
 0x399   : > { %2609 = vmatmul.f32.gmra.mxu0 %v2510_v53  ;;  %v1959_v49 = vadd.f32 %v7268_v39, %v7267_v2  ;;  %v2512_v26 = vld [vmem:[#allocation2 + $0xd40] sm:$0xff]  ;;  %v7273_v2 = vld [vmem:[#allocation44_spill] sm:$0xff] }
 0x39a   : > { %7265 = vst [vmem:[#allocation36_spill] sm:$0xff] %v6052_v24  ;;  %2722 = vmatmul.f32.gmra.mxu1 %v2511_v20 }
 0x39b   : > { %v2315_v4 = vpop.f32.mrf.mxu3 }
 0x39c   : > { %v2316_v36 = vadd.f32 %v2315_v4, %v5743_v37  ;;  %2930 = vmatmul.f32.gmra.mxu2 %v2844_v21  ;;  %v2051_v37 = vmul.f32 %v5996_v29, %v1959_v49  ;;  %v2846_v4 = vld [vmem:[#allocation2 + $0xe70] sm:$0xff]  ;;  %v2155_v21 = vld [vmem:[#allocation2 + $0xb58] sm:$0xff] }
 0x39d   : > { %v2515_v49 = vld [vmem:[#allocation2 + $0xd58] sm:$0xff] }
 0x39e   : > { %v2410_v34 = vmul.f32 %v6011_v0, %v2316_v36  ;;  %v6060_v10 = vpop.f32.mrf.mxu0  ;;  %v7272_v36 = vld [vmem:[#allocation14_spill] sm:$0xff] }
 0x39f   : > { %7269 = vst [vmem:[#allocation37_spill] sm:$0xff] %v6060_v10  ;;  %v6062_v61 = vpop.f32.mrf.mxu1  ;;  %v6064_v53 = vpop.f32.mrf.mxu2  ;;  %v2083_v40 = vadd.f32 %v2051_v37, %v7272_v36 }
 0x3a0   : > { %7270 = vst [vmem:[#allocation110_spill] sm:$0xff] %v6062_v61  ;;  %v6066_v20 = vadd.f32 %v2410_v34, %v2082_v52  ;;  %2365 = vmatmul.f32.gmra.mxu3 %v2153_v5  ;;  %v7274_v61 = vld [vmem:[#allocation70_spill] sm:$0xff]  ;;  %v2514_v5 = vld [vmem:[#allocation2 + $0xd50] sm:$0xff] }
 0x3a1   : > { %2612 = vmatmul.f32.gmra.mxu0 %v2512_v26  ;;  %v1962_v10 = vadd.f32 %v7274_v61, %v7273_v2  ;;  %v7279_v2 = vld [vmem:[#allocation15_spill] sm:$0xff] }
 0x3a2   : > { %7271 = vst [vmem:[#allocation111_spill] sm:$0xff] %v6066_v20  ;;  %2725 = vmatmul.f32.gmra.mxu1 %v2513_v12 }
 0x3a3   : > { %v2318_v60 = vpop.f32.mrf.mxu3 }
 0x3a4   : > { %v2319_v39 = vadd.f32 %v2318_v60, %v5767_v50  ;;  %2933 = vmatmul.f32.gmra.mxu2 %v2846_v4  ;;  %v2052_v50 = vmul.f32 %v5996_v29, %v1962_v10  ;;  %v2848_v60 = vld [vmem:[#allocation2 + $0xe80] sm:$0xff]  ;;  %v2157_v4 = vld [vmem:[#allocation2 + $0xb68] sm:$0xff] }
 0x3a5   : > { %v2517_v10 = vld [vmem:[#allocation2 + $0xd68] sm:$0xff] }
 0x3a6   : > { %v2411_v24 = vmul.f32 %v6011_v0, %v2319_v39  ;;  %v6074_v34 = vpop.f32.mrf.mxu0  ;;  %v7278_v39 = vld [vmem:[#allocation68_spill] sm:$0xff] }
 0x3a7   : > { %7275 = vst [vmem:[#allocation77_spill] sm:$0xff] %v6074_v34  ;;  %v6076_v52 = vpop.f32.mrf.mxu1  ;;  %v6078_v26 = vpop.f32.mrf.mxu2  ;;  %v2084_v36 = vadd.f32 %v2052_v50, %v7278_v39 }
 0x3a8   : > { %7276 = vst [vmem:[#allocation38_spill] sm:$0xff] %v6076_v52  ;;  %v6080_v12 = vadd.f32 %v2411_v24, %v2083_v40  ;;  %2368 = vmatmul.f32.gmra.mxu3 %v2155_v21  ;;  %v7280_v52 = vld [vmem:[#allocation67_spill] sm:$0xff] }
 0x3a9   : > { %2615 = vmatmul.f32.gmra.mxu0 %v2514_v5  ;;  %v1965_v34 = vadd.f32 %v7280_v52, %v7279_v2  ;;  %v2516_v21 = vld [vmem:[#allocation2 + $0xd60] sm:$0xff] }
 0x3aa   : > { %7277 = vst [vmem:[#allocation39_spill] sm:$0xff] %v6080_v12  ;;  %2728 = vmatmul.f32.gmra.mxu1 %v2515_v49  ;;  %v7285_v2 = vld [vmem:[#allocation47_spill] sm:$0xff] }
 0x3ab   : > { %v2321_v37 = vpop.f32.mrf.mxu3 }
 0x3ac   : > { %v2322_v61 = vadd.f32 %v2321_v37, %v5786_v58  ;;  %2936 = vmatmul.f32.gmra.mxu2 %v2848_v60  ;;  %v2053_v58 = vmul.f32 %v5996_v29, %v1965_v34  ;;  %v2850_v37 = vld [vmem:[#allocation2 + $0xe90] sm:$0xff]  ;;  %v2159_v60 = vld [vmem:[#allocation2 + $0xb78] sm:$0xff] }
 0x3ad   : > { %v2519_v34 = vld [vmem:[#allocation2 + $0xd78] sm:$0xff] }
 0x3ae   : > { %v2412_v20 = vmul.f32 %v6011_v0, %v2322_v61  ;;  %v6088_v24 = vpop.f32.mrf.mxu0  ;;  %v7284_v61 = vld [vmem:[#allocation16_spill] sm:$0xff] }
 0x3af   : > { %7281 = vst [vmem:[#allocation112_spill] sm:$0xff] %v6088_v24  ;;  %v6090_v40 = vpop.f32.mrf.mxu1  ;;  %v6092_v5 = vpop.f32.mrf.mxu2  ;;  %v2085_v39 = vadd.f32 %v2053_v58, %v7284_v61 }
 0x3b0   : > { %7282 = vst [vmem:[#allocation113_spill] sm:$0xff] %v6090_v40  ;;  %v6094_v49 = vadd.f32 %v2412_v20, %v2084_v36  ;;  %2371 = vmatmul.f32.gmra.mxu3 %v2157_v4  ;;  %v7286_v40 = vld [vmem:[#allocation74_spill] sm:$0xff]  ;;  %v2518_v4 = vld [vmem:[#allocation2 + $0xd70] sm:$0xff] }
 0x3b1   : > { %2618 = vmatmul.f32.gmra.mxu0 %v2516_v21  ;;  %v1968_v24 = vadd.f32 %v7286_v40, %v7285_v2  ;;  %v7291_v2 = vld [vmem:[#allocation17_spill] sm:$0xff] }
 0x3b2   : > { %7283 = vst [vmem:[#allocation81_spill] sm:$0xff] %v6094_v49  ;;  %2731 = vmatmul.f32.gmra.mxu1 %v2517_v10 }
 0x3b3   : > { %v2324_v50 = vpop.f32.mrf.mxu3 }
 0x3b4   : > { %v2325_v52 = vadd.f32 %v2324_v50, %v5805_v47  ;;  %2939 = vmatmul.f32.gmra.mxu2 %v2850_v37  ;;  %v2054_v47 = vmul.f32 %v5996_v29, %v1968_v24  ;;  %v2852_v50 = vld [vmem:[#allocation2 + $0xea0] sm:$0xff]  ;;  %v2161_v37 = vld [vmem:[#allocation2 + $0xb88] sm:$0xff] }
 0x3b5   : > { %v2521_v24 = vld [vmem:[#allocation2 + $0xd88] sm:$0xff] }
 0x3b6   : > { %v2413_v12 = vmul.f32 %v6011_v0, %v2325_v52  ;;  %v6102_v20 = vpop.f32.mrf.mxu0  ;;  %v7290_v52 = vld [vmem:[#allocation72_spill] sm:$0xff] }
 0x3b7   : > { %7287 = vst [vmem:[#allocation116_spill] sm:$0xff] %v6102_v20  ;;  %v6104_v36 = vpop.f32.mrf.mxu1  ;;  %v6106_v21 = vpop.f32.mrf.mxu2  ;;  %v2086_v61 = vadd.f32 %v2054_v47, %v7290_v52 }
 0x3b8   : > { %7288 = vst [vmem:[#allocation40_spill] sm:$0xff] %v6104_v36  ;;  %v6108_v10 = vadd.f32 %v2413_v12, %v2085_v39  ;;  %2374 = vmatmul.f32.gmra.mxu3 %v2159_v60  ;;  %v7292_v36 = vld [vmem:[#allocation71_spill] sm:$0xff] }
 0x3b9   : > { %2621 = vmatmul.f32.gmra.mxu0 %v2518_v4  ;;  %v1971_v20 = vadd.f32 %v7292_v36, %v7291_v2  ;;  %v2520_v60 = vld [vmem:[#allocation2 + $0xd80] sm:$0xff]  ;;  %v7297_v2 = vld [vmem:[#allocation50_spill] sm:$0xff] }
 0x3ba   : > { %7289 = vst [vmem:[#allocation41_spill] sm:$0xff] %v6108_v10  ;;  %2734 = vmatmul.f32.gmra.mxu1 %v2519_v34 }
 0x3bb   : > { %v2327_v58 = vpop.f32.mrf.mxu3 }
 0x3bc   : > { %v2328_v40 = vadd.f32 %v2327_v58, %v5824_v62  ;;  %2942 = vmatmul.f32.gmra.mxu2 %v2852_v50  ;;  %v2055_v62 = vmul.f32 %v5996_v29, %v1971_v20  ;;  %v2854_v58 = vld [vmem:[#allocation2 + $0xeb0] sm:$0xff]  ;;  %v2163_v50 = vld [vmem:[#allocation2 + $0xb98] sm:$0xff] }
 0x3bd   : > { %v2523_v20 = vld [vmem:[#allocation2 + $0xd98] sm:$0xff] }
 0x3be   : > { %v2414_v49 = vmul.f32 %v6011_v0, %v2328_v40  ;;  %v6116_v12 = vpop.f32.mrf.mxu0  ;;  %v7296_v40 = vld [vmem:[#allocation18_spill] sm:$0xff] }
 0x3bf   : > { %7293 = vst [vmem:[#allocation114_spill] sm:$0xff] %v6116_v12  ;;  %v6118_v39 = vpop.f32.mrf.mxu1  ;;  %v6120_v4 = vpop.f32.mrf.mxu2  ;;  %v2087_v52 = vadd.f32 %v2055_v62, %v7296_v40 }
 0x3c0   : > { %7294 = vst [vmem:[#allocation115_spill] sm:$0xff] %v6118_v39  ;;  %v6122_v34 = vadd.f32 %v2414_v49, %v2086_v61  ;;  %2377 = vmatmul.f32.gmra.mxu3 %v2161_v37  ;;  %v7298_v39 = vld [vmem:[#allocation78_spill] sm:$0xff]  ;;  %v2522_v37 = vld [vmem:[#allocation2 + $0xd90] sm:$0xff] }
 0x3c1   : > { %2624 = vmatmul.f32.gmra.mxu0 %v2520_v60  ;;  %v1974_v12 = vadd.f32 %v7298_v39, %v7297_v2  ;;  %v7303_v2 = vld [vmem:[#allocation19_spill] sm:$0xff] }
 0x3c2   : > { %7295 = vst [vmem:[#allocation85_spill] sm:$0xff] %v6122_v34  ;;  %2737 = vmatmul.f32.gmra.mxu1 %v2521_v24 }
 0x3c3   : > { %v2330_v47 = vpop.f32.mrf.mxu3 }
 0x3c4   : > { %v2331_v36 = vadd.f32 %v2330_v47, %v5843_v41  ;;  %2945 = vmatmul.f32.gmra.mxu2 %v2854_v58  ;;  %v2056_v41 = vmul.f32 %v5996_v29, %v1974_v12  ;;  %v2856_v47 = vld [vmem:[#allocation2 + $0xec0] sm:$0xff]  ;;  %v2165_v58 = vld [vmem:[#allocation2 + $0xba8] sm:$0xff] }
 0x3c5   : > { %v2525_v12 = vld [vmem:[#allocation2 + $0xda8] sm:$0xff] }
 0x3c6   : > { %v2415_v10 = vmul.f32 %v6011_v0, %v2331_v36  ;;  %v6130_v49 = vpop.f32.mrf.mxu0  ;;  %v7302_v36 = vld [vmem:[#allocation76_spill] sm:$0xff] }
 0x3c7   : > { %7299 = vst [vmem:[#allocation119_spill] sm:$0xff] %v6130_v49  ;;  %v6132_v61 = vpop.f32.mrf.mxu1  ;;  %v6134_v60 = vpop.f32.mrf.mxu2  ;;  %v2088_v40 = vadd.f32 %v2056_v41, %v7302_v36 }
 0x3c8   : > { %7300 = vst [vmem:[#allocation42_spill] sm:$0xff] %v6132_v61  ;;  %v6136_v24 = vadd.f32 %v2415_v10, %v2087_v52  ;;  %2380 = vmatmul.f32.gmra.mxu3 %v2163_v50  ;;  %v7304_v61 = vld [vmem:[#allocation75_spill] sm:$0xff] }
 0x3c9   : > { %2627 = vmatmul.f32.gmra.mxu0 %v2522_v37  ;;  %v1977_v49 = vadd.f32 %v7304_v61, %v7303_v2  ;;  %v2524_v50 = vld [vmem:[#allocation2 + $0xda0] sm:$0xff]  ;;  %v7309_v2 = vld [vmem:[#allocation53_spill] sm:$0xff] }
 0x3ca   : > { %7301 = vst [vmem:[#allocation43_spill] sm:$0xff] %v6136_v24  ;;  %2740 = vmatmul.f32.gmra.mxu1 %v2523_v20 }
 0x3cb   : > { %v2333_v62 = vpop.f32.mrf.mxu3 }
 0x3cc   : > { %v2334_v39 = vadd.f32 %v2333_v62, %v5872_v18  ;;  %2948 = vmatmul.f32.gmra.mxu2 %v2856_v47  ;;  %v2057_v18 = vmul.f32 %v5996_v29, %v1977_v49  ;;  %v2858_v62 = vld [vmem:[#allocation2 + $0xed0] sm:$0xff]  ;;  %v2167_v47 = vld [vmem:[#allocation2 + $0xbb8] sm:$0xff] }
 0x3cd   : > { %v2527_v49 = vld [vmem:[#allocation2 + $0xdb8] sm:$0xff] }
 0x3ce   : > { %v2416_v34 = vmul.f32 %v6011_v0, %v2334_v39  ;;  %v6144_v10 = vpop.f32.mrf.mxu0  ;;  %v7308_v39 = vld [vmem:[#allocation20_spill] sm:$0xff] }
 0x3cf   : > { %7305 = vst [vmem:[#allocation117_spill] sm:$0xff] %v6144_v10  ;;  %v6146_v52 = vpop.f32.mrf.mxu1  ;;  %v6148_v37 = vpop.f32.mrf.mxu2  ;;  %v2089_v36 = vadd.f32 %v2057_v18, %v7308_v39 }
 0x3d0   : > { %7306 = vst [vmem:[#allocation118_spill] sm:$0xff] %v6146_v52  ;;  %v6150_v20 = vadd.f32 %v2416_v34, %v2088_v40  ;;  %2383 = vmatmul.f32.gmra.mxu3 %v2165_v58  ;;  %v7310_v52 = vld [vmem:[#allocation82_spill] sm:$0xff]  ;;  %v2526_v58 = vld [vmem:[#allocation2 + $0xdb0] sm:$0xff] }
 0x3d1   : > { %2630 = vmatmul.f32.gmra.mxu0 %v2524_v50  ;;  %v1980_v10 = vadd.f32 %v7310_v52, %v7309_v2  ;;  %v7315_v2 = vld [vmem:[#allocation21_spill] sm:$0xff] }
 0x3d2   : > { %7307 = vst [vmem:[#allocation89_spill] sm:$0xff] %v6150_v20  ;;  %2743 = vmatmul.f32.gmra.mxu1 %v2525_v12 }
 0x3d3   : > { %v2336_v41 = vpop.f32.mrf.mxu3 }
 0x3d4   : > { %v2337_v61 = vadd.f32 %v2336_v41, %v5886_v1  ;;  %2951 = vmatmul.f32.gmra.mxu2 %v2858_v62  ;;  %v2058_v1 = vmul.f32 %v5996_v29, %v1980_v10  ;;  %v2860_v41 = vld [vmem:[#allocation2 + $0xee0] sm:$0xff]  ;;  %v2169_v62 = vld [vmem:[#allocation2 + $0xbc8] sm:$0xff] }
 0x3d5   : > { %v2529_v10 = vld [vmem:[#allocation2 + $0xdc8] sm:$0xff] }
 0x3d6   : > { %v2417_v24 = vmul.f32 %v6011_v0, %v2337_v61  ;;  %v6158_v34 = vpop.f32.mrf.mxu0  ;;  %v7314_v61 = vld [vmem:[#allocation80_spill] sm:$0xff] }
 0x3d7   : > { %7311 = vst [vmem:[#allocation122_spill] sm:$0xff] %v6158_v34  ;;  %v6160_v40 = vpop.f32.mrf.mxu1  ;;  %v6162_v50 = vpop.f32.mrf.mxu2  ;;  %v2090_v39 = vadd.f32 %v2058_v1, %v7314_v61 }
 0x3d8   : > { %7312 = vst [vmem:[#allocation45_spill] sm:$0xff] %v6160_v40  ;;  %v6164_v12 = vadd.f32 %v2417_v24, %v2089_v36  ;;  %2386 = vmatmul.f32.gmra.mxu3 %v2167_v47  ;;  %v7316_v40 = vld [vmem:[#allocation79_spill] sm:$0xff] }
 0x3d9   : > { %2633 = vmatmul.f32.gmra.mxu0 %v2526_v58  ;;  %v1983_v34 = vadd.f32 %v7316_v40, %v7315_v2  ;;  %v2528_v47 = vld [vmem:[#allocation2 + $0xdc0] sm:$0xff]  ;;  %v7320_v2 = vld [vmem:[#allocation56_spill] sm:$0xff] }
 0x3da   : > { %7313 = vst [vmem:[#allocation46_spill] sm:$0xff] %v6164_v12  ;;  %2746 = vmatmul.f32.gmra.mxu1 %v2527_v49 }
 0x3db   : > { %v2339_v18 = vpop.f32.mrf.mxu3 }
 0x3dc   : > { %v2340_v52 = vadd.f32 %v2339_v18, %v5900_v44  ;;  %2954 = vmatmul.f32.gmra.mxu2 %v2860_v41  ;;  %v2059_v44 = vmul.f32 %v5996_v29, %v1983_v34  ;;  %v2862_v18 = vld [vmem:[#allocation2 + $0xef0] sm:$0xff]  ;;  %v2171_v41 = vld [vmem:[#allocation2 + $0xbd8] sm:$0xff] }
 0x3dd   : > { %v2531_v34 = vld [vmem:[#allocation2 + $0xdd8] sm:$0xff] }
 0x3de   : > { %v2418_v20 = vmul.f32 %v6011_v0, %v2340_v52  ;;  %v6172_v24 = vpop.f32.mrf.mxu0  ;;  %v7319_v52 = vld [vmem:[#allocation22_spill] sm:$0xff] }
 0x3df   : > { %7317 = vst [vmem:[#allocation120_spill] sm:$0xff] %v6172_v24  ;;  %v6174_v36 = vpop.f32.mrf.mxu1  ;;  %v6176_v58 = vpop.f32.mrf.mxu2  ;;  %v2091_v61 = vadd.f32 %v2059_v44, %v7319_v52  ;;  %v7324_v52 = vld [vmem:[#allocation23_spill] sm:$0xff] }
 0x3e0   : > { %7318 = vst [vmem:[#allocation121_spill] sm:$0xff] %v6174_v36  ;;  %v6178_v49 = vadd.f32 %v2418_v20, %v2090_v39  ;;  %2389 = vmatmul.f32.gmra.mxu3 %v2169_v62  ;;  %v7321_v36 = vld [vmem:[#allocation86_spill] sm:$0xff]  ;;  %v2530_v62 = vld [vmem:[#allocation2 + $0xdd0] sm:$0xff] }
 0x3e1   : > { %2636 = vmatmul.f32.gmra.mxu0 %v2528_v47  ;;  %v1986_v24 = vadd.f32 %v7321_v36, %v7320_v2  ;;  %v7325_v2 = vld [vmem:[#allocation83_spill] sm:$0xff] }
 0x3e2   : > { %2749 = vmatmul.f32.gmra.mxu1 %v2529_v10 }
 0x3e3   : > { %v2342_v1 = vpop.f32.mrf.mxu3 }
 0x3e4   : > { %v2343_v40 = vadd.f32 %v2342_v1, %v5914_v28  ;;  %2957 = vmatmul.f32.gmra.mxu2 %v2862_v18  ;;  %v2060_v28 = vmul.f32 %v5996_v29, %v1986_v24  ;;  %v2864_v1 = vld [vmem:[#allocation2 + $0xf00] sm:$0xff]  ;;  %v2173_v18 = vld [vmem:[#allocation2 + $0xbe8] sm:$0xff] }
 0x3e5   : > { %v2533_v24 = vld [vmem:[#allocation2 + $0xde8] sm:$0xff] }
 0x3e6   : > { %v2419_v12 = vmul.f32 %v6011_v0, %v2343_v40  ;;  %v6186_v20 = vpop.f32.mrf.mxu0  ;;  %v2092_v40 = vadd.f32 %v2060_v28, %v5684_v17  ;;  %v2866_v28 = vld [vmem:[#allocation2 + $0xf10] sm:$0xff] }
 0x3e7   : > { %7322 = vst [vmem:[#allocation93_spill] sm:$0xff] %v6186_v20  ;;  %v6188_v39 = vpop.f32.mrf.mxu1  ;;  %v6190_v47 = vpop.f32.mrf.mxu2 }
 0x3e8   : > { %7323 = vst [vmem:[#allocation125_spill] sm:$0xff] %v6188_v39  ;;  %v6192_v10 = vadd.f32 %v2419_v12, %v2091_v61  ;;  %2392 = vmatmul.f32.gmra.mxu3 %v2171_v41  ;;  %v1989_v39 = vadd.f32 %v7325_v2, %v7324_v52  ;;  %v2532_v41 = vld [vmem:[#allocation2 + $0xde0] sm:$0xff]  ;;  %v7329_v52 = vld [vmem:[#allocation84_spill] sm:$0xff] }
 0x3e9   : > { %2639 = vmatmul.f32.gmra.mxu0 %v2530_v62  ;;  %v7330_v2 = vld [vmem:[#allocation59_spill] sm:$0xff] }
 0x3ea   : > { %2752 = vmatmul.f32.gmra.mxu1 %v2531_v34 }
 0x3eb   : > { %v2345_v44 = vpop.f32.mrf.mxu3 }
 0x3ec   : > { %v2346_v36 = vadd.f32 %v2345_v44, %v5928_v8  ;;  %2960 = vmatmul.f32.gmra.mxu2 %v2864_v1  ;;  %v2061_v8 = vmul.f32 %v5996_v29, %v1989_v39  ;;  %v2175_v1 = vld [vmem:[#allocation2 + $0xbf8] sm:$0xff] }
 0x3ed   : > { %v2535_v39 = vld [vmem:[#allocation2 + $0xdf8] sm:$0xff] }
 0x3ee   : > { %v2420_v20 = vmul.f32 %v6011_v0, %v2346_v36  ;;  %v6200_v12 = vpop.f32.mrf.mxu0  ;;  %v2093_v36 = vadd.f32 %v2061_v8, %v5703_v63  ;;  %v2868_v8 = vld [vmem:[#allocation2 + $0xf20] sm:$0xff] }
 0x3ef   : > { %7326 = vst [vmem:[#allocation48_spill] sm:$0xff] %v6200_v12  ;;  %v6202_v61 = vpop.f32.mrf.mxu1  ;;  %v6204_v62 = vpop.f32.mrf.mxu2 }
 0x3f0   : > { %7327 = vst [vmem:[#allocation49_spill] sm:$0xff] %v6202_v61  ;;  %v6206_v34 = vadd.f32 %v2420_v20, %v2092_v40  ;;  %2395 = vmatmul.f32.gmra.mxu3 %v2173_v18  ;;  %v1992_v61 = vadd.f32 %v7330_v2, %v7329_v52  ;;  %v2534_v18 = vld [vmem:[#allocation2 + $0xdf0] sm:$0xff]  ;;  %v7335_v2 = vld [vmem:[#allocation90_spill] sm:$0xff] }
 0x3f1   : > { %2642 = vmatmul.f32.gmra.mxu0 %v2532_v41 }
 0x3f2   : > { %7328 = vst [vmem:[#allocation123_spill] sm:$0xff] %v6206_v34  ;;  %2755 = vmatmul.f32.gmra.mxu1 %v2533_v24 }
 0x3f3   : > { %v2348_v17 = vpop.f32.mrf.mxu3 }
 0x3f4   : > { %v2349_v44 = vadd.f32 %v2348_v17, %v5942_v51  ;;  %2963 = vmatmul.f32.gmra.mxu2 %v2866_v28  ;;  %v2062_v51 = vmul.f32 %v5996_v29, %v1992_v61  ;;  %v2833_v28 = vld [vmem:[#allocation2 + $0xe08] sm:$0xff] }
 0x3f5   : > { %v3193_v61 = vld [vmem:[#allocation2 + $0x1008] sm:$0xff] }
 0x3f6   : > { %v2421_v12 = vmul.f32 %v6011_v0, %v2349_v44  ;;  %v6214_v20 = vpop.f32.mrf.mxu0  ;;  %v7334_v44 = vld [vmem:[#allocation25_spill] sm:$0xff] }
 0x3f7   : > { %7331 = vst [vmem:[#allocation124_spill] sm:$0xff] %v6214_v20  ;;  %v6216_v40 = vpop.f32.mrf.mxu1  ;;  %v6218_v41 = vpop.f32.mrf.mxu2  ;;  %v2094_v52 = vadd.f32 %v2062_v51, %v7334_v44 }
 0x3f8   : > { %7332 = vst [vmem:[#allocation97_spill] sm:$0xff] %v6216_v40  ;;  %v6220_v24 = vadd.f32 %v2421_v12, %v2093_v36  ;;  %2398 = vmatmul.f32.gmra.mxu3 %v2175_v1  ;;  %v7336_v40 = vld [vmem:[#allocation24_spill] sm:$0xff]  ;;  %v3192_v1 = vld [vmem:[#allocation2 + $0x1000] sm:$0xff] }
 0x3f9   : > { %2645 = vmatmul.f32.gmra.mxu0 %v2534_v18  ;;  %v1995_v20 = vadd.f32 %v7336_v40, %v7335_v2  ;;  %v7341_v2 = vld [vmem:[#allocation87_spill] sm:$0xff] }
 0x3fa   : > { %7333 = vst [vmem:[#allocation128_spill] sm:$0xff] %v6220_v24  ;;  %2758 = vmatmul.f32.gmra.mxu1 %v2535_v39 }
 0x3fb   : > { %v2351_v63 = vpop.f32.mrf.mxu3 }
 0x3fc   : > { %v2352_v17 = vadd.f32 %v2351_v63, %v5956_v56  ;;  %2966 = vmatmul.f32.gmra.mxu2 %v2868_v8  ;;  %v2063_v56 = vmul.f32 %v5996_v29, %v1995_v20  ;;  %v2870_v63 = vld [vmem:[#allocation2 + $0xf30] sm:$0xff]  ;;  %v2835_v8 = vld [vmem:[#allocation2 + $0xe18] sm:$0xff] }
 0x3fd   : > { %v3195_v20 = vld [vmem:[#allocation2 + $0x1018] sm:$0xff] }
 0x3fe   : > { %v2422_v34 = vmul.f32 %v6011_v0, %v2352_v17  ;;  %v6228_v12 = vpop.f32.mrf.mxu0  ;;  %v7340_v17 = vld [vmem:[#allocation60_spill] sm:$0xff] }
 0x3ff   : > { %7337 = vst [vmem:[#allocation51_spill] sm:$0xff] %v6228_v12  ;;  %v6230_v36 = vpop.f32.mrf.mxu1  ;;  %v6232_v18 = vpop.f32.mrf.mxu2  ;;  %v2095_v44 = vadd.f32 %v2063_v56, %v7340_v17 }
 0x400   : > { %7338 = vst [vmem:[#allocation52_spill] sm:$0xff] %v6230_v36  ;;  %v6234_v39 = vadd.f32 %v2422_v34, %v2094_v52  ;;  %3025 = vmatmul.f32.vlgmr.msra.gmra.mxu3 %v2833_v28  ;;  %v7342_v36 = vld [vmem:[#allocation88_spill] sm:$0xff]  ;;  %v3194_v28 = vld [vmem:[#allocation2 + $0x1010] sm:$0xff] }
 0x401   : > { %3272 = vmatmul.f32.vlgmr.msra.gmra.mxu0 %v3192_v1  ;;  %v1998_v12 = vadd.f32 %v7342_v36, %v7341_v2  ;;  %v7347_v2 = vld [vmem:[#allocation94_spill] sm:$0xff] }
 0x402   : > { %7339 = vst [vmem:[#allocation126_spill] sm:$0xff] %v6234_v39  ;;  %3385 = vmatmul.f32.vlgmr.msra.gmra.mxu1 %v3193_v61 }
 0x403   : > { %v2354_v51 = vpop.f32.mrf.mxu3 }
 0x404   : > { %v2355_v40 = vadd.f32 %v2354_v51, %v5970_v27  ;;  %2969 = vmatmul.f32.gmra.mxu2 %v2870_v63  ;;  %v2064_v27 = vmul.f32 %v5996_v29, %v1998_v12  ;;  %v2872_v51 = vld [vmem:[#allocation2 + $0xf40] sm:$0xff]  ;;  %v2837_v63 = vld [vmem:[#allocation2 + $0xe28] sm:$0xff] }
 0x405   : > { %v3197_v12 = vld [vmem:[#allocation2 + $0x1028] sm:$0xff] }
 0x406   : > { %v2423_v24 = vmul.f32 %v6011_v0, %v2355_v40  ;;  %v6242_v34 = vpop.f32.mrf.mxu0  ;;  %v7346_v40 = vld [vmem:[#allocation27_spill] sm:$0xff] }
 0x407   : > { %7343 = vst [vmem:[#allocation127_spill] sm:$0xff] %v6242_v34  ;;  %v6244_v52 = vpop.f32.mrf.mxu1  ;;  %v6246_v1 = vpop.f32.mrf.mxu2  ;;  %v2096_v17 = vadd.f32 %v2064_v27, %v7346_v40 }
 0x408   : > { %7344 = vst [vmem:[#allocation101_spill] sm:$0xff] %v6244_v52  ;;  %v6248_v61 = vadd.f32 %v2423_v24, %v2095_v44  ;;  %3028 = vmatmul.f32.gmra.mxu3 %v2835_v8  ;;  %v7348_v52 = vld [vmem:[#allocation26_spill] sm:$0xff]  ;;  %v3196_v8 = vld [vmem:[#allocation2 + $0x1020] sm:$0xff] }
 0x409   : > { %3275 = vmatmul.f32.gmra.mxu0 %v3194_v28  ;;  %v2001_v34 = vadd.f32 %v7348_v52, %v7347_v2  ;;  %v7353_v2 = vld [vmem:[#allocation91_spill] sm:$0xff] }
 0x40a   : > { %7345 = vst [vmem:[#allocation131_spill] sm:$0xff] %v6248_v61  ;;  %3388 = vmatmul.f32.gmra.mxu1 %v3195_v20 }
 0x40b   : > { %v2357_v56 = vpop.f32.mrf.mxu3 }
 0x40c   : > { %v2358_v36 = vadd.f32 %v2357_v56, %v5984_v46  ;;  %2972 = vmatmul.f32.gmra.mxu2 %v2872_v51  ;;  %v2065_v46 = vmul.f32 %v5996_v29, %v2001_v34  ;;  %v2874_v56 = vld [vmem:[#allocation2 + $0xf50] sm:$0xff]  ;;  %v2839_v51 = vld [vmem:[#allocation2 + $0xe38] sm:$0xff] }
 0x40d   : > { %v3199_v34 = vld [vmem:[#allocation2 + $0x1038] sm:$0xff] }
 0x40e   : > { %v2424_v39 = vmul.f32 %v6011_v0, %v2358_v36  ;;  %v6256_v24 = vpop.f32.mrf.mxu0  ;;  %v7352_v36 = vld [vmem:[#allocation61_spill] sm:$0xff] }
 0x40f   : > { %7349 = vst [vmem:[#allocation54_spill] sm:$0xff] %v6256_v24  ;;  %v6258_v44 = vpop.f32.mrf.mxu1  ;;  %v6260_v28 = vpop.f32.mrf.mxu2  ;;  %v2097_v40 = vadd.f32 %v2065_v46, %v7352_v36 }
 0x410   : > { %7350 = vst [vmem:[#allocation55_spill] sm:$0xff] %v6258_v44  ;;  %v6262_v20 = vadd.f32 %v2424_v39, %v2096_v17  ;;  %3031 = vmatmul.f32.gmra.mxu3 %v2837_v63  ;;  %v7354_v44 = vld [vmem:[#allocation92_spill] sm:$0xff]  ;;  %v3198_v63 = vld [vmem:[#allocation2 + $0x1030] sm:$0xff] }
 0x411   : > { %3278 = vmatmul.f32.gmra.mxu0 %v3196_v8  ;;  %v2004_v24 = vadd.f32 %v7354_v44, %v7353_v2  ;;  %v7358_v2 = vld [vmem:[#allocation98_spill] sm:$0xff] }
 0x412   : > { %7351 = vst [vmem:[#allocation129_spill] sm:$0xff] %v6262_v20  ;;  %3391 = vmatmul.f32.gmra.mxu1 %v3197_v12 }
 0x413   : > { %v2360_v27 = vpop.f32.mrf.mxu3 }
 0x414   : > { %v2361_v52 = vadd.f32 %v2360_v27, %v6003_v6  ;;  %2975 = vmatmul.f32.gmra.mxu2 %v2874_v56  ;;  %v2066_v6 = vmul.f32 %v5996_v29, %v2004_v24  ;;  %v2876_v27 = vld [vmem:[#allocation2 + $0xf60] sm:$0xff]  ;;  %v2841_v56 = vld [vmem:[#allocation2 + $0xe48] sm:$0xff] }
 0x415   : > { %v3201_v24 = vld [vmem:[#allocation2 + $0x1048] sm:$0xff] }
 0x416   : > { %v2425_v61 = vmul.f32 %v6011_v0, %v2361_v52  ;;  %v6270_v39 = vpop.f32.mrf.mxu0  ;;  %v7357_v52 = vld [vmem:[#allocation29_spill] sm:$0xff] }
 0x417   : > { %7355 = vst [vmem:[#allocation130_spill] sm:$0xff] %v6270_v39  ;;  %v6272_v17 = vpop.f32.mrf.mxu1  ;;  %v6274_v8 = vpop.f32.mrf.mxu2  ;;  %v2098_v36 = vadd.f32 %v2066_v6, %v7357_v52  ;;  %v7362_v52 = vld [vmem:[#allocation95_spill] sm:$0xff] }
 0x418   : > { %7356 = vst [vmem:[#allocation105_spill] sm:$0xff] %v6272_v17  ;;  %v6276_v12 = vadd.f32 %v2425_v61, %v2097_v40  ;;  %3034 = vmatmul.f32.gmra.mxu3 %v2839_v51  ;;  %v7359_v17 = vld [vmem:[#allocation28_spill] sm:$0xff]  ;;  %v3200_v51 = vld [vmem:[#allocation2 + $0x1040] sm:$0xff] }
 0x419   : > { %3281 = vmatmul.f32.gmra.mxu0 %v3198_v63  ;;  %v2007_v39 = vadd.f32 %v7359_v17, %v7358_v2  ;;  %v7363_v2 = vld [vmem:[#allocation96_spill] sm:$0xff] }
 0x41a   : > { %3394 = vmatmul.f32.gmra.mxu1 %v3199_v34 }
 0x41b   : > { %v2363_v46 = vpop.f32.mrf.mxu3 }
 0x41c   : > { %v2364_v44 = vadd.f32 %v2363_v46, %v6022_v22  ;;  %2978 = vmatmul.f32.gmra.mxu2 %v2876_v27  ;;  %v2067_v22 = vmul.f32 %v5996_v29, %v2007_v39  ;;  %v2878_v46 = vld [vmem:[#allocation2 + $0xf70] sm:$0xff]  ;;  %v2843_v27 = vld [vmem:[#allocation2 + $0xe58] sm:$0xff] }
 0x41d   : > { %v3203_v39 = vld [vmem:[#allocation2 + $0x1058] sm:$0xff] }
 0x41e   : > { %v2426_v20 = vmul.f32 %v6011_v0, %v2364_v44  ;;  %v6284_v61 = vpop.f32.mrf.mxu0  ;;  %v2099_v44 = vadd.f32 %v2067_v22, %v5827_v23  ;;  %v2880_v22 = vld [vmem:[#allocation2 + $0xf80] sm:$0xff] }
 0x41f   : > { %7360 = vst [vmem:[#allocation134_spill] sm:$0xff] %v6284_v61  ;;  %v6286_v40 = vpop.f32.mrf.mxu1  ;;  %v6288_v63 = vpop.f32.mrf.mxu2 }
 0x420   : > { %7361 = vst [vmem:[#allocation57_spill] sm:$0xff] %v6286_v40  ;;  %v6290_v34 = vadd.f32 %v2426_v20, %v2098_v36  ;;  %3037 = vmatmul.f32.gmra.mxu3 %v2841_v56  ;;  %v2010_v40 = vadd.f32 %v7363_v2, %v7362_v52  ;;  %v3202_v56 = vld [vmem:[#allocation2 + $0x1050] sm:$0xff]  ;;  %v7366_v52 = vld [vmem:[#allocation62_spill] sm:$0xff] }
 0x421   : > { %3284 = vmatmul.f32.gmra.mxu0 %v3200_v51  ;;  %v7367_v2 = vld [vmem:[#allocation102_spill] sm:$0xff] }
 0x422   : > { %3397 = vmatmul.f32.gmra.mxu1 %v3201_v24 }
 0x423   : > { %v2366_v6 = vpop.f32.mrf.mxu3 }
 0x424   : > { %v2367_v17 = vadd.f32 %v2366_v6, %v6036_v55  ;;  %2981 = vmatmul.f32.gmra.mxu2 %v2878_v46  ;;  %v2068_v55 = vmul.f32 %v5996_v29, %v2010_v40  ;;  %v2845_v46 = vld [vmem:[#allocation2 + $0xe68] sm:$0xff] }
 0x425   : > { %v3205_v40 = vld [vmem:[#allocation2 + $0x1068] sm:$0xff] }
 0x426   : > { %v2427_v61 = vmul.f32 %v6011_v0, %v2367_v17  ;;  %v6298_v20 = vpop.f32.mrf.mxu0  ;;  %v2100_v17 = vadd.f32 %v2068_v55, %v5846_v11  ;;  %v2882_v55 = vld [vmem:[#allocation2 + $0xf90] sm:$0xff] }
 0x427   : > { %7364 = vst [vmem:[#allocation58_spill] sm:$0xff] %v6298_v20  ;;  %v6300_v36 = vpop.f32.mrf.mxu1  ;;  %v6302_v51 = vpop.f32.mrf.mxu2 }
 0x428   : > { %7365 = vst [vmem:[#allocation132_spill] sm:$0xff] %v6300_v36  ;;  %v6304_v24 = vadd.f32 %v2427_v61, %v2099_v44  ;;  %3040 = vmatmul.f32.gmra.mxu3 %v2843_v27  ;;  %v2013_v36 = vadd.f32 %v7367_v2, %v7366_v52  ;;  %v3204_v27 = vld [vmem:[#allocation2 + $0x1060] sm:$0xff]  ;;  %v7370_v52 = vld [vmem:[#allocation30_spill] sm:$0xff] }
 0x429   : > { %3287 = vmatmul.f32.gmra.mxu0 %v3202_v56  ;;  %v7371_v2 = vld [vmem:[#allocation31_spill] sm:$0xff] }
 0x42a   : > { %3400 = vmatmul.f32.gmra.mxu1 %v3203_v39 }
 0x42b   : > { %v2369_v23 = vpop.f32.mrf.mxu3 }
 0x42c   : > { %v2370_v6 = vadd.f32 %v2369_v23, %v6050_v33  ;;  %2984 = vmatmul.f32.gmra.mxu2 %v2880_v22  ;;  %v2069_v33 = vmul.f32 %v5996_v29, %v2013_v36  ;;  %v2847_v22 = vld [vmem:[#allocation2 + $0xe78] sm:$0xff] }
 0x42d   : > { %v3207_v36 = vld [vmem:[#allocation2 + $0x1078] sm:$0xff] }
 0x42e   : > { %v2428_v20 = vmul.f32 %v6011_v0, %v2370_v6  ;;  %v6312_v61 = vpop.f32.mrf.mxu0  ;;  %v2101_v6 = vadd.f32 %v2069_v33, %v5875_v54  ;;  %v2884_v33 = vld [vmem:[#allocation2 + $0xfa0] sm:$0xff] }
 0x42f   : > { %7368 = vst [vmem:[#allocation133_spill] sm:$0xff] %v6312_v61  ;;  %v6314_v44 = vpop.f32.mrf.mxu1  ;;  %v6316_v56 = vpop.f32.mrf.mxu2 }
 0x430   : > { %7369 = vst [vmem:[#allocation135_spill] sm:$0xff] %v6314_v44  ;;  %v6318_v39 = vadd.f32 %v2428_v20, %v2100_v17  ;;  %3043 = vmatmul.f32.gmra.mxu3 %v2845_v46  ;;  %v2016_v44 = vadd.f32 %v7371_v2, %v7370_v52  ;;  %v3206_v46 = vld [vmem:[#allocation2 + $0x1070] sm:$0xff]  ;;  %v2019_v52 = vadd.f32 %v5884_v16, %v5882_v7  ;;  %v2851_v16 = vld [vmem:[#allocation2 + $0xe98] sm:$0xff] }
 0x431   : > { %3290 = vmatmul.f32.gmra.mxu0 %v3204_v27 }
 0x432   : > { %3403 = vmatmul.f32.gmra.mxu1 %v3205_v40 }
 0x433   : > { %v2372_v11 = vpop.f32.mrf.mxu3 }
 0x434   : > { %v2373_v23 = vadd.f32 %v2372_v11, %v6064_v53  ;;  %2987 = vmatmul.f32.gmra.mxu2 %v2882_v55  ;;  %v2070_v53 = vmul.f32 %v5996_v29, %v2016_v44  ;;  %v2849_v55 = vld [vmem:[#allocation2 + $0xe88] sm:$0xff] }
 0x435   : > { %v3209_v44 = vld [vmem:[#allocation2 + $0x1088] sm:$0xff] }
 0x436   : > { %v2429_v61 = vmul.f32 %v6011_v0, %v2373_v23  ;;  %v6326_v20 = vpop.f32.mrf.mxu0  ;;  %v2102_v23 = vadd.f32 %v2070_v53, %v5888_v25  ;;  %v2886_v53 = vld [vmem:[#allocation2 + $0xfb0] sm:$0xff] }
 0x437   : > { %v6328_v17 = vpop.f32.mrf.mxu1  ;;  %v6330_v27 = vpop.f32.mrf.mxu2 }
 0x438   : > { %v6332_v40 = vadd.f32 %v2429_v61, %v2101_v6  ;;  %3046 = vmatmul.f32.gmra.mxu3 %v2847_v22  ;;  %v3208_v22 = vld [vmem:[#allocation2 + $0x1080] sm:$0xff] }
 0x439   : > { %3293 = vmatmul.f32.gmra.mxu0 %v3206_v46 }
 0x43a   : > { %3406 = vmatmul.f32.gmra.mxu1 %v3207_v36 }
 0x43b   : > { %v2375_v54 = vpop.f32.mrf.mxu3 }
 0x43c   : > { %v2376_v11 = vadd.f32 %v2375_v54, %v6078_v26  ;;  %2990 = vmatmul.f32.gmra.mxu2 %v2884_v33  ;;  %v2071_v26 = vmul.f32 %v5996_v29, %v2019_v52  ;;  %v7373_v33 = vld [vmem:[#allocation99_spill] sm:$0xff]  ;;  %v3211_v52 = vld [vmem:[#allocation2 + $0x1098] sm:$0xff] }
 0x43e   : > { %v2430_v2 = vmul.f32 %v6011_v0, %v2376_v11  ;;  %v6340_v61 = vpop.f32.mrf.mxu0  ;;  %v2103_v54 = vadd.f32 %v2071_v26, %v5902_v43  ;;  %v2022_v11 = vadd.f32 %v7373_v33, %v5896_v32  ;;  %v2888_v26 = vld [vmem:[#allocation2 + $0xfc0] sm:$0xff]  ;;  %v7377_v33 = vld [vmem:[#allocation65_spill] sm:$0xff] }
 0x43f   : > { %v6342_v6 = vpop.f32.mrf.mxu1  ;;  %v6344_v46 = vpop.f32.mrf.mxu2 }
 0x440   : > { %7372 = vst [vmem:[#allocation136_spill] sm:$0xff] %v6342_v6  ;;  %v6346_v36 = vadd.f32 %v2430_v2, %v2102_v23  ;;  %3049 = vmatmul.f32.gmra.mxu3 %v2849_v55  ;;  %v3210_v55 = vld [vmem:[#allocation2 + $0x1090] sm:$0xff] }
 0x441   : > { %3296 = vmatmul.f32.gmra.mxu0 %v3208_v22 }
 0x442   : > { %3409 = vmatmul.f32.gmra.mxu1 %v3209_v44 }
 0x443   : > { %v2378_v25 = vpop.f32.mrf.mxu3 }
 0x444   : > { %v2379_v7 = vadd.f32 %v2378_v25, %v6092_v5  ;;  %2993 = vmatmul.f32.gmra.mxu2 %v2886_v53  ;;  %v2072_v5 = vmul.f32 %v5996_v29, %v2022_v11  ;;  %v2853_v25 = vld [vmem:[#allocation2 + $0xea8] sm:$0xff] }
 0x445   : > { %v3213_v11 = vld [vmem:[#allocation2 + $0x10a8] sm:$0xff] }
 0x446   : > { %v2431_v6 = vmul.f32 %v6011_v0, %v2379_v7  ;;  %v6354_v23 = vpop.f32.mrf.mxu0  ;;  %v2104_v53 = vadd.f32 %v2072_v5, %v5916_v59  ;;  %v7376_v7 = vld [vmem:[#allocation100_spill] sm:$0xff]  ;;  %v2890_v5 = vld [vmem:[#allocation2 + $0xfd0] sm:$0xff] }
 0x447   : > { %7374 = vst [vmem:[#allocation137_spill] sm:$0xff] %v6354_v23  ;;  %v6356_v2 = vpop.f32.mrf.mxu1  ;;  %v6358_v22 = vpop.f32.mrf.mxu2 }
 0x448   : > { %7375 = vst [vmem:[#allocation138_spill] sm:$0xff] %v6356_v2  ;;  %v6360_v44 = vadd.f32 %v2431_v6, %v2103_v54  ;;  %3052 = vmatmul.f32.gmra.mxu3 %v2851_v16  ;;  %v2025_v2 = vadd.f32 %v7377_v33, %v7376_v7  ;;  %v3212_v16 = vld [vmem:[#allocation2 + $0x10a0] sm:$0xff]  ;;  %v7380_v7 = vld [vmem:[#allocation106_spill] sm:$0xff]  ;;  %v7381_v33 = vld [vmem:[#allocation32_spill] sm:$0xff] }
 0x449   : > { %3299 = vmatmul.f32.gmra.mxu0 %v3210_v55 }
 0x44a   : > { %3412 = vmatmul.f32.gmra.mxu1 %v3211_v52 }
 0x44b   : > { %v2381_v43 = vpop.f32.mrf.mxu3 }
 0x44c   : > { %v2382_v32 = vadd.f32 %v2381_v43, %v6106_v21  ;;  %2996 = vmatmul.f32.gmra.mxu2 %v2888_v26  ;;  %v2073_v21 = vmul.f32 %v5996_v29, %v2025_v2  ;;  %v2855_v26 = vld [vmem:[#allocation2 + $0xeb8] sm:$0xff] }
 0x44d   : > { %v3215_v2 = vld [vmem:[#allocation2 + $0x10b8] sm:$0xff] }
 0x44e   : > { %v2432_v23 = vmul.f32 %v6011_v0, %v2382_v32  ;;  %v6368_v6 = vpop.f32.mrf.mxu0  ;;  %v2105_v32 = vadd.f32 %v2073_v21, %v5930_v3  ;;  %v2892_v21 = vld [vmem:[#allocation2 + $0xfe0] sm:$0xff] }
 0x44f   : > { %7378 = vst [vmem:[#allocation139_spill] sm:$0xff] %v6368_v6  ;;  %v6370_v54 = vpop.f32.mrf.mxu1  ;;  %v6372_v55 = vpop.f32.mrf.mxu2 }
 0x450   : > { %7379 = vst [vmem:[#allocation140_spill] sm:$0xff] %v6370_v54  ;;  %v6374_v52 = vadd.f32 %v2432_v23, %v2104_v53  ;;  %3055 = vmatmul.f32.gmra.mxu3 %v2853_v25  ;;  %v2028_v54 = vadd.f32 %v7381_v33, %v7380_v7  ;;  %v3214_v25 = vld [vmem:[#allocation2 + $0x10b0] sm:$0xff]  ;;  %v7385_v33 = vld [vmem:[#allocation103_spill] sm:$0xff] }
 0x451   : > { %3302 = vmatmul.f32.gmra.mxu0 %v3212_v16  ;;  %v7384_v7 = vld [vmem:[#allocation33_spill] sm:$0xff] }
 0x452   : > { %3415 = vmatmul.f32.gmra.mxu1 %v3213_v11 }
 0x453   : > { %v2384_v59 = vpop.f32.mrf.mxu3 }
 0x454   : > { %v2385_v43 = vadd.f32 %v2384_v59, %v6120_v4  ;;  %2999 = vmatmul.f32.gmra.mxu2 %v2890_v5  ;;  %v2074_v4 = vmul.f32 %v5996_v29, %v2028_v54  ;;  %v2857_v5 = vld [vmem:[#allocation2 + $0xec8] sm:$0xff] }
 0x455   : > { %v3217_v29 = vld [vmem:[#allocation2 + $0x10c8] sm:$0xff] }
 0x456   : > { %v2433_v6 = vmul.f32 %v6011_v0, %v2385_v43  ;;  %v6382_v23 = vpop.f32.mrf.mxu0  ;;  %v2106_v43 = vadd.f32 %v2074_v4, %v5944_v9  ;;  %v4207_v9 = vld [vmem:[%s6908_s2 + $0x4] ss:$0 sm:$0xff] }
 0x457   : > { %7382 = vst [vmem:[#allocation141_spill] sm:$0xff] %v6382_v23  ;;  %v6384_v53 = vpop.f32.mrf.mxu1  ;;  %v6386_v16 = vpop.f32.mrf.mxu2 }
 0x458   : > { %7383 = vst [vmem:[#allocation142_spill] sm:$0xff] %v6384_v53  ;;  %v6388_v11 = vadd.f32 %v2433_v6, %v2105_v32  ;;  %3058 = vmatmul.f32.gmra.mxu3 %v2855_v26  ;;  %v2031_v53 = vadd.f32 %v7385_v33, %v7384_v7  ;;  %v3216_v26 = vld [vmem:[#allocation2 + $0x10c0] sm:$0xff]  ;;  %v7389_v7 = vld [vmem:[#allocation69_spill] sm:$0xff] }
 0x459   : > { %3305 = vmatmul.f32.gmra.mxu0 %v3214_v25 }
 0x45a   : > { %3418 = vmatmul.f32.gmra.mxu1 %v3215_v2 }
 0x45b   : > { %v2387_v3 = vpop.f32.mrf.mxu3 }
 0x45c   : > { %v2388_v59 = vadd.f32 %v2387_v3, %v6134_v60  ;;  %3002 = vmatmul.f32.gmra.mxu2 %v2892_v21  ;;  %v2075_v60 = vmul.f32 %v4207_v9, %v2031_v53  ;;  %v2859_v3 = vld [vmem:[#allocation2 + $0xed8] sm:$0xff]  ;;  %v3218_v53 = vld [vmem:[#allocation2 + $0x10d0] sm:$0xff] }
 0x45e   : > { %v2434_v23 = vmul.f32 %v6011_v0, %v2388_v59  ;;  %v6396_v6 = vpop.f32.mrf.mxu0  ;;  %v2894_v0 = vld [vmem:[#allocation2 + $0xff0] sm:$0xff]  ;;  %v2107_v21 = vadd.f32 %v2075_v60, %v5958_v13  ;;  %v7388_v59 = vld [vmem:[#allocation104_spill] sm:$0xff] }
 0x45f   : > { %7386 = vst [vmem:[#allocation143_spill] sm:$0xff] %v6396_v6  ;;  %v6398_v32 = vpop.f32.mrf.mxu1  ;;  %v6400_v54 = vpop.f32.mrf.mxu2 }
 0x460   : > { %7387 = vst [vmem:[#allocation144_spill] sm:$0xff] %v6398_v32  ;;  %v6402_v25 = vadd.f32 %v2434_v23, %v2106_v43  ;;  %3061 = vmatmul.f32.gmra.mxu3 %v2857_v5  ;;  %v2034_v23 = vadd.f32 %v7389_v7, %v7388_v59  ;;  %v4208_v5 = vld [vmem:[%s6908_s2 + $0x5] ss:$0 sm:$0xff]  ;;  %v2037_v59 = vadd.f32 %v5968_v19, %v5966_v42 }
 0x461   : > { %3308 = vmatmul.f32.gmra.mxu0 %v3216_v26  ;;  %v2040_v19 = vadd.f32 %v5982_v35, %v5980_v30  ;;  %v7392_v35 = vld [vmem:[#allocation109_spill] sm:$0xff] }
 0x462   : > { %3421 = vmatmul.f32.gmra.mxu1 %v3217_v29  ;;  %v3219_v29 = vld [vmem:[#allocation2 + $0x10d8] sm:$0xff]  ;;  %v2076_v13 = vmul.f32 %v4207_v9, %v2034_v23 }
 0x463   : > { %v2390_v2 = vpop.f32.mrf.mxu3 }
 0x464   : > { %v2391_v4 = vadd.f32 %v2390_v2, %v6148_v37  ;;  %3005 = vmatmul.f32.gmra.mxu2 %v2894_v0  ;;  %v2861_v0 = vld [vmem:[#allocation2 + $0xee8] sm:$0xff] }
 0x466   : > { %v2435_v43 = vmul.f32 %v4208_v5, %v2391_v4  ;;  %v6414_v33 = vpop.f32.mrf.mxu0  ;;  %v2108_v4 = vadd.f32 %v2076_v13, %v5972_v45 }
 0x467   : > { %7390 = vst [vmem:[#allocation145_spill] sm:$0xff] %v6414_v33  ;;  %v6416_v26 = vpop.f32.mrf.mxu1  ;;  %v6418_v32 = vpop.f32.mrf.mxu2  ;;  %v3220_v33 = vld [vmem:[#allocation2 + $0x10e0] sm:$0xff] }
 0x468   : > { %7391 = vst [vmem:[#allocation146_spill] sm:$0xff] %v6416_v26  ;;  %v6420_v37 = vadd.f32 %v2435_v43, %v2107_v21  ;;  %3064 = vmatmul.f32.gmra.mxu3 %v2859_v3  ;;  %v3221_v21 = vld [vmem:[#allocation2 + $0x10e8] sm:$0xff] }
 0x469   : > { %3311 = vmatmul.f32.gmra.mxu0 %v3218_v53  ;;  %v2863_v53 = vld [vmem:[#allocation2 + $0xef8] sm:$0xff] }
 0x46a   : > { %3424 = vmatmul.f32.gmra.mxu1 %v3219_v29 }
 0x46b   : > { %v2393_v60 = vpop.f32.mrf.mxu3 }
 0x46c   : > { %v2394_v2 = vadd.f32 %v2393_v60, %v6162_v50  ;;  %v2077_v50 = vmul.f32 %v4207_v9, %v2037_v59  ;;  %v3222_v60 = vld [vmem:[#allocation2 + $0x10f0] sm:$0xff] }
 0x46e   : > { %v2436_v7 = vmul.f32 %v4208_v5, %v2394_v2  ;;  %v6426_v26 = vpop.f32.mrf.mxu0  ;;  %v2109_v42 = vadd.f32 %v2077_v50, %v5986_v15  ;;  %v6453_v50 = vld [vmem:[%s6908_s2 + $0x6] ss:$0 sm:$0xff] }
 0x46f   : > { %v6428_v6 = vpop.f32.mrf.mxu1  ;;  %v6430_v3 = vpop.f32.mrf.mxu2 }
 0x470   : > { %v6432_v23 = vadd.f32 %v2436_v7, %v2108_v4  ;;  %3067 = vmatmul.f32.gmra.mxu3 %v2861_v0  ;;  %v3223_v4 = vld [vmem:[#allocation2 + $0x10f8] sm:$0xff]  ;;  %v2865_v7 = vld [vmem:[#allocation2 + $0xf08] sm:$0xff] }
 0x471   : > { %3314 = vmatmul.f32.gmra.mxu0 %v3220_v33 }
 0x472   : > { %3427 = vmatmul.f32.gmra.mxu1 %v3221_v21  ;;  %v2667_v21 = vadd.f32 %v7392_v35, %v5999_v48  ;;  %v6461_v48 = vld [vmem:[%s6908_s2 + $0x7] ss:$0 sm:$0xff] }
 0x473   : > { %v2396_v43 = vpop.f32.mrf.mxu3 }
 0x474   : > { %v2397_v45 = vadd.f32 %v2396_v43, %v6176_v58  ;;  %v2078_v58 = vmul.f32 %v4207_v9, %v2040_v19  ;;  %v3225_v9 = vld [vmem:[#allocation2 + $0x1108] sm:$0xff] }
 0x476   : > { %v2437_v29 = vmul.f32 %v4208_v5, %v2397_v45  ;;  %v6438_v13 = vpop.f32.mrf.mxu0  ;;  %v2110_v30 = vadd.f32 %v2078_v58, %v6005_v31  ;;  %v2867_v58 = vld [vmem:[#allocation2 + $0xf18] sm:$0xff] }
 0x477   : > { %v6440_v2 = vpop.f32.mrf.mxu1  ;;  %v6444_v33 = vpop.f32.mrf.mxu2 }
 0x478   : > { %v6442_v0 = vadd.f32 %v2437_v29, %v2109_v42  ;;  %3070 = vmatmul.f32.gmra.mxu3 %v2863_v53  ;;  %v3224_v53 = vld [vmem:[#allocation2 + $0x1100] sm:$0xff] }
 0x479   : > { %3317 = vmatmul.f32.gmra.mxu0 %v3222_v60 }
 0x47a   : > { %3430 = vmatmul.f32.gmra.mxu1 %v3223_v4 }
 0x47b   : > { %v2399_v59 = vpop.f32.mrf.mxu3 }
 0x47c   : > { %v2400_v15 = vadd.f32 %v2399_v59, %v6190_v47  ;;  %v2767_v47 = vmul.f32 %v6453_v50, %v2667_v21  ;;  %v3226_v21 = vld [vmem:[#allocation2 + $0x1110] sm:$0xff] }
 0x47e   : > { %v2438_v43 = vmul.f32 %v4208_v5, %v2400_v15  ;;  %v3273_v45 = vpop.f32.mrf.mxu0  ;;  %v6466_v5 = vld [vmem:[%s6908_s2 + $0x8] ss:$0 sm:$0xff]  ;;  %v2799_v59 = vadd.f32 %v2767_v47, %v6024_v38  ;;  %v2670_v15 = vadd.f32 %v6020_v57, %v6018_v14 }
 0x47f   : > { %v3386_v42 = vpop.f32.mrf.mxu1  ;;  %v6468_v60 = vpop.f32.mrf.mxu2  ;;  %v2869_v57 = vld [vmem:[#allocation2 + $0xf28] sm:$0xff] }
 0x480   : > { %v6455_v19 = vadd.f32 %v2438_v43, %v2110_v30  ;;  %3073 = vmatmul.f32.gmra.mxu3 %v2865_v7  ;;  %v3387_v31 = vadd.f32 %v3386_v42, %v3273_v45  ;;  %v3227_v45 = vld [vmem:[#allocation2 + $0x1118] sm:$0xff] }
 0x481   : > { %3320 = vmatmul.f32.gmra.mxu0 %v3224_v53 }
 0x482   : > { %7393 = vst [vmem:[#allocation147_spill] sm:$0xff] %v6455_v19  ;;  %3433 = vmatmul.f32.gmra.mxu1 %v3225_v9  ;;  %v3487_v30 = vmul.f32 %v6466_v5, %v3387_v31  ;;  %v7394_v31 = vld [vmem:[#allocation107_spill] sm:$0xff] }
 0x483   : > { %v3026_v29 = vpop.f32.mrf.mxu3 }
 0x484   : > { %v3027_v4 = vadd.f32 %v3026_v29, %v6204_v62  ;;  %v2768_v62 = vmul.f32 %v6453_v50, %v2670_v15 }
 0x486   : > { %v3127_v7 = vmul.f32 %v6461_v48, %v3027_v4  ;;  %v3276_v35 = vpop.f32.mrf.mxu0  ;;  %v2800_v29 = vadd.f32 %v2768_v62, %v7394_v31  ;;  %v7395_v4 = vld [vmem:[#allocation34_spill] sm:$0xff]  ;;  %v7397_v31 = vld [vmem:[#allocation36_spill] sm:$0xff] }
 0x487   : > { %v3389_v43 = vpop.f32.mrf.mxu1  ;;  %v6479_v47 = vpop.f32.mrf.mxu2 }
 0x488   : > { %v3159_v53 = vadd.f32 %v3127_v7, %v2799_v59  ;;  %3076 = vmatmul.f32.gmra.mxu3 %v2867_v58  ;;  %v3390_v9 = vadd.f32 %v3389_v43, %v3276_v35  ;;  %v7396_v59 = vld [vmem:[#allocation35_spill] sm:$0xff]  ;;  %v3229_v43 = vld [vmem:[#allocation2 + $0x1128] sm:$0xff] }
 0x489   : > { %3323 = vmatmul.f32.gmra.mxu0 %v3226_v21  ;;  %v2673_v58 = vadd.f32 %v7396_v59, %v7395_v4  ;;  %v3228_v35 = vld [vmem:[#allocation2 + $0x1120] sm:$0xff]  ;;  %v7398_v4 = vld [vmem:[#allocation108_spill] sm:$0xff]  ;;  %v7399_v59 = vld [vmem:[#allocation73_spill] sm:$0xff] }
 0x48a   : > { %v3519_v42 = vadd.f32 %v3487_v30, %v3159_v53  ;;  %3436 = vmatmul.f32.gmra.mxu1 %v3227_v45  ;;  %v3488_v15 = vmul.f32 %v6466_v5, %v3390_v9  ;;  %v2676_v19 = vadd.f32 %v7399_v59, %v7398_v4  ;;  %v7402_v4 = vld [vmem:[#allocation110_spill] sm:$0xff] }
 0x48b   : > { %v3029_v38 = vpop.f32.mrf.mxu3 }
 0x48c   : > { %v3030_v14 = vadd.f32 %v3029_v38, %v6218_v41  ;;  %4025 = vmatmul.msk.f32.vlgmr.msra.gmra.mxu2 %vm3552_vm1, %v3519_v42  ;;  %v2769_v41 = vmul.f32 %v6453_v50, %v2673_v58  ;;  %v3230_v58 = vld [vmem:[#allocation2 + $0x1130] sm:$0xff] }
 0x48e   : > { %v3128_v7 = vmul.f32 %v6461_v48, %v3030_v14  ;;  %v3279_v30 = vpop.f32.mrf.mxu0  ;;  %v2871_v14 = vld [vmem:[#allocation2 + $0xf38] sm:$0xff]  ;;  %v2801_v9 = vadd.f32 %v2769_v41, %v7397_v31  ;;  %v7401_v31 = vld [vmem:[#allocation37_spill] sm:$0xff] }
 0x48f   : > { %v3392_v21 = vpop.f32.mrf.mxu1  ;;  %v2679_v59 = vadd.f32 %v7402_v4, %v7401_v31  ;;  %v7405_v31 = vld [vmem:[#allocation38_spill] sm:$0xff] }
 0x490   : > { %v3160_v45 = vadd.f32 %v3128_v7, %v2800_v29  ;;  %3079 = vmatmul.f32.gmra.mxu3 %v2869_v57  ;;  %v3393_v42 = vadd.f32 %v3392_v21, %v3279_v30  ;;  %v3231_v30 = vld [vmem:[#allocation2 + $0x1138] sm:$0xff] }
 0x491   : > { %3326 = vmatmul.f32.gmra.mxu0 %v3228_v35  ;;  %v6494_v35 = vpop.f32.mrf.mxu2 }
 0x492   : > { %v3520_v53 = vadd.f32 %v3488_v15, %v3160_v45  ;;  %3439 = vmatmul.f32.gmra.mxu1 %v3229_v43  ;;  %v3489_v57 = vmul.f32 %v6466_v5, %v3393_v42  ;;  %v2873_v42 = vld [vmem:[#allocation2 + $0xf48] sm:$0xff] }
 0x493   : > { %v3032_v62 = vpop.f32.mrf.mxu3 }
 0x494   : > { %v3033_v38 = vadd.f32 %v3032_v62, %v6232_v18  ;;  %4026 = vmatmul.msk.f32.gmra.mxu2 %vm3552_vm1, %v3520_v53  ;;  %v2770_v18 = vmul.f32 %v6453_v50, %v2676_v19  ;;  %v7400_v62 = vld [vmem:[#allocation111_spill] sm:$0xff] }
 0x495   : > { %v3232_v19 = vld [vmem:[#allocation2 + $0x1140] sm:$0xff] }
 0x496   : > { %v3129_v29 = vmul.f32 %v6461_v48, %v3033_v38  ;;  %v3282_v7 = vpop.f32.mrf.mxu0  ;;  %v2802_v38 = vadd.f32 %v2770_v18, %v7400_v62  ;;  %v7404_v62 = vld [vmem:[#allocation77_spill] sm:$0xff] }
 0x497   : > { %v3395_v15 = vpop.f32.mrf.mxu1 }
 0x498   : > { %v3161_v21 = vadd.f32 %v3129_v29, %v2801_v9  ;;  %3082 = vmatmul.f32.gmra.mxu3 %v2871_v14  ;;  %v3396_v45 = vadd.f32 %v3395_v15, %v3282_v7  ;;  %v3233_v7 = vld [vmem:[#allocation2 + $0x1148] sm:$0xff]  ;;  %v2771_v15 = vmul.f32 %v6453_v50, %v2679_v59  ;;  %v3234_v59 = vld [vmem:[#allocation2 + $0x1150] sm:$0xff] }
 0x499   : > { %3329 = vmatmul.f32.gmra.mxu0 %v3230_v58 }
 0x49a   : > { %v3521_v43 = vadd.f32 %v3489_v57, %v3161_v21  ;;  %3442 = vmatmul.f32.gmra.mxu1 %v3231_v30  ;;  %v3490_v14 = vmul.f32 %v6466_v5, %v3396_v45  ;;  %v2875_v45 = vld [vmem:[#allocation2 + $0xf58] sm:$0xff] }
 0x49b   : > { %v3035_v41 = vpop.f32.mrf.mxu3 }
 0x49c   : > { %v3036_v53 = vadd.f32 %v3035_v41, %v6246_v1  ;;  %4027 = vmatmul.msk.f32.gmra.mxu2 %vm3552_vm1, %v3521_v43  ;;  %v6504_v1 = vpop.f32.mrf.mxu2  ;;  %v7403_v41 = vld [vmem:[#allocation39_spill] sm:$0xff] }
 0x49e   : > { %v3130_v9 = vmul.f32 %v6461_v48, %v3036_v53  ;;  %v3285_v29 = vpop.f32.mrf.mxu0  ;;  %v2803_v53 = vadd.f32 %v2771_v15, %v7403_v41  ;;  %v7407_v41 = vld [vmem:[#allocation112_spill] sm:$0xff] }
 0x49f   : > { %v3398_v57 = vpop.f32.mrf.mxu1 }
 0x4a0   : > { %v3162_v58 = vadd.f32 %v3130_v9, %v2802_v38  ;;  %3085 = vmatmul.f32.gmra.mxu3 %v2873_v42  ;;  %v3399_v21 = vadd.f32 %v3398_v57, %v3285_v29  ;;  %v2682_v38 = vadd.f32 %v7405_v31, %v7404_v62  ;;  %v3235_v29 = vld [vmem:[#allocation2 + $0x1158] sm:$0xff]  ;;  %v7408_v62 = vld [vmem:[#allocation113_spill] sm:$0xff] }
 0x4a1   : > { %3332 = vmatmul.f32.gmra.mxu0 %v3232_v19 }
 0x4a2   : > { %v3522_v30 = vadd.f32 %v3490_v14, %v3162_v58  ;;  %3445 = vmatmul.f32.gmra.mxu1 %v3233_v7  ;;  %v3491_v4 = vmul.f32 %v6466_v5, %v3399_v21  ;;  %v2877_v21 = vld [vmem:[#allocation2 + $0xf68] sm:$0xff] }
 0x4a3   : > { %v3038_v18 = vpop.f32.mrf.mxu3 }
 0x4a4   : > { %v3039_v43 = vadd.f32 %v3038_v18, %v6260_v28  ;;  %4028 = vmatmul.msk.f32.gmra.mxu2 %vm3552_vm1, %v3522_v30  ;;  %v2772_v28 = vmul.f32 %v6453_v50, %v2682_v38  ;;  %v6515_v15 = vpop.f32.mrf.mxu2  ;;  %v7406_v18 = vld [vmem:[#allocation81_spill] sm:$0xff] }
 0x4a6   : > { %v3131_v42 = vmul.f32 %v6461_v48, %v3039_v43  ;;  %v3288_v9 = vpop.f32.mrf.mxu0  ;;  %v2804_v43 = vadd.f32 %v2772_v28, %v7406_v18  ;;  %v7410_v18 = vld [vmem:[#allocation116_spill] sm:$0xff] }
 0x4a7   : > { %v3401_v14 = vpop.f32.mrf.mxu1 }
 0x4a8   : > { %v3163_v19 = vadd.f32 %v3131_v42, %v2803_v53  ;;  %3088 = vmatmul.f32.gmra.mxu3 %v2875_v45  ;;  %v3402_v7 = vadd.f32 %v3401_v14, %v3288_v9  ;;  %v2685_v53 = vadd.f32 %v7408_v62, %v7407_v41  ;;  %v3236_v42 = vld [vmem:[#allocation2 + $0x1160] sm:$0xff]  ;;  %v3237_v9 = vld [vmem:[#allocation2 + $0x1168] sm:$0xff] }
 0x4a9   : > { %3335 = vmatmul.f32.gmra.mxu0 %v3234_v59  ;;  %v7411_v41 = vld [vmem:[#allocation40_spill] sm:$0xff] }
 0x4aa   : > { %v3523_v57 = vadd.f32 %v3491_v4, %v3163_v19  ;;  %3448 = vmatmul.f32.gmra.mxu1 %v3235_v29  ;;  %v3492_v31 = vmul.f32 %v6466_v5, %v3402_v7  ;;  %v7409_v7 = vld [vmem:[#allocation41_spill] sm:$0xff] }
 0x4ab   : > { %v3041_v58 = vpop.f32.mrf.mxu3 }
 0x4ac   : > { %v3042_v30 = vadd.f32 %v3041_v58, %v6274_v8  ;;  %4029 = vmatmul.msk.f32.gmra.mxu2 %vm3552_vm1, %v3523_v57  ;;  %v2773_v8 = vmul.f32 %v6453_v50, %v2685_v53  ;;  %v2879_v57 = vld [vmem:[#allocation2 + $0xf78] sm:$0xff]  ;;  %v6527_v58 = vpop.f32.mrf.mxu2 }
 0x4ae   : > { %v3132_v45 = vmul.f32 %v6461_v48, %v3042_v30  ;;  %v3291_v38 = vpop.f32.mrf.mxu0  ;;  %v2805_v30 = vadd.f32 %v2773_v8, %v7409_v7  ;;  %v7414_v7 = vld [vmem:[#allocation115_spill] sm:$0xff] }
 0x4af   : > { %v3404_v4 = vpop.f32.mrf.mxu1 }
 0x4b0   : > { %v3164_v59 = vadd.f32 %v3132_v45, %v2804_v43  ;;  %3091 = vmatmul.f32.gmra.mxu3 %v2877_v21  ;;  %v3405_v29 = vadd.f32 %v3404_v4, %v3291_v38  ;;  %v2688_v43 = vadd.f32 %v7411_v41, %v7410_v18  ;;  %v3238_v45 = vld [vmem:[#allocation2 + $0x1170] sm:$0xff]  ;;  %v3239_v38 = vld [vmem:[#allocation2 + $0x1178] sm:$0xff] }
 0x4b1   : > { %3338 = vmatmul.f32.gmra.mxu0 %v3236_v42 }
 0x4b2   : > { %v3524_v14 = vadd.f32 %v3492_v31, %v3164_v59  ;;  %3451 = vmatmul.f32.gmra.mxu1 %v3237_v9  ;;  %v3493_v62 = vmul.f32 %v6466_v5, %v3405_v29 }
 0x4b3   : > { %v3044_v19 = vpop.f32.mrf.mxu3 }
 0x4b4   : > { %v3045_v28 = vadd.f32 %v3044_v19, %v6288_v63  ;;  %4030 = vmatmul.msk.f32.gmra.mxu2 %vm3552_vm1, %v3524_v14  ;;  %v2774_v63 = vmul.f32 %v6453_v50, %v2688_v43  ;;  %v2881_v14 = vld [vmem:[#allocation2 + $0xf88] sm:$0xff]  ;;  %v7412_v19 = vld [vmem:[#allocation85_spill] sm:$0xff]  ;;  %v3240_v43 = vld [vmem:[#allocation2 + $0x1180] sm:$0xff] }
 0x4b6   : > { %v3133_v21 = vmul.f32 %v6461_v48, %v3045_v28  ;;  %v3294_v53 = vpop.f32.mrf.mxu0  ;;  %v2806_v29 = vadd.f32 %v2774_v63, %v7412_v19  ;;  %v7413_v28 = vld [vmem:[#allocation114_spill] sm:$0xff] }
 0x4b7   : > { %v3407_v31 = vpop.f32.mrf.mxu1  ;;  %v2691_v18 = vadd.f32 %v7414_v7, %v7413_v28  ;;  %v7417_v19 = vld [vmem:[#allocation42_spill] sm:$0xff] }
 0x4b8   : > { %v3165_v42 = vadd.f32 %v3133_v21, %v2805_v30  ;;  %3094 = vmatmul.f32.gmra.mxu3 %v2879_v57  ;;  %v3408_v9 = vadd.f32 %v3407_v31, %v3294_v53  ;;  %v6542_v53 = vpop.f32.mrf.mxu2 }
 0x4b9   : > { %3341 = vmatmul.f32.gmra.mxu0 %v3238_v45 }
 0x4ba   : > { %v3525_v4 = vadd.f32 %v3493_v62, %v3165_v42  ;;  %3454 = vmatmul.f32.gmra.mxu1 %v3239_v38  ;;  %v3494_v57 = vmul.f32 %v6466_v5, %v3408_v9  ;;  %v3241_v62 = vld [vmem:[#allocation2 + $0x1188] sm:$0xff]  ;;  %v7415_v9 = vld [vmem:[#allocation43_spill] sm:$0xff] }
 0x4bb   : > { %v3047_v59 = vpop.f32.mrf.mxu3 }
 0x4bc   : > { %v3048_v8 = vadd.f32 %v3047_v59, %v6302_v51  ;;  %4031 = vmatmul.msk.f32.gmra.mxu2 %vm3552_vm1, %v3525_v4  ;;  %v2775_v51 = vmul.f32 %v6453_v50, %v2691_v18  ;;  %v2883_v4 = vld [vmem:[#allocation2 + $0xf98] sm:$0xff]  ;;  %v3242_v18 = vld [vmem:[#allocation2 + $0x1190] sm:$0xff] }
 0x4be   : > { %v3134_v30 = vmul.f32 %v6461_v48, %v3048_v8  ;;  %v3297_v41 = vpop.f32.mrf.mxu0  ;;  %v2807_v59 = vadd.f32 %v2775_v51, %v7415_v9  ;;  %v7416_v8 = vld [vmem:[#allocation119_spill] sm:$0xff]  ;;  %v7420_v9 = vld [vmem:[#allocation118_spill] sm:$0xff] }
 0x4bf   : > { %v3410_v21 = vpop.f32.mrf.mxu1  ;;  %v2694_v28 = vadd.f32 %v7417_v19, %v7416_v8 }
 0x4c0   : > { %v3166_v45 = vadd.f32 %v3134_v30, %v2806_v29  ;;  %3097 = vmatmul.f32.gmra.mxu3 %v2881_v14  ;;  %v3411_v38 = vadd.f32 %v3410_v21, %v3297_v41 }
 0x4c1   : > { %3344 = vmatmul.f32.gmra.mxu0 %v3240_v43  ;;  %v2776_v43 = vmul.f32 %v6453_v50, %v2694_v28  ;;  %v3244_v28 = vld [vmem:[#allocation2 + $0x11a0] sm:$0xff] }
 0x4c2   : > { %v3526_v31 = vadd.f32 %v3494_v57, %v3166_v45  ;;  %3457 = vmatmul.f32.gmra.mxu1 %v3241_v62  ;;  %v3495_v14 = vmul.f32 %v6466_v5, %v3411_v38  ;;  %v3243_v57 = vld [vmem:[#allocation2 + $0x1198] sm:$0xff]  ;;  %v7418_v38 = vld [vmem:[#allocation89_spill] sm:$0xff] }
 0x4c3   : > { %v3050_v42 = vpop.f32.mrf.mxu3 }
 0x4c4   : > { %v3051_v63 = vadd.f32 %v3050_v42, %v6316_v56  ;;  %4032 = vmatmul.msk.f32.gmra.mxu2 %vm3552_vm1, %v3526_v31  ;;  %v6552_v56 = vpop.f32.mrf.mxu2  ;;  %v2885_v31 = vld [vmem:[#allocation2 + $0xfa8] sm:$0xff]  ;;  %v2808_v42 = vadd.f32 %v2776_v43, %v7418_v38  ;;  %v7423_v38 = vld [vmem:[#allocation45_spill] sm:$0xff] }
 0x4c6   : > { %v3135_v29 = vmul.f32 %v6461_v48, %v3051_v63  ;;  %v3300_v7 = vpop.f32.mrf.mxu0  ;;  %v7419_v63 = vld [vmem:[#allocation117_spill] sm:$0xff] }
 0x4c7   : > { %v3413_v30 = vpop.f32.mrf.mxu1 }
 0x4c8   : > { %v3167_v41 = vadd.f32 %v3135_v29, %v2807_v59  ;;  %3100 = vmatmul.f32.gmra.mxu3 %v2883_v4  ;;  %v3414_v62 = vadd.f32 %v3413_v30, %v3300_v7  ;;  %v2697_v59 = vadd.f32 %v7420_v9, %v7419_v63 }
 0x4c9   : > { %3347 = vmatmul.f32.gmra.mxu0 %v3242_v18 }
 0x4ca   : > { %v3527_v21 = vadd.f32 %v3495_v14, %v3167_v41  ;;  %3460 = vmatmul.f32.gmra.mxu1 %v3243_v57  ;;  %v3496_v8 = vmul.f32 %v6466_v5, %v3414_v62  ;;  %v3245_v14 = vld [vmem:[#allocation2 + $0x11a8] sm:$0xff]  ;;  %v7421_v62 = vld [vmem:[#allocation46_spill] sm:$0xff] }
 0x4cb   : > { %v3053_v45 = vpop.f32.mrf.mxu3 }
 0x4cc   : > { %v3054_v51 = vadd.f32 %v3053_v45, %v6330_v27  ;;  %4033 = vmatmul.msk.f32.gmra.mxu2 %vm3552_vm1, %v3527_v21  ;;  %v2777_v27 = vmul.f32 %v6453_v50, %v2697_v59  ;;  %v6563_v41 = vpop.f32.mrf.mxu2  ;;  %v2887_v21 = vld [vmem:[#allocation2 + $0xfb8] sm:$0xff]  ;;  %v3246_v59 = vld [vmem:[#allocation2 + $0x11b0] sm:$0xff] }
 0x4ce   : > { %v3136_v4 = vmul.f32 %v6461_v48, %v3054_v51  ;;  %v3303_v19 = vpop.f32.mrf.mxu0  ;;  %v2809_v45 = vadd.f32 %v2777_v27, %v7421_v62  ;;  %v7422_v51 = vld [vmem:[#allocation122_spill] sm:$0xff]  ;;  %v2889_v27 = vld [vmem:[#allocation2 + $0xfc8] sm:$0xff] }
 0x4cf   : > { %v3416_v29 = vpop.f32.mrf.mxu1 }
 0x4d0   : > { %v3168_v7 = vadd.f32 %v3136_v4, %v2808_v42  ;;  %3103 = vmatmul.f32.gmra.mxu3 %v2885_v31  ;;  %v3417_v30 = vadd.f32 %v3416_v29, %v3303_v19  ;;  %v2700_v42 = vadd.f32 %v7423_v38, %v7422_v51  ;;  %v3248_v38 = vld [vmem:[#allocation2 + $0x11c0] sm:$0xff] }
 0x4d1   : > { %3350 = vmatmul.f32.gmra.mxu0 %v3244_v28 }
 0x4d2   : > { %v3528_v18 = vadd.f32 %v3496_v8, %v3168_v7  ;;  %3463 = vmatmul.f32.gmra.mxu1 %v3245_v14  ;;  %v3497_v63 = vmul.f32 %v6466_v5, %v3417_v30  ;;  %v3247_v8 = vld [vmem:[#allocation2 + $0x11b8] sm:$0xff] }
 0x4d3   : > { %v3056_v57 = vpop.f32.mrf.mxu3 }
 0x4d4   : > { %v3057_v43 = vadd.f32 %v3056_v57, %v6344_v46  ;;  %4034 = vmatmul.msk.f32.gmra.mxu2 %vm3552_vm1, %v3528_v18  ;;  %v2778_v46 = vmul.f32 %v6453_v50, %v2700_v42  ;;  %v6575_v18 = vpop.f32.mrf.mxu2  ;;  %v7424_v57 = vld [vmem:[#allocation120_spill] sm:$0xff] }
 0x4d6   : > { %v3137_v31 = vmul.f32 %v6461_v48, %v3057_v43  ;;  %v3306_v9 = vpop.f32.mrf.mxu0  ;;  %v2810_v30 = vadd.f32 %v2778_v46, %v6178_v49  ;;  %v7425_v43 = vld [vmem:[#allocation121_spill] sm:$0xff] }
 0x4d7   : > { %v3419_v4 = vpop.f32.mrf.mxu1  ;;  %v2703_v62 = vadd.f32 %v7425_v43, %v7424_v57  ;;  %v7426_v46 = vld [vmem:[#allocation93_spill] sm:$0xff] }
 0x4d8   : > { %v3169_v19 = vadd.f32 %v3137_v31, %v2809_v45  ;;  %3106 = vmatmul.f32.gmra.mxu3 %v2887_v21  ;;  %v3420_v29 = vadd.f32 %v3419_v4, %v3306_v9  ;;  %v3249_v31 = vld [vmem:[#allocation2 + $0x11c8] sm:$0xff] }
 0x4d9   : > { %3353 = vmatmul.f32.gmra.mxu0 %v3246_v59 }
 0x4da   : > { %v3529_v28 = vadd.f32 %v3497_v63, %v3169_v19  ;;  %3466 = vmatmul.f32.gmra.mxu1 %v3247_v8  ;;  %v3498_v45 = vmul.f32 %v6466_v5, %v3420_v29  ;;  %v2891_v8 = vld [vmem:[#allocation2 + $0xfd8] sm:$0xff] }
 0x4db   : > { %v3059_v14 = vpop.f32.mrf.mxu3 }
 0x4dc   : > { %v3060_v7 = vadd.f32 %v3059_v14, %v6358_v22  ;;  %4035 = vmatmul.msk.f32.gmra.mxu2 %vm3552_vm1, %v3529_v28  ;;  %v2779_v22 = vmul.f32 %v6453_v50, %v2703_v62  ;;  %v7427_v28 = vld [vmem:[#allocation125_spill] sm:$0xff]  ;;  %v6590_v43 = vpop.f32.mrf.mxu2  ;;  %v3251_v62 = vld [vmem:[#allocation2 + $0x11d8] sm:$0xff] }
 0x4dd   : > { %v2706_v29 = vadd.f32 %v7427_v28, %v7426_v46  ;;  %v3253_v28 = vld [vmem:[#allocation2 + $0x11e8] sm:$0xff] }
 0x4de   : > { %v3138_v21 = vmul.f32 %v6461_v48, %v3060_v7  ;;  %v3309_v51 = vpop.f32.mrf.mxu0  ;;  %v2811_v19 = vadd.f32 %v2779_v22, %v6192_v10  ;;  %v7429_v22 = vld [vmem:[#allocation48_spill] sm:$0xff] }
 0x4df   : > { %v3422_v42 = vpop.f32.mrf.mxu1 }
 0x4e0   : > { %v3170_v63 = vadd.f32 %v3138_v21, %v2810_v30  ;;  %3109 = vmatmul.f32.gmra.mxu3 %v2889_v27  ;;  %v3423_v59 = vadd.f32 %v3422_v42, %v3309_v51  ;;  %v3250_v30 = vld [vmem:[#allocation2 + $0x11d0] sm:$0xff]  ;;  %v2893_v42 = vld [vmem:[#allocation2 + $0xfe8] sm:$0xff] }
 0x4e1   : > { %3356 = vmatmul.f32.gmra.mxu0 %v3248_v38 }
 0x4e2   : > { %v3530_v9 = vadd.f32 %v3498_v45, %v3170_v63  ;;  %3469 = vmatmul.f32.gmra.mxu1 %v3249_v31  ;;  %v3499_v7 = vmul.f32 %v6466_v5, %v3423_v59  ;;  %v7428_v31 = vld [vmem:[#allocation123_spill] sm:$0xff] }
 0x4e3   : > { %v3062_v49 = vpop.f32.mrf.mxu3 }
 0x4e4   : > { %v3063_v4 = vadd.f32 %v3062_v49, %v6372_v55  ;;  %4036 = vmatmul.msk.f32.gmra.mxu2 %vm3552_vm1, %v3530_v9  ;;  %v2780_v55 = vmul.f32 %v6453_v50, %v2706_v29  ;;  %v7430_v9 = vld [vmem:[#allocation49_spill] sm:$0xff] }
 0x4e5   : > { %v2709_v59 = vadd.f32 %v7430_v9, %v7429_v22  ;;  %v3255_v9 = vld [vmem:[#allocation2 + $0x11f8] sm:$0xff] }
 0x4e6   : > { %v3139_v14 = vmul.f32 %v6461_v48, %v3063_v4  ;;  %v3312_v27 = vpop.f32.mrf.mxu0  ;;  %v2812_v63 = vadd.f32 %v2780_v55, %v7428_v31 }
 0x4e7   : > { %v3425_v57 = vpop.f32.mrf.mxu1 }
 0x4e8   : > { %v3171_v21 = vadd.f32 %v3139_v14, %v2811_v19  ;;  %3112 = vmatmul.f32.gmra.mxu3 %v2891_v8  ;;  %v3426_v10 = vadd.f32 %v3425_v57, %v3312_v27  ;;  %v3252_v19 = vld [vmem:[#allocation2 + $0x11e0] sm:$0xff]  ;;  %v6600_v14 = vpop.f32.mrf.mxu2 }
 0x4e9   : > { %3359 = vmatmul.f32.gmra.mxu0 %v3250_v30 }
 0x4ea   : > { %v3531_v45 = vadd.f32 %v3499_v7, %v3171_v21  ;;  %3472 = vmatmul.f32.gmra.mxu1 %v3251_v62  ;;  %v3500_v4 = vmul.f32 %v6466_v5, %v3426_v10  ;;  %v2895_v62 = vld [vmem:[#allocation2 + $0xff8] sm:$0xff]  ;;  %v7431_v21 = vld [vmem:[#allocation128_spill] sm:$0xff]  ;;  %v7433_v10 = vld [vmem:[#allocation97_spill] sm:$0xff] }
 0x4eb   : > { %v3065_v51 = vpop.f32.mrf.mxu3 }
 0x4ec   : > { %v3066_v38 = vadd.f32 %v3065_v51, %v6386_v16  ;;  %4037 = vmatmul.msk.f32.gmra.mxu2 %vm3552_vm1, %v3531_v45  ;;  %v2781_v16 = vmul.f32 %v6453_v50, %v2709_v59  ;;  %v7432_v45 = vld [vmem:[#allocation124_spill] sm:$0xff] }
 0x4ed   : > { %v2712_v51 = vadd.f32 %v7433_v10, %v7432_v45 }
 0x4ee   : > { %v3140_v49 = vmul.f32 %v6461_v48, %v3066_v38  ;;  %v3315_v8 = vpop.f32.mrf.mxu0  ;;  %v2813_v55 = vadd.f32 %v2781_v16, %v7431_v21  ;;  %v7435_v16 = vld [vmem:[#allocation51_spill] sm:$0xff] }
 0x4ef   : > { %v3428_v46 = vpop.f32.mrf.mxu1 }
 0x4f0   : > { %v3172_v29 = vadd.f32 %v3140_v49, %v2812_v63  ;;  %3115 = vmatmul.f32.gmra.mxu3 %v2893_v42  ;;  %v3429_v27 = vadd.f32 %v3428_v46, %v3315_v8  ;;  %v3254_v63 = vld [vmem:[#allocation2 + $0x11f0] sm:$0xff] }
 0x4f1   : > { %3362 = vmatmul.f32.gmra.mxu0 %v3252_v19  ;;  %v6611_v19 = vpop.f32.mrf.mxu2 }
 0x4f2   : > { %v3532_v7 = vadd.f32 %v3500_v4, %v3172_v29  ;;  %3475 = vmatmul.f32.gmra.mxu1 %v3253_v28  ;;  %v3501_v42 = vmul.f32 %v6466_v5, %v3429_v27  ;;  %v7434_v28 = vld [vmem:[#allocation126_spill] sm:$0xff] }
 0x4f3   : > { %v3068_v30 = vpop.f32.mrf.mxu3 }
 0x4f4   : > { %v3069_v57 = vadd.f32 %v3068_v30, %v6400_v54  ;;  %4038 = vmatmul.msk.f32.gmra.mxu2 %vm3552_vm1, %v3532_v7  ;;  %v2782_v54 = vmul.f32 %v6453_v50, %v2712_v51  ;;  %v7436_v7 = vld [vmem:[#allocation52_spill] sm:$0xff] }
 0x4f5   : > { %v2715_v27 = vadd.f32 %v7436_v7, %v7435_v16 }
 0x4f6   : > { %v3141_v38 = vmul.f32 %v6461_v48, %v3069_v57  ;;  %v3318_v31 = vpop.f32.mrf.mxu0  ;;  %v2814_v29 = vadd.f32 %v2782_v54, %v7434_v28 }
 0x4f7   : > { %v3431_v22 = vpop.f32.mrf.mxu1  ;;  %v2783_v45 = vmul.f32 %v6453_v50, %v2715_v27  ;;  %v6633_v27 = vld [vmem:[#allocation6] ss:$0 sm:$0xff] }
 0x4f8   : > { %v3173_v59 = vadd.f32 %v3141_v38, %v2813_v55  ;;  %3118 = vmatmul.f32.gmra.mxu3 %v2895_v62  ;;  %v3432_v4 = vadd.f32 %v3431_v22, %v3318_v31  ;;  %v7437_v31 = vld [vmem:[#allocation131_spill] sm:$0xff] }
 0x4f9   : > { %3365 = vmatmul.f32.gmra.mxu0 %v3254_v63  ;;  %v2815_v63 = vadd.f32 %v2783_v45, %v7437_v31  ;;  %v7438_v22 = vld [vmem:[#allocation127_spill] sm:$0xff] }
 0x4fa   : > { %v3533_v49 = vadd.f32 %v3501_v42, %v3173_v59  ;;  %3478 = vmatmul.f32.gmra.mxu1 %v3255_v9  ;;  %v3502_v57 = vmul.f32 %v6466_v5, %v3432_v4  ;;  %v6623_v42 = vpop.f32.mrf.mxu2  ;;  %v7439_v9 = vld [vmem:[#allocation101_spill] sm:$0xff] }
 0x4fb   : > { %v3071_v8 = vpop.f32.mrf.mxu3  ;;  %v2718_v59 = vadd.f32 %v7439_v9, %v7438_v22 }
 0x4fc   : > { %v3072_v46 = vadd.f32 %v3071_v8, %v6418_v32  ;;  %4039 = vmatmul.msk.f32.gmra.mxu2 %vm3552_vm1, %v3533_v49 }
 0x4fd   : > { %v2784_v28 = vmul.f32 %v6453_v50, %v2718_v59 }
 0x4fe   : > { %v3142_v30 = vmul.f32 %v6461_v48, %v3072_v46  ;;  %v3321_v62 = vpop.f32.mrf.mxu0 }
 0x4ff   : > { %v3434_v21 = vpop.f32.mrf.mxu1 }
 0x500   : > { %v3174_v55 = vadd.f32 %v3142_v30, %v2814_v29  ;;  %v3435_v51 = vadd.f32 %v3434_v21, %v3321_v62  ;;  %v7440_v30 = vld [vmem:[#allocation129_spill] sm:$0xff]  ;;  %v7441_v62 = vld [vmem:[#allocation54_spill] sm:$0xff]  ;;  %v7442_v21 = vld [vmem:[#allocation55_spill] sm:$0xff] }
 0x502   : > { %v3534_v10 = vadd.f32 %v3502_v57, %v3174_v55  ;;  %v3503_v49 = vmul.f32 %v6466_v5, %v3435_v51  ;;  %v2816_v57 = vadd.f32 %v2784_v28, %v7440_v30  ;;  %v2721_v55 = vadd.f32 %v7442_v21, %v7441_v62  ;;  %v6640_v51 = vld [vmem:[#allocation7] ss:$0 sm:$0xff]  ;;  %v7443_v28 = vld [vmem:[#allocation130_spill] sm:$0xff] }
 0x503   : > { %v3074_v38 = vpop.f32.mrf.mxu3 }
 0x504   : > { %v3075_v32 = vadd.f32 %v3074_v38, %v6430_v3  ;;  %4040 = vmatmul.msk.f32.gmra.mxu2 %vm3552_vm1, %v3534_v10  ;;  %v2785_v22 = vmul.f32 %v6453_v50, %v2721_v55 }
 0x506   : > { %v3143_v54 = vmul.f32 %v6461_v48, %v3075_v32  ;;  %v3324_v4 = vpop.f32.mrf.mxu0 }
 0x507   : > { %v3437_v8 = vpop.f32.mrf.mxu1 }
 0x508   : > { %v3175_v46 = vadd.f32 %v3143_v54, %v2815_v63  ;;  %v3438_v3 = vadd.f32 %v3437_v8, %v3324_v4 }
 0x50a   : > { %v3535_v29 = vadd.f32 %v3503_v49, %v3175_v46  ;;  %v3504_v10 = vmul.f32 %v6466_v5, %v3438_v3  ;;  %v2817_v46 = vadd.f32 %v2785_v22, %v6276_v12  ;;  %v7446_v22 = vld [vmem:[#allocation57_spill] sm:$0xff] }
 0x50b   : > { %v3077_v16 = vpop.f32.mrf.mxu3 }
 0x50c   : > { %v3078_v7 = vadd.f32 %v3077_v16, %v6444_v33  ;;  %4041 = vmatmul.msk.f32.gmra.mxu2 %vm3552_vm1, %v3535_v29  ;;  %v7444_v29 = vld [vmem:[#allocation105_spill] sm:$0xff] }
 0x50d   : > { %v2724_v3 = vadd.f32 %v7444_v29, %v7443_v28 }
 0x50e   : > { %v3144_v45 = vmul.f32 %v6461_v48, %v3078_v7  ;;  %v3327_v38 = vpop.f32.mrf.mxu0 }
 0x50f   : > { %v3670_v32 = vpop.f32.mrf.mxu2  ;;  %v3440_v31 = vpop.f32.mrf.mxu1  ;;  %v2786_v55 = vmul.f32 %v6453_v50, %v2724_v3 }
 0x510   : > { %v3176_v33 = vadd.f32 %v3144_v45, %v2816_v57  ;;  %v3770_v63 = vmul.f32 %v6633_v27, %v3670_v32  ;;  %v3441_v54 = vadd.f32 %v3440_v31, %v3327_v38 }
 0x512   : > { %v3536_v9 = vadd.f32 %v3504_v10, %v3176_v33  ;;  %v3806_v59 = vadd.f32 %v6640_v51, %v3770_v63  ;;  %v3505_v7 = vmul.f32 %v6466_v5, %v3441_v54  ;;  %v2818_v33 = vadd.f32 %v2786_v55, %v6290_v34  ;;  %v7445_v63 = vld [vmem:[#allocation134_spill] sm:$0xff] }
 0x513   : > { %v3080_v49 = vpop.f32.mrf.mxu3 }
 0x514   : > { %v3838_v4 = vmax.f32 %v3806_v59, 0.0  ;;  %v3081_v8 = vadd.f32 %v3080_v49, %v6468_v60  ;;  %4042 = vmatmul.msk.f32.gmra.mxu2 %vm3552_vm1, %v3536_v9  ;;  %v2727_v9 = vadd.f32 %v7446_v22, %v7445_v63 }
 0x516   : > { %3871 = vst.msk [vmem:[%s6650_s16] sm:$0xff] %vm3870_vm2, %v3838_v4  ;;  %v3145_v16 = vmul.f32 %v6461_v48, %v3081_v8  ;;  %v3330_v30 = vpop.f32.mrf.mxu0  ;;  %v2787_v28 = vmul.f32 %v6453_v50, %v2727_v9 }
 0x517   : > { %v3673_v57 = vpop.f32.mrf.mxu2  ;;  %v3443_v62 = vpop.f32.mrf.mxu1 }
 0x518   : > { %v3177_v21 = vadd.f32 %v3145_v16, %v2817_v46  ;;  %v3771_v60 = vmul.f32 %v6633_v27, %v3673_v57  ;;  %v3444_v10 = vadd.f32 %v3443_v62, %v3330_v30  ;;  %v2819_v57 = vadd.f32 %v2787_v28, %v6304_v24  ;;  %v7447_v62 = vld [vmem:[#allocation58_spill] sm:$0xff] }
 0x51a   : > { %v3537_v45 = vadd.f32 %v3505_v7, %v3177_v21  ;;  %v3807_v12 = vadd.f32 %v6640_v51, %v3771_v60  ;;  %v3506_v54 = vmul.f32 %v6466_v5, %v3444_v10  ;;  %v7448_v21 = vld [vmem:[#allocation132_spill] sm:$0xff] }
 0x51b   : > { %v3083_v38 = vpop.f32.mrf.mxu3  ;;  %v2730_v60 = vadd.f32 %v7448_v21, %v7447_v62 }
 0x51c   : > { %v3839_v32 = vmax.f32 %v3807_v12, 0.0  ;;  %v3084_v31 = vadd.f32 %v3083_v38, %v6479_v47  ;;  %4043 = vmatmul.msk.f32.gmra.mxu2 %vm3552_vm1, %v3537_v45 }
 0x51e   : > { %3872 = vst.msk [vmem:[%s6650_s16 + $0x8] sm:$0xff] %vm3870_vm2, %v3839_v32  ;;  %v3146_v59 = vmul.f32 %v6461_v48, %v3084_v31  ;;  %v3333_v49 = vpop.f32.mrf.mxu0  ;;  %v2788_v31 = vmul.f32 %v6453_v50, %v2730_v60 }
 0x51f   : > { %v3676_v4 = vpop.f32.mrf.mxu2  ;;  %v3446_v8 = vpop.f32.mrf.mxu1 }
 0x520   : > { %v3178_v46 = vadd.f32 %v3146_v59, %v2818_v33  ;;  %v3772_v47 = vmul.f32 %v6633_v27, %v3676_v4  ;;  %v3447_v3 = vadd.f32 %v3446_v8, %v3333_v49  ;;  %v7449_v49 = vld [vmem:[#allocation133_spill] sm:$0xff]  ;;  %v7450_v4 = vld [vmem:[#allocation135_spill] sm:$0xff] }
 0x521   : > { %v2733_v8 = vadd.f32 %v7450_v4, %v7449_v49 }
 0x522   : > { %v3538_v29 = vadd.f32 %v3506_v54, %v3178_v46  ;;  %v3808_v34 = vadd.f32 %v6640_v51, %v3772_v47  ;;  %v3507_v45 = vmul.f32 %v6466_v5, %v3447_v3  ;;  %v2820_v54 = vadd.f32 %v2788_v31, %v6318_v39 }
 0x523   : > { %v3086_v16 = vpop.f32.mrf.mxu3 }
 0x524   : > { %v3840_v7 = vmax.f32 %v3808_v34, 0.0  ;;  %v3087_v30 = vadd.f32 %v3086_v16, %v6494_v35  ;;  %4044 = vmatmul.msk.f32.gmra.mxu2 %vm3552_vm1, %v3538_v29  ;;  %v2789_v16 = vmul.f32 %v6453_v50, %v2733_v8 }
 0x526   : > { %3873 = vst.msk [vmem:[%s6650_s16 + $0x10] sm:$0xff] %vm3870_vm2, %v3840_v7  ;;  %v3147_v55 = vmul.f32 %v6461_v48, %v3087_v30  ;;  %v3336_v12 = vpop.f32.mrf.mxu0  ;;  %v2821_v60 = vadd.f32 %v2789_v16, %v6332_v40 }
 0x527   : > { %v3679_v10 = vpop.f32.mrf.mxu2  ;;  %v3449_v38 = vpop.f32.mrf.mxu1 }
 0x528   : > { %v3179_v32 = vadd.f32 %v3147_v55, %v2819_v57  ;;  %v3773_v35 = vmul.f32 %v6633_v27, %v3679_v10  ;;  %v3450_v63 = vadd.f32 %v3449_v38, %v3336_v12  ;;  %v2736_v55 = vadd.f32 %v6328_v17, %v6326_v20 }
 0x52a   : > { %v3539_v33 = vadd.f32 %v3507_v45, %v3179_v32  ;;  %v3809_v24 = vadd.f32 %v6640_v51, %v3773_v35  ;;  %v3508_v47 = vmul.f32 %v6466_v5, %v3450_v63  ;;  %v2790_v31 = vmul.f32 %v6453_v50, %v2736_v55 }
 0x52b   : > { %v3089_v22 = vpop.f32.mrf.mxu3 }
 0x52c   : > { %v3841_v9 = vmax.f32 %v3809_v24, 0.0  ;;  %v3090_v59 = vadd.f32 %v3089_v22, %v6504_v1  ;;  %4045 = vmatmul.msk.f32.gmra.mxu2 %vm3552_vm1, %v3539_v33  ;;  %v2822_v22 = vadd.f32 %v2790_v31, %v6346_v36 }
 0x52e   : > { %3874 = vst.msk [vmem:[%s6650_s16 + $0x18] sm:$0xff] %vm3870_vm2, %v3841_v9  ;;  %v3148_v46 = vmul.f32 %v6461_v48, %v3090_v59  ;;  %v3339_v28 = vpop.f32.mrf.mxu0  ;;  %v7451_v9 = vld [vmem:[#allocation136_spill] sm:$0xff] }
 0x52f   : > { %v3682_v29 = vpop.f32.mrf.mxu2  ;;  %v3452_v34 = vpop.f32.mrf.mxu1  ;;  %v2739_v59 = vadd.f32 %v7451_v9, %v6340_v61 }
 0x530   : > { %v3180_v3 = vadd.f32 %v3148_v46, %v2820_v54  ;;  %v3774_v1 = vmul.f32 %v6633_v27, %v3682_v29  ;;  %v3453_v30 = vadd.f32 %v3452_v34, %v3339_v28 }
 0x531   : > { %v2791_v28 = vmul.f32 %v6453_v50, %v2739_v59 }
 0x532   : > { %v3540_v7 = vadd.f32 %v3508_v47, %v3180_v3  ;;  %v3810_v39 = vadd.f32 %v6640_v51, %v3774_v1  ;;  %v3509_v12 = vmul.f32 %v6466_v5, %v3453_v30 }
 0x533   : > { %v3092_v57 = vpop.f32.mrf.mxu3  ;;  %v2823_v16 = vadd.f32 %v2791_v28, %v6360_v44  ;;  %v7456_v28 = vld [vmem:[#allocation141_spill] sm:$0xff] }
 0x534   : > { %v3842_v62 = vmax.f32 %v3810_v39, 0.0  ;;  %v3093_v21 = vadd.f32 %v3092_v57, %v6515_v15  ;;  %4046 = vmatmul.msk.f32.gmra.mxu2 %vm3552_vm1, %v3540_v7  ;;  %v7452_v7 = vld [vmem:[#allocation137_spill] sm:$0xff]  ;;  %v7453_v39 = vld [vmem:[#allocation138_spill] sm:$0xff] }
 0x535   : > { %v2742_v30 = vadd.f32 %v7453_v39, %v7452_v7 }
 0x536   : > { %3875 = vst.msk [vmem:[%s6650_s16 + $0x20] sm:$0xff] %vm3870_vm2, %v3842_v62  ;;  %v3149_v45 = vmul.f32 %v6461_v48, %v3093_v21  ;;  %v3342_v10 = vpop.f32.mrf.mxu0 }
 0x537   : > { %v3685_v38 = vpop.f32.mrf.mxu2  ;;  %v3455_v32 = vpop.f32.mrf.mxu1 }
 0x538   : > { %v3181_v35 = vadd.f32 %v3149_v45, %v2821_v60  ;;  %v3775_v15 = vmul.f32 %v6633_v27, %v3685_v38  ;;  %v3456_v24 = vadd.f32 %v3455_v32, %v3342_v10 }
 0x53a   : > { %v3541_v33 = vadd.f32 %v3509_v12, %v3181_v35  ;;  %v3811_v40 = vadd.f32 %v6640_v51, %v3775_v15  ;;  %v3510_v49 = vmul.f32 %v6466_v5, %v3456_v24  ;;  %v2792_v12 = vmul.f32 %v6453_v50, %v2742_v30 }
 0x53b   : > { %v3095_v20 = vpop.f32.mrf.mxu3 }
 0x53c   : > { %v3843_v17 = vmax.f32 %v3811_v40, 0.0  ;;  %v3096_v63 = vadd.f32 %v3095_v20, %v6527_v58  ;;  %4047 = vmatmul.msk.f32.gmra.mxu2 %vm3552_vm1, %v3541_v33  ;;  %v2824_v31 = vadd.f32 %v2792_v12, %v6374_v52  ;;  %v7454_v33 = vld [vmem:[#allocation139_spill] sm:$0xff]  ;;  %v7455_v40 = vld [vmem:[#allocation140_spill] sm:$0xff] }
 0x53d   : > { %v2745_v24 = vadd.f32 %v7455_v40, %v7454_v33 }
 0x53e   : > { %3876 = vst.msk [vmem:[%s6650_s16 + $0x28] sm:$0xff] %vm3870_vm2, %v3843_v17  ;;  %v3150_v54 = vmul.f32 %v6461_v48, %v3096_v63  ;;  %v3345_v4 = vpop.f32.mrf.mxu0 }
 0x53f   : > { %v3688_v8 = vpop.f32.mrf.mxu2  ;;  %v3458_v46 = vpop.f32.mrf.mxu1 }
 0x540   : > { %v3182_v47 = vadd.f32 %v3150_v54, %v2822_v22  ;;  %v3776_v58 = vmul.f32 %v6633_v27, %v3688_v8  ;;  %v3459_v34 = vadd.f32 %v3458_v46, %v3345_v4  ;;  %v2793_v54 = vmul.f32 %v6453_v50, %v2745_v24 }
 0x542   : > { %v3542_v29 = vadd.f32 %v3510_v49, %v3182_v47  ;;  %v3812_v36 = vadd.f32 %v6640_v51, %v3776_v58  ;;  %v3511_v62 = vmul.f32 %v6466_v5, %v3459_v34  ;;  %v2825_v58 = vadd.f32 %v2793_v54, %v6388_v11  ;;  %v6761_v11 = vld [vmem:[%s6908_s2 + $0x6] ss:$0 sm:$0xff] }
 0x543   : > { %v3098_v61 = vpop.f32.mrf.mxu3 }
 0x544   : > { %v3844_v3 = vmax.f32 %v3812_v36, 0.0  ;;  %v3099_v1 = vadd.f32 %v3098_v61, %v6542_v53  ;;  %4048 = vmatmul.msk.f32.gmra.mxu2 %vm3552_vm1, %v3542_v29  ;;  %v7457_v29 = vld [vmem:[#allocation142_spill] sm:$0xff] }
 0x545   : > { %v2748_v36 = vadd.f32 %v7457_v29, %v7456_v28 }
 0x546   : > { %3877 = vst.msk [vmem:[%s6650_s16 + $0x30] sm:$0xff] %vm3870_vm2, %v3844_v3  ;;  %v3151_v57 = vmul.f32 %v6461_v48, %v3099_v1  ;;  %v3348_v21 = vpop.f32.mrf.mxu0 }
 0x547   : > { %v3691_v60 = vpop.f32.mrf.mxu2  ;;  %v3461_v55 = vpop.f32.mrf.mxu1  ;;  %v2794_v7 = vmul.f32 %v6761_v11, %v2748_v36 }
 0x548   : > { %v3183_v45 = vadd.f32 %v3151_v57, %v2823_v16  ;;  %v3777_v53 = vmul.f32 %v6633_v27, %v3691_v60  ;;  %v3462_v38 = vadd.f32 %v3461_v55, %v3348_v21  ;;  %v7458_v60 = vld [vmem:[#allocation143_spill] sm:$0xff]  ;;  %v7459_v55 = vld [vmem:[#allocation144_spill] sm:$0xff] }
 0x549   : > { %v2826_v21 = vadd.f32 %v2794_v7, %v6402_v25 }
 0x54a   : > { %v3543_v10 = vadd.f32 %v3511_v62, %v3183_v45  ;;  %v3813_v44 = vadd.f32 %v6640_v51, %v3777_v53  ;;  %v3512_v17 = vmul.f32 %v6466_v5, %v3462_v38  ;;  %v2751_v45 = vadd.f32 %v7459_v55, %v7458_v60  ;;  %v6775_v53 = vld [vmem:[%s6908_s2 + $0x7] ss:$0 sm:$0xff] }
 0x54b   : > { %v3101_v32 = vpop.f32.mrf.mxu3 }
 0x54c   : > { %v3845_v35 = vmax.f32 %v3813_v44, 0.0  ;;  %v3102_v15 = vadd.f32 %v3101_v32, %v6552_v56  ;;  %4049 = vmatmul.msk.f32.gmra.mxu2 %vm3552_vm1, %v3543_v10 }
 0x54e   : > { %3878 = vst.msk [vmem:[%s6650_s16 + $0x38] sm:$0xff] %vm3870_vm2, %v3845_v35  ;;  %v3152_v20 = vmul.f32 %v6461_v48, %v3102_v15  ;;  %v3351_v63 = vpop.f32.mrf.mxu0  ;;  %v2795_v15 = vmul.f32 %v6761_v11, %v2751_v45 }
 0x54f   : > { %v3694_v22 = vpop.f32.mrf.mxu2  ;;  %v3464_v9 = vpop.f32.mrf.mxu1 }
 0x550   : > { %v3184_v59 = vadd.f32 %v3152_v20, %v2824_v31  ;;  %v3778_v56 = vmul.f32 %v6633_v27, %v3694_v22  ;;  %v3465_v4 = vadd.f32 %v3464_v9, %v3351_v63  ;;  %v2827_v63 = vadd.f32 %v2795_v15, %v6420_v37  ;;  %v7460_v22 = vld [vmem:[#allocation145_spill] sm:$0xff]  ;;  %v7461_v9 = vld [vmem:[#allocation146_spill] sm:$0xff] }
 0x552   : > { %v3544_v49 = vadd.f32 %v3512_v17, %v3184_v59  ;;  %v3814_v52 = vadd.f32 %v6640_v51, %v3778_v56  ;;  %v3513_v50 = vmul.f32 %v6466_v5, %v3465_v4  ;;  %v2754_v59 = vadd.f32 %v7461_v9, %v7460_v22 }
 0x553   : > { %v3104_v8 = vpop.f32.mrf.mxu3 }
 0x554   : > { %v3846_v46 = vmax.f32 %v3814_v52, 0.0  ;;  %v3105_v47 = vadd.f32 %v3104_v8, %v6563_v41  ;;  %4050 = vmatmul.msk.f32.gmra.mxu2 %vm3552_vm1, %v3544_v49 }
 0x556   : > { %3879 = vst.msk [vmem:[%s6650_s16 + $0x40] sm:$0xff] %vm3870_vm2, %v3846_v46  ;;  %v3153_v34 = vmul.f32 %v6461_v48, %v3105_v47  ;;  %v3354_v61 = vpop.f32.mrf.mxu0  ;;  %v2796_v46 = vmul.f32 %v6761_v11, %v2754_v59 }
 0x557   : > { %v3697_v3 = vpop.f32.mrf.mxu2  ;;  %v3467_v1 = vpop.f32.mrf.mxu1 }
 0x558   : > { %v3185_v16 = vadd.f32 %v3153_v34, %v2825_v58  ;;  %v3779_v41 = vmul.f32 %v6633_v27, %v3697_v3  ;;  %v3468_v48 = vadd.f32 %v3467_v1, %v3354_v61  ;;  %v2828_v34 = vadd.f32 %v2796_v46, %v6432_v23 }
 0x55a   : > { %v3545_v39 = vadd.f32 %v3513_v50, %v3185_v16  ;;  %v3815_v30 = vadd.f32 %v6640_v51, %v3779_v41  ;;  %v2757_v50 = vadd.f32 %v6428_v6, %v6426_v26 }
 0x55b   : > { %v3107_v57 = vpop.f32.mrf.mxu3 }
 0x55c   : > { %v3847_v5 = vmax.f32 %v3815_v30, 0.0  ;;  %v3108_v62 = vadd.f32 %v3107_v57, %v6575_v18  ;;  %4051 = vmatmul.msk.f32.gmra.mxu2 %vm3552_vm1, %v3545_v39  ;;  %v6781_v18 = vld [vmem:[%s6908_s2 + $0x8] ss:$0 sm:$0xff]  ;;  %v2797_v39 = vmul.f32 %v6761_v11, %v2757_v50 }
 0x55d   : > { %v3514_v10 = vmul.f32 %v6781_v18, %v3468_v48 }
 0x55e   : > { %3880 = vst.msk [vmem:[%s6650_s16 + $0x48] sm:$0xff] %vm3870_vm2, %v3847_v5  ;;  %v3154_v12 = vmul.f32 %v6775_v53, %v3108_v62  ;;  %v3357_v25 = vpop.f32.mrf.mxu0  ;;  %v2829_v5 = vadd.f32 %v2797_v39, %v6442_v0  ;;  %v2760_v62 = vadd.f32 %v6440_v2, %v6438_v13 }
 0x55f   : > { %v3700_v44 = vpop.f32.mrf.mxu2  ;;  %v3470_v38 = vpop.f32.mrf.mxu1 }
 0x560   : > { %v3186_v32 = vadd.f32 %v3154_v12, %v2826_v21  ;;  %v3780_v35 = vmul.f32 %v6633_v27, %v3700_v44  ;;  %v3471_v40 = vadd.f32 %v3470_v38, %v3357_v25  ;;  %v2798_v25 = vmul.f32 %v6761_v11, %v2760_v62 }
 0x562   : > { %v3546_v31 = vadd.f32 %v3514_v10, %v3186_v32  ;;  %v3816_v33 = vadd.f32 %v6640_v51, %v3780_v35  ;;  %v3515_v54 = vmul.f32 %v6781_v18, %v3471_v40  ;;  %v7462_v35 = vld [vmem:[#allocation147_spill] sm:$0xff] }
 0x563   : > { %v3110_v24 = vpop.f32.mrf.mxu3  ;;  %v2830_v15 = vadd.f32 %v2798_v25, %v7462_v35 }
 0x564   : > { %v3848_v20 = vmax.f32 %v3816_v33, 0.0  ;;  %v3111_v17 = vadd.f32 %v3110_v24, %v6590_v43  ;;  %4052 = vmatmul.msk.f32.gmra.mxu2 %vm3552_vm1, %v3546_v31 }
 0x566   : > { %3881 = vst.msk [vmem:[%s6650_s16 + $0x50] sm:$0xff] %vm3870_vm2, %v3848_v20  ;;  %v3155_v56 = vmul.f32 %v6775_v53, %v3111_v17  ;;  %v3360_v49 = vpop.f32.mrf.mxu0 }
 0x567   : > { %v3703_v52 = vpop.f32.mrf.mxu2  ;;  %v3473_v4 = vpop.f32.mrf.mxu1 }
 0x568   : > { %v3187_v8 = vadd.f32 %v3155_v56, %v2827_v63  ;;  %v3781_v43 = vmul.f32 %v6633_v27, %v3703_v52  ;;  %v3474_v58 = vadd.f32 %v3473_v4, %v3360_v49 }
 0x56a   : > { %v3547_v47 = vadd.f32 %v3515_v54, %v3187_v8  ;;  %v3817_v37 = vadd.f32 %v6640_v51, %v3781_v43  ;;  %v3516_v3 = vmul.f32 %v6781_v18, %v3474_v58 }
 0x56b   : > { %v3113_v28 = vpop.f32.mrf.mxu3 }
 0x56c   : > { %v3849_v29 = vmax.f32 %v3817_v37, 0.0  ;;  %v3114_v36 = vadd.f32 %v3113_v28, %v6600_v14  ;;  %4053 = vmatmul.msk.f32.gmra.mxu2 %vm3552_vm1, %v3547_v47 }
 0x56e   : > { %3882 = vst.msk [vmem:[%s6650_s16 + $0x58] sm:$0xff] %vm3870_vm2, %v3849_v29  ;;  %v3156_v61 = vmul.f32 %v6775_v53, %v3114_v36  ;;  %v3363_v1 = vpop.f32.mrf.mxu0 }
 0x56f   : > { %v3706_v16 = vpop.f32.mrf.mxu2  ;;  %v3476_v41 = vpop.f32.mrf.mxu1 }
 0x570   : > { %v3188_v7 = vadd.f32 %v3156_v61, %v2828_v34  ;;  %v3782_v14 = vmul.f32 %v6633_v27, %v3706_v16  ;;  %v3477_v48 = vadd.f32 %v3476_v41, %v3363_v1 }
 0x572   : > { %v3548_v30 = vadd.f32 %v3516_v3, %v3188_v7  ;;  %v3818_v23 = vadd.f32 %v6640_v51, %v3782_v14  ;;  %v3517_v60 = vmul.f32 %v6781_v18, %v3477_v48 }
 0x573   : > { %v3116_v6 = vpop.f32.mrf.mxu3 }
 0x574   : > { %v3850_v26 = vmax.f32 %v3818_v23, 0.0  ;;  %v3117_v57 = vadd.f32 %v3116_v6, %v6611_v19  ;;  %4054 = vmatmul.msk.f32.gmra.mxu2 %vm3552_vm1, %v3548_v30 }
 0x576   : > { %3883 = vst.msk [vmem:[%s6650_s16 + $0x60] sm:$0xff] %vm3870_vm2, %v3850_v26  ;;  %v3157_v21 = vmul.f32 %v6775_v53, %v3117_v57  ;;  %v3366_v55 = vpop.f32.mrf.mxu0 }
 0x577   : > { %v3709_v45 = vpop.f32.mrf.mxu2  ;;  %v3479_v12 = vpop.f32.mrf.mxu1 }
 0x578   : > { %v3189_v10 = vadd.f32 %v3157_v21, %v2829_v5  ;;  %v3783_v19 = vmul.f32 %v6633_v27, %v3709_v45  ;;  %v3480_v38 = vadd.f32 %v3479_v12, %v3366_v55 }
 0x57a   : > { %v3549_v44 = vadd.f32 %v3517_v60, %v3189_v10  ;;  %v3819_v0 = vadd.f32 %v6640_v51, %v3783_v19  ;;  %v3518_v11 = vmul.f32 %v6781_v18, %v3480_v38 }
 0x57b   : > { %v3119_v13 = vpop.f32.mrf.mxu3 }
 0x57c   : > { %v3851_v2 = vmax.f32 %v3819_v0, 0.0  ;;  %v3120_v32 = vadd.f32 %v3119_v13, %v6623_v42  ;;  %4055 = vmatmul.msk.f32.gmra.mxu2 %vm3552_vm1, %v3549_v44 }
 0x57e   : > { %3884 = vst.msk [vmem:[%s6650_s16 + $0x68] sm:$0xff] %vm3870_vm2, %v3851_v2  ;;  %v3158_v31 = vmul.f32 %v6775_v53, %v3120_v32 }
 0x57f   : > { %v3712_v33 = vpop.f32.mrf.mxu2 }
 0x580   : > { %v3190_v40 = vadd.f32 %v3158_v31, %v2830_v15  ;;  %v3784_v24 = vmul.f32 %v6633_v27, %v3712_v33 }
 0x582   : > { %v3550_v20 = vadd.f32 %v3518_v11, %v3190_v40  ;;  %v3820_v17 = vadd.f32 %v6640_v51, %v3784_v24 }
 0x584   : > { %v3852_v42 = vmax.f32 %v3820_v17, 0.0  ;;  %4056 = vmatmul.msk.f32.gmra.mxu2 %vm3552_vm1, %v3550_v20 }
 0x586   : > { %3885 = vst.msk [vmem:[%s6650_s16 + $0x70] sm:$0xff] %vm3870_vm2, %v3852_v42 }
 0x587   : > { %v3715_v63 = vpop.f32.mrf.mxu2 }
 0x588   : > { %v3785_v22 = vmul.f32 %v6633_v27, %v3715_v63 }
 0x58a   : > { %v3821_v53 = vadd.f32 %v6640_v51, %v3785_v22 }
 0x58c   : > { %v3853_v18 = vmax.f32 %v3821_v53, 0.0 }
 0x58e   : > { %3886 = vst.msk [vmem:[%s6650_s16 + $0x78] sm:$0xff] %vm3870_vm2, %v3853_v18 }
 0x58f   : > { %v3718_v9 = vpop.f32.mrf.mxu2 }
 0x590   : > { %v3786_v59 = vmul.f32 %v6633_v27, %v3718_v9 }
 0x592   : > { %v3822_v56 = vadd.f32 %v6640_v51, %v3786_v59 }
 0x594   : > { %v3854_v54 = vmax.f32 %v3822_v56, 0.0 }
 0x596   : > { %3887 = vst.msk [vmem:[%s6650_s16 + $0x80] sm:$0xff] %vm3870_vm2, %v3854_v54 }
 0x597   : > { %v3721_v49 = vpop.f32.mrf.mxu2 }
 0x598   : > { %v3787_v52 = vmul.f32 %v6633_v27, %v3721_v49 }
 0x59a   : > { %v3823_v4 = vadd.f32 %v6640_v51, %v3787_v52 }
 0x59c   : > { %v3855_v8 = vmax.f32 %v3823_v4, 0.0 }
 0x59e   : > { %3888 = vst.msk [vmem:[%s6650_s16 + $0x88] sm:$0xff] %vm3870_vm2, %v3855_v8 }
 0x59f   : > { %v3724_v43 = vpop.f32.mrf.mxu2 }
 0x5a0   : > { %v3788_v46 = vmul.f32 %v6633_v27, %v3724_v43 }
 0x5a2   : > { %v3824_v47 = vadd.f32 %v6640_v51, %v3788_v46 }
 0x5a4   : > { %v3856_v37 = vmax.f32 %v3824_v47, 0.0 }
 0x5a6   : > { %3889 = vst.msk [vmem:[%s6650_s16 + $0x90] sm:$0xff] %vm3870_vm2, %v3856_v37 }
 0x5a7   : > { %v3727_v58 = vpop.f32.mrf.mxu2 }
 0x5a8   : > { %v3789_v28 = vmul.f32 %v6633_v27, %v3727_v58 }
 0x5aa   : > { %v3825_v29 = vadd.f32 %v6640_v51, %v3789_v28 }
 0x5ac   : > { %v3857_v36 = vmax.f32 %v3825_v29, 0.0 }
 0x5ae   : > { %3890 = vst.msk [vmem:[%s6650_s16 + $0x98] sm:$0xff] %vm3870_vm2, %v3857_v36 }
 0x5af   : > { %v3730_v34 = vpop.f32.mrf.mxu2 }
 0x5b0   : > { %v3790_v50 = vmul.f32 %v6633_v27, %v3730_v34 }
 0x5b2   : > { %v3826_v61 = vadd.f32 %v6640_v51, %v3790_v50 }
 0x5b4   : > { %v3858_v3 = vmax.f32 %v3826_v61, 0.0 }
 0x5b6   : > { %3891 = vst.msk [vmem:[%s6650_s16 + $0xa0] sm:$0xff] %vm3870_vm2, %v3858_v3 }
 0x5b7   : > { %v3733_v1 = vpop.f32.mrf.mxu2 }
 0x5b8   : > { %v3791_v16 = vmul.f32 %v6633_v27, %v3733_v1 }
 0x5ba   : > { %v3827_v41 = vadd.f32 %v6640_v51, %v3791_v16 }
 0x5bc   : > { %v3859_v7 = vmax.f32 %v3827_v41, 0.0 }
 0x5be   : > { %3892 = vst.msk [vmem:[%s6650_s16 + $0xa8] sm:$0xff] %vm3870_vm2, %v3859_v7 }
 0x5bf   : > { %v3736_v14 = vpop.f32.mrf.mxu2 }
 0x5c0   : > { %v3792_v39 = vmul.f32 %v6633_v27, %v3736_v14 }
 0x5c2   : > { %v3828_v30 = vadd.f32 %v6640_v51, %v3792_v39 }
 0x5c4   : > { %v3860_v23 = vmax.f32 %v3828_v30, 0.0 }
 0x5c6   : > { %3893 = vst.msk [vmem:[%s6650_s16 + $0xb0] sm:$0xff] %vm3870_vm2, %v3860_v23 }
 0x5c7   : > { %v3739_v48 = vpop.f32.mrf.mxu2 }
 0x5c8   : > { %v3793_v6 = vmul.f32 %v6633_v27, %v3739_v48 }
 0x5ca   : > { %v3829_v26 = vadd.f32 %v6640_v51, %v3793_v6 }
 0x5cc   : > { %v3861_v57 = vmax.f32 %v3829_v26, 0.0 }
 0x5ce   : > { %3894 = vst.msk [vmem:[%s6650_s16 + $0xb8] sm:$0xff] %vm3870_vm2, %v3861_v57 }
 0x5cf   : > { %v3742_v5 = vpop.f32.mrf.mxu2 }
 0x5d0   : > { %v3794_v62 = vmul.f32 %v6633_v27, %v3742_v5 }
 0x5d2   : > { %v3830_v21 = vadd.f32 %v6640_v51, %v3794_v62 }
 0x5d4   : > { %v3862_v60 = vmax.f32 %v3830_v21, 0.0 }
 0x5d6   : > { %3895 = vst.msk [vmem:[%s6650_s16 + $0xc0] sm:$0xff] %vm3870_vm2, %v3862_v60 }
 0x5d7   : > { %v3745_v55 = vpop.f32.mrf.mxu2 }
 0x5d8   : > { %v3795_v45 = vmul.f32 %v6633_v27, %v3745_v55 }
 0x5da   : > { %v3831_v12 = vadd.f32 %v6640_v51, %v3795_v45 }
 0x5dc   : > { %v3863_v10 = vmax.f32 %v3831_v12, 0.0 }
 0x5de   : > { %3896 = vst.msk [vmem:[%s6650_s16 + $0xc8] sm:$0xff] %vm3870_vm2, %v3863_v10 }
 0x5df   : > { %v3748_v19 = vpop.f32.mrf.mxu2 }
 0x5e0   : > { %v3796_v25 = vmul.f32 %v6633_v27, %v3748_v19 }
 0x5e2   : > { %v3832_v44 = vadd.f32 %v6640_v51, %v3796_v25 }
 0x5e4   : > { %v3864_v0 = vmax.f32 %v3832_v44, 0.0 }
 0x5e6   : > { %3897 = vst.msk [vmem:[%s6650_s16 + $0xd0] sm:$0xff] %vm3870_vm2, %v3864_v0 }
 0x5e7   : > { %v3751_v38 = vpop.f32.mrf.mxu2 }
 0x5e8   : > { %v3797_v13 = vmul.f32 %v6633_v27, %v3751_v38 }
 0x5ea   : > { %v3833_v2 = vadd.f32 %v6640_v51, %v3797_v13 }
 0x5ec   : > { %v3865_v32 = vmax.f32 %v3833_v2, 0.0 }
 0x5ee   : > { %3898 = vst.msk [vmem:[%s6650_s16 + $0xd8] sm:$0xff] %vm3870_vm2, %v3865_v32 }
 0x5ef   : > { %v3754_v35 = vpop.f32.mrf.mxu2 }
 0x5f0   : > { %v3798_v15 = vmul.f32 %v6633_v27, %v3754_v35 }
 0x5f2   : > { %v3834_v31 = vadd.f32 %v6640_v51, %v3798_v15 }
 0x5f4   : > { %v3866_v11 = vmax.f32 %v3834_v31, 0.0 }
 0x5f6   : > { %3899 = vst.msk [vmem:[%s6650_s16 + $0xe0] sm:$0xff] %vm3870_vm2, %v3866_v11 }
 0x5f7   : > { %v3757_v33 = vpop.f32.mrf.mxu2 }
 0x5f8   : > { %v3799_v40 = vmul.f32 %v6633_v27, %v3757_v33 }
 0x5fa   : > { %v3835_v24 = vadd.f32 %v6640_v51, %v3799_v40 }
 0x5fc   : > { %v3867_v20 = vmax.f32 %v3835_v24, 0.0 }
 0x5fe   : > { %3900 = vst.msk [vmem:[%s6650_s16 + $0xe8] sm:$0xff] %vm3870_vm2, %v3867_v20 }
 0x5ff   : > { %v3760_v17 = vpop.f32.mrf.mxu2 }
 0x600   : > { %v3800_v42 = vmul.f32 %v6633_v27, %v3760_v17 }
 0x602   : > { %v3836_v63 = vadd.f32 %v6640_v51, %v3800_v42 }
 0x604   : > { %v3868_v22 = vmax.f32 %v3836_v63, 0.0 }
 0x606   : > { %3901 = vst.msk [vmem:[%s6650_s16 + $0xf0] sm:$0xff] %vm3870_vm2, %v3868_v22 }
 0x607   : > { %v3763_v53 = vpop.f32.mrf.mxu2 }
 0x608   : > { %v3801_v18 = vmul.f32 %v6633_v27, %v3763_v53 }
 0x60a   : > { %v3837_v9 = vadd.f32 %v6640_v51, %v3801_v18 }
 0x60c   : > { %v3869_v59 = vmax.f32 %v3837_v9, 0.0 }
 0x60e   : > { %3902 = vst.msk [vmem:[%s6650_s16 + $0xf8] sm:$0xff] %vm3870_vm2, %v3869_v59 }
 0x60f PF: > { %s19_s21 = sadd.s32 1, %s4350_s21  }
 0x610   : > { %p16_p7 = scmp.ge.s32.totalorder %s19_s21, 4  }
 0x612   :  { %18 = sbr.rel (!%p16_p7) target bundleno = 3 (0x3), region = 107 }
 0x617   :  { %3924 = vsyncpa [#allocation3], 1 }
 0x618   :  { %3926 = vsyncpa [#allocation3 + $0x1], 1 }
 0x619   :  { %3927 = vsyncpa [#allocation5], 1 }
 0x61a   :  { %3928 = vsyncpa [#allocation8], 1 }

</bundles_post_ra>
